<compile_context>
chip_gen: v5e
topology: v5e:2x2
jax: 0.10.0
libtpu: 0.0.40
codegen_flags: <defaults>
</compile_context>

<pallas_src>
import math

import jax
import jax.numpy as jnp
from jax.experimental import pallas as pl
from jax.experimental.pallas import tpu as pltpu  # noqa: F401  (kept for TPU-specific params)

# ---------------- model dimensions (small, consistent with the module) ----------------
B = 2
IMG_C, IMG_H, IMG_W = 3, 56, 56        # input image, NCHW
FEAT_HW = 7                            # backbone output spatial size -> seq_len = 49
SEQ_LEN = FEAT_HW * FEAT_HW            # 49
IMG_DIM = 128                          # stands in for 2048 (resnet50) / 720 (hrnet_w48)
MODEL_DIM = 128                        # transformer_config['model_dim']
HIDDEN = 256                           # stands in for the 1024-wide fc1 / fc2
NUM_VERTEX = 54                        # mesh (vertex) tokens
NUM_JOINTS = 17
POSE_DIM = NUM_JOINTS * 3              # 51
CODEBOOK = 128                         # VQ codebook size (mesh_logits last dim, autoreg=True)


# ============================ single fused forward kernel ==============================
def _fused_forward_kernel(
        xp_ref, pose_ref, pos_ref,
        wfeat_ref, bfeat_ref,
        headw_ref, headb_ref,
        q_ref, wkv_ref, wo_ref, bo_ref,
        cb_ref, jreg_ref,
        rotcam_ref, logits_ref, idx_ref, meshc_ref, predv_ref, joints_ref):
    f32 = jnp.float32

    # ---- shared backbone channel projection (Cin=3): VPU broadcast FMAs ---------------
    # wfeat = [brot_w | bpose_w @ conv1x1_w]  (3, IMG_DIM+MODEL_DIM); bfeat the matching bias.
    xp = xp_ref[...]                                               # (B, S, 3)
    feat = (xp[:, :, 0:1] * wfeat_ref[0:1, :]
            + xp[:, :, 1:2] * wfeat_ref[1:2, :]
            + xp[:, :, 2:3] * wfeat_ref[2:3, :]
            + bfeat_ref[...])                                      # (B, S, IMG_DIM+MODEL_DIM)

    feat_rot = feat[:, :, :IMG_DIM]                                # backbone_rot features
    memory = feat[:, :, IMG_DIM:] + pos_ref[...]                   # conv_1x1(backbone_pose)+pos

    # ---- rot / cam head: AdaptiveAvgPool2d(1) + composed fc1∘fc2∘[rot|cam] linear ------
    # (dropout is identity at inference; no nonlinearity between the linears -> exact fuse)
    img_enc = jnp.mean(feat_rot, axis=1)                           # (B, IMG_DIM)
    hw = headw_ref[...]                                            # (IMG_DIM + POSE_DIM, 9)
    # torch.cat([img_enc, pose_init], 1) @ W == img_enc @ W[:C] + pose @ W[C:]
    rotcam = (jnp.dot(img_enc, hw[:IMG_DIM, :], preferred_element_type=f32)
              + jnp.dot(pose_ref[...], hw[IMG_DIM:, :], preferred_element_type=f32)
              + headb_ref[...])                                    # (B, 9) = rot(6) | cam(3)
    rotcam_ref[...] = rotcam

    # ---- transformer decoder stand-in + VQ decode + rotation + joint regression --------
    # TODO(synk): stands in for the multi-layer FastMETRO transformer + external VQ decoder.
    q = q_ref[...]                                                 # (V, D), precomputed tok @ Wq
    scale = 1.0 / math.sqrt(MODEL_DIM)
    wkv = wkv_ref[...]                                             # (D, 2D) = [Wk | Wv]
    wo = wo_ref[...]
    bo = bo_ref[...]
    cb = cb_ref[...]                                               # (CODEBOOK, 3)
    jreg = jreg_ref[...]                                           # (J, V)
    ids = jax.lax.broadcasted_iota(jnp.int32, (NUM_VERTEX, CODEBOOK), 1)

    def _normalize(v):
        n = jnp.sqrt(jnp.sum(v * v, axis=-1, keepdims=True))
        return v / jnp.maximum(n, 1e-12)

    def _cross(u, v):
        return jnp.concatenate([
            u[:, 1:2] * v[:, 2:3] - u[:, 2:3] * v[:, 1:2],
            u[:, 2:3] * v[:, 0:1] - u[:, 0:1] * v[:, 2:3],
            u[:, 0:1] * v[:, 1:2] - u[:, 1:2] * v[:, 0:1]], axis=-1)

    for b in range(B):   # static unroll; B is tiny and all weights stay resident in VMEM
        mem_b = memory[b]                                                 # (S, D)
        kv = jnp.dot(mem_b, wkv, preferred_element_type=f32)              # (S, 2D): one 256-lane matmul
        k = kv[:, :MODEL_DIM]
        v = kv[:, MODEL_DIM:]
        s = jax.lax.dot_general(q, k, (((1,), (1,)), ((), ())),
                                preferred_element_type=f32) * scale       # (V, S)
        s = s - jnp.max(s, axis=-1, keepdims=True)
        e = jnp.exp(s)
        p_attn = e / jnp.sum(e, axis=-1, keepdims=True)
        ctx = jnp.dot(p_attn, v, preferred_element_type=f32)              # (V, D)
        logits = jnp.dot(ctx, wo, preferred_element_type=f32) + bo        # (V, CODEBOOK)
        logits_ref[b] = logits

        # torch.argmax(mesh_logits, dim=-1): first maximal index; compare kept in f32.
        mx = jnp.max(logits, axis=-1, keepdims=True)
        masked_ids = jnp.where(logits == mx, ids, CODEBOOK)
        idx1d = jnp.min(masked_ids, axis=-1)                              # (V,), computed once
        idx_ref[b] = idx1d[None, :].astype(jnp.int32)

        # VQ codebook decode fused in-kernel: one-hot(idx) @ codebook -> (V, 3)
        onehot = (ids == idx1d[:, None]).astype(f32)
        meshc = jnp.dot(onehot, cb, preferred_element_type=f32)           # (V, 3)
        meshc_ref[b] = meshc

        # rotation_6d_to_matrix + rotate mesh + 3D joint regression
        r = rotcam[b:b + 1, 0:6]                                          # (1, 6)
        a1 = r[:, 0:3]
        a2 = r[:, 3:6]
        b1 = _normalize(a1)
        b2 = _normalize(a2 - jnp.sum(b1 * a2, axis=-1, keepdims=True) * b1)
        b3 = _cross(b1, b2)
        rot = jnp.concatenate([b1, b2, b3], axis=0)                       # (3, 3), rows b1|b2|b3
        # pred_v = (R @ mesh^T)^T == mesh @ R^T
        pv = jax.lax.dot_general(meshc, rot, (((1,), (1,)), ((), ())),
                                 preferred_element_type=f32)              # (V, 3)
        predv_ref[b] = pv
        joints_ref[b] = jnp.dot(jreg, pv, preferred_element_type=f32)     # (J, 3)


# ================================ plain-JAX glue ========================================
def sine_position_encoding(h, w, d, temperature=10000.0):
    # DETR-style sine positional encoding (build_position_encoding(pos_type='sine')).
    npf = d // 2
    ys = (jnp.arange(1, h + 1, dtype=jnp.float32) / h) * (2.0 * math.pi)
    xs = (jnp.arange(1, w + 1, dtype=jnp.float32) / w) * (2.0 * math.pi)
    dim_t = temperature ** (2.0 * jnp.floor(jnp.arange(npf, dtype=jnp.float32) / 2.0) / npf)
    px = xs[:, None] / dim_t[None, :]
    py = ys[:, None] / dim_t[None, :]
    px = jnp.stack([jnp.sin(px[:, 0::2]), jnp.cos(px[:, 1::2])], axis=-1).reshape(w, npf)
    py = jnp.stack([jnp.sin(py[:, 0::2]), jnp.cos(py[:, 1::2])], axis=-1).reshape(h, npf)
    pos = jnp.concatenate([jnp.broadcast_to(py[:, None, :], (h, w, npf)),
                           jnp.broadcast_to(px[None, :, :], (h, w, npf))], axis=-1)
    return pos.reshape(h * w, d)                                          # (S, D)


def init_params(key):
    ks = jax.random.split(key, 16)

    def g(k, shape, scale=0.02):
        return scale * jax.random.normal(k, shape, jnp.float32)

    z = lambda shape: jnp.zeros(shape, jnp.float32)
    return {
        # backbone stand-ins (channel projections of the pooled image)
        'brot_w': g(ks[0], (IMG_C, IMG_DIM)), 'brot_b': z((1, IMG_DIM)),
        'bpose_w': g(ks[1], (IMG_C, IMG_DIM)), 'bpose_b': z((1, IMG_DIM)),
        # conv_1x1 = nn.Conv2d(img_dim, model_dim, 1); weight stored as (Cin, Cout)
        'conv1x1_w': g(ks[2], (IMG_DIM, MODEL_DIM)), 'conv1x1_b': g(ks[3], (1, MODEL_DIM)),
        # fc1 / fc2 / rot_predictor / cam_predictor (Linear weights stored transposed)
        'fc1_w': g(ks[4], (IMG_DIM + POSE_DIM, HIDDEN)), 'fc1_b': z((1, HIDDEN)),
        'fc2_w': g(ks[5], (HIDDEN, HIDDEN)), 'fc2_b': z((1, HIDDEN)),
        'rot_w': g(ks[6], (HIDDEN, 6)), 'rot_b': z((1, 6)),
        'cam_w': g(ks[7], (HIDDEN, 3)), 'cam_b': z((1, 3)),
        # nn.Embedding(num_vertex, model_dim)
        'mesh_token_embed': g(ks[8], (NUM_VERTEX, MODEL_DIM), 1.0),
        # transformer stand-in weights
        'wq': g(ks[9], (MODEL_DIM, MODEL_DIM)), 'wk': g(ks[10], (MODEL_DIM, MODEL_DIM)),
        'wv': g(ks[11], (MODEL_DIM, MODEL_DIM)),
        'wo': g(ks[12], (MODEL_DIM, CODEBOOK)), 'bo': z((1, CODEBOOK)),
        # VQ mesh-decoder codebook stand-in (index -> 3D vertex)
        'codebook': g(ks[13], (CODEBOOK, 3), 1.0),
    }


def prepare_fused_params(p):
    """One-time exact algebraic composition / concatenation of weights + constant pos-enc."""
    pf = {}
    # compose backbone_pose -> conv_1x1 and concat with backbone_rot: (3, IMG_DIM + MODEL_DIM)
    pf['wfeat'] = jnp.concatenate([p['brot_w'], p['bpose_w'] @ p['conv1x1_w']], axis=1)
    pf['bfeat'] = jnp.concatenate(
        [p['brot_b'], p['bpose_b'] @ p['conv1x1_w'] + p['conv1x1_b']], axis=1)
    # fc1 -> drop -> fc2 -> drop -> [rot|cam]: no nonlinearity, dropout=identity at inference
    # => one (IMG_DIM+POSE_DIM, 9) linear.  Cuts ~440 KB of fc weight DMA + 2 matmuls.
    wrc = jnp.concatenate([p['rot_w'], p['cam_w']], axis=1)                 # (HIDDEN, 9)
    brc = jnp.concatenate([p['rot_b'], p['cam_b']], axis=1)                 # (1, 9)
    pf['head_w'] = p['fc1_w'] @ p['fc2_w'] @ wrc                            # (IMG_DIM+POSE_DIM, 9)
    pf['head_b'] = (p['fc1_b'] @ p['fc2_w'] + p['fc2_b']) @ wrc + brc       # (1, 9)
    # q = mesh_token_embed @ Wq is input independent -> precompute once
    pf['q_const'] = p['mesh_token_embed'] @ p['wq']                         # (V, D)
    # pack k|v so the per-batch KV projection is one 256-lane-wide matmul
    pf['wkv'] = jnp.concatenate([p['wk'], p['wv']], axis=1)                 # (D, 2D)
    pf['wo'] = p['wo']
    pf['bo'] = p['bo']
    pf['codebook'] = p['codebook']
    # positional encoding is input independent: build once
    pf['pos_enc'] = sine_position_encoding(FEAT_HW, FEAT_HW, MODEL_DIM)     # (S, D)
    return pf


def mesh_regressor_forward(pf, img, pose_init, joints_reg):
    Bn, C, H, W = img.shape
    ph, pw = H // FEAT_HW, W // FEAT_HW
    # TODO(synk): backbone_pose / backbone_rot are external pretrained CNNs (ResNet50 /
    # HRNet-W48); stood in with a single shared average-pool to 7x7 (XLA glue) + in-kernel
    # channel projection.  The transformer and VQ mesh decoder are stood in inside the kernel.
    xp = img.reshape(Bn, C, FEAT_HW, ph, FEAT_HW, pw).mean(axis=(3, 5))     # (B, 3, 7, 7)
    xp = xp.transpose(0, 2, 3, 1).reshape(Bn, SEQ_LEN, C)                   # (B, 49, 3)

    rotcam, mesh_logits, idx3, mesh_canonical, pred_v, joints3d = pl.pallas_call(
        _fused_forward_kernel,
        out_shape=(
            jax.ShapeDtypeStruct((Bn, 9), jnp.float32),                     # rot(6) | cam(3) packed
            jax.ShapeDtypeStruct((Bn, NUM_VERTEX, CODEBOOK), jnp.float32),  # mesh logits
            jax.ShapeDtypeStruct((Bn, 1, NUM_VERTEX), jnp.int32),           # argmax indices
            jax.ShapeDtypeStruct((Bn, NUM_VERTEX, 3), jnp.float32),         # canonical mesh
            jax.ShapeDtypeStruct((Bn, NUM_VERTEX, 3), jnp.float32),         # rotated mesh
            jax.ShapeDtypeStruct((Bn, NUM_JOINTS, 3), jnp.float32),         # regressed 3D joints
        ),
    )(xp, pose_init, pf['pos_enc'],
      pf['wfeat'], pf['bfeat'],
      pf['head_w'], pf['head_b'],
      pf['q_const'], pf['wkv'], pf['wo'], pf['bo'],
      pf['codebook'], joints_reg)

    pred_rot = rotcam[:, 0:6]
    pred_cam = rotcam[:, 6:9]
    mesh_indices = idx3[:, 0, :]
    _pose_next = joints3d.reshape(-1, POSE_DIM)   # matmul(J_reg, pred_v).reshape(-1, 51)

    return {
        'prob_indices': mesh_logits,
        'pred_indices': mesh_indices,
        'pred_mesh_canonical': mesh_canonical,
        'pred_mesh': pred_v,
        'pred_rot': pred_rot,
        'pred_cam': pred_cam,
    }


if __name__ == "__main__":
    key = jax.random.PRNGKey(0)
    k_img, k_pose, k_jreg, k_params = jax.random.split(key, 4)
    img = jax.random.normal(k_img, (B, IMG_C, IMG_H, IMG_W), jnp.float32)
    pose_init = 0.1 * jax.random.normal(k_pose, (B, POSE_DIM), jnp.float32)
    joints_reg = jax.random.uniform(k_jreg, (NUM_JOINTS, NUM_VERTEX), jnp.float32)
    joints_reg = joints_reg / jnp.sum(joints_reg, axis=-1, keepdims=True)
    params = init_params(k_params)
    fused_params = prepare_fused_params(params)       # one-time weight composition

    fwd = jax.jit(mesh_regressor_forward)
    out = fwd(fused_params, img, pose_init, joints_reg)
    jax.block_until_ready(out)

    assert out['prob_indices'].shape == (B, NUM_VERTEX, CODEBOOK)
    assert out['pred_indices'].shape == (B, NUM_VERTEX)
    assert out['pred_mesh_canonical'].shape == (B, NUM_VERTEX, 3)
    assert out['pred_mesh'].shape == (B, NUM_VERTEX, 3)
    assert out['pred_rot'].shape == (B, 6)
    assert out['pred_cam'].shape == (B, 3)
    print("KERNEL_OK")
</pallas_src>

<mosaic_0001>
module attributes {stable_mosaic.version = 11 : i64} {
  func.func @_fused_forward_kernel(%arg0: memref<2x49x3xf32, #tpu.memory_space<vmem>>, %arg1: memref<2x51xf32, #tpu.memory_space<vmem>>, %arg2: memref<49x128xf32, #tpu.memory_space<vmem>>, %arg3: memref<3x256xf32, #tpu.memory_space<vmem>>, %arg4: memref<1x256xf32, #tpu.memory_space<vmem>>, %arg5: memref<179x9xf32, #tpu.memory_space<vmem>>, %arg6: memref<1x9xf32, #tpu.memory_space<vmem>>, %arg7: memref<54x128xf32, #tpu.memory_space<vmem>>, %arg8: memref<128x256xf32, #tpu.memory_space<vmem>>, %arg9: memref<128x128xf32, #tpu.memory_space<vmem>>, %arg10: memref<1x128xf32, #tpu.memory_space<vmem>>, %arg11: memref<128x3xf32, #tpu.memory_space<vmem>>, %arg12: memref<17x54xf32, #tpu.memory_space<vmem>>, %arg13: memref<2x9xf32, #tpu.memory_space<vmem>>, %arg14: memref<2x54x128xf32, #tpu.memory_space<vmem>>, %arg15: memref<2x1x54xi32, #tpu.memory_space<vmem>>, %arg16: memref<2x54x3xf32, #tpu.memory_space<vmem>>, %arg17: memref<2x54x3xf32, #tpu.memory_space<vmem>>, %arg18: memref<2x17x3xf32, #tpu.memory_space<vmem>>) attributes {dimension_semantics = [], scalar_prefetch = 0 : i64, scratch_operands = 0 : i64, tpu.core_type = #tpu.core_type<tc>} {
    %c0 = arith.constant 0 : index
    %c0_0 = arith.constant 0 : index
    %c0_1 = arith.constant 0 : index
    %0 = vector.load %arg0[%c0, %c0_0, %c0_1] : memref<2x49x3xf32, #tpu.memory_space<vmem>>, vector<2x49x3xf32>
    %1 = vector.extract_strided_slice %0 {offsets = [0, 0, 0], sizes = [2, 49, 1], strides = [1, 1, 1]} : vector<2x49x3xf32> to vector<2x49x1xf32>
    %c0_2 = arith.constant 0 : index
    %c0_3 = arith.constant 0 : index
    %2 = vector.load %arg3[%c0_2, %c0_3] : memref<3x256xf32, #tpu.memory_space<vmem>>, vector<1x256xf32>
    %3 = vector.shape_cast %2 : vector<1x256xf32> to vector<1x1x256xf32>
    %4 = vector.broadcast %1 : vector<2x49x1xf32> to vector<2x49x256xf32>
    %5 = vector.broadcast %3 : vector<1x1x256xf32> to vector<2x49x256xf32>
    %6 = arith.mulf %4, %5 : vector<2x49x256xf32>
    %7 = vector.extract_strided_slice %0 {offsets = [0, 0, 1], sizes = [2, 49, 1], strides = [1, 1, 1]} : vector<2x49x3xf32> to vector<2x49x1xf32>
    %c1 = arith.constant 1 : index
    %c0_4 = arith.constant 0 : index
    %8 = vector.load %arg3[%c1, %c0_4] : memref<3x256xf32, #tpu.memory_space<vmem>>, vector<1x256xf32>
    %9 = vector.shape_cast %8 : vector<1x256xf32> to vector<1x1x256xf32>
    %10 = vector.broadcast %7 : vector<2x49x1xf32> to vector<2x49x256xf32>
    %11 = vector.broadcast %9 : vector<1x1x256xf32> to vector<2x49x256xf32>
    %12 = arith.mulf %10, %11 : vector<2x49x256xf32>
    %13 = arith.addf %6, %12 : vector<2x49x256xf32>
    %14 = vector.extract_strided_slice %0 {offsets = [0, 0, 2], sizes = [2, 49, 1], strides = [1, 1, 1]} : vector<2x49x3xf32> to vector<2x49x1xf32>
    %c2 = arith.constant 2 : index
    %c0_5 = arith.constant 0 : index
    %15 = vector.load %arg3[%c2, %c0_5] : memref<3x256xf32, #tpu.memory_space<vmem>>, vector<1x256xf32>
    %16 = vector.shape_cast %15 : vector<1x256xf32> to vector<1x1x256xf32>
    %17 = vector.broadcast %14 : vector<2x49x1xf32> to vector<2x49x256xf32>
    %18 = vector.broadcast %16 : vector<1x1x256xf32> to vector<2x49x256xf32>
    %19 = arith.mulf %17, %18 : vector<2x49x256xf32>
    %20 = arith.addf %13, %19 : vector<2x49x256xf32>
    %c0_6 = arith.constant 0 : index
    %c0_7 = arith.constant 0 : index
    %21 = vector.load %arg4[%c0_6, %c0_7] : memref<1x256xf32, #tpu.memory_space<vmem>>, vector<1x256xf32>
    %22 = vector.shape_cast %21 : vector<1x256xf32> to vector<1x1x256xf32>
    %23 = vector.broadcast %22 : vector<1x1x256xf32> to vector<2x49x256xf32>
    %24 = arith.addf %20, %23 : vector<2x49x256xf32>
    %25 = vector.extract_strided_slice %24 {offsets = [0, 0, 0], sizes = [2, 49, 128], strides = [1, 1, 1]} : vector<2x49x256xf32> to vector<2x49x128xf32>
    %26 = vector.extract_strided_slice %24 {offsets = [0, 0, 128], sizes = [2, 49, 128], strides = [1, 1, 1]} : vector<2x49x256xf32> to vector<2x49x128xf32>
    %c0_8 = arith.constant 0 : index
    %c0_9 = arith.constant 0 : index
    %27 = vector.load %arg2[%c0_8, %c0_9] : memref<49x128xf32, #tpu.memory_space<vmem>>, vector<49x128xf32>
    %28 = vector.shape_cast %27 : vector<49x128xf32> to vector<1x49x128xf32>
    %29 = vector.broadcast %28 : vector<1x49x128xf32> to vector<2x49x128xf32>
    %30 = arith.addf %26, %29 : vector<2x49x128xf32>
    %cst = arith.constant dense<0.000000e+00> : vector<2x128xf32>
    %31 = vector.multi_reduction <add>, %25, %cst [1] : vector<2x49x128xf32> to vector<2x128xf32>
    %cst_10 = arith.constant 4.900000e+01 : f32
    %32 = vector.broadcast %cst_10 : f32 to vector<2x128xf32>
    %33 = arith.divf %31, %32 : vector<2x128xf32>
    %c0_11 = arith.constant 0 : index
    %c0_12 = arith.constant 0 : index
    %34 = vector.load %arg5[%c0_11, %c0_12] : memref<179x9xf32, #tpu.memory_space<vmem>>, vector<179x9xf32>
    %35 = vector.extract_strided_slice %34 {offsets = [0, 0], sizes = [128, 9], strides = [1, 1]} : vector<179x9xf32> to vector<128x9xf32>
    %cst_13 = arith.constant dense<0.000000e+00> : vector<2x9xf32>
    %36 = tpu.matmul %33, %35, %cst_13 {dimension_numbers = #tpu.dot_dimension_numbers<[1], [0], [0], [1], [0, 0, 1, 1], [], []>} : vector<2x128xf32>, vector<128x9xf32>, vector<2x9xf32> -> vector<2x9xf32>
    %c0_14 = arith.constant 0 : index
    %c0_15 = arith.constant 0 : index
    %37 = vector.load %arg1[%c0_14, %c0_15] : memref<2x51xf32, #tpu.memory_space<vmem>>, vector<2x51xf32>
    %38 = vector.extract_strided_slice %34 {offsets = [128, 0], sizes = [51, 9], strides = [1, 1]} : vector<179x9xf32> to vector<51x9xf32>
    %cst_16 = arith.constant dense<0.000000e+00> : vector<2x9xf32>
    %39 = tpu.matmul %37, %38, %cst_16 {dimension_numbers = #tpu.dot_dimension_numbers<[1], [0], [0], [1], [0, 0, 1, 1], [], []>} : vector<2x51xf32>, vector<51x9xf32>, vector<2x9xf32> -> vector<2x9xf32>
    %40 = arith.addf %36, %39 : vector<2x9xf32>
    %c0_17 = arith.constant 0 : index
    %c0_18 = arith.constant 0 : index
    %41 = vector.load %arg6[%c0_17, %c0_18] : memref<1x9xf32, #tpu.memory_space<vmem>>, vector<1x9xf32>
    %42 = vector.broadcast %41 : vector<1x9xf32> to vector<2x9xf32>
    %43 = arith.addf %40, %42 : vector<2x9xf32>
    %c0_19 = arith.constant 0 : index
    %c0_20 = arith.constant 0 : index
    %44 = vector.load %arg13[%c0_19, %c0_20] : memref<2x9xf32, #tpu.memory_space<vmem>>, vector<2x9xf32>
    tpu.vector_store %arg13[%c0_19, %c0_20], %43 {strides = array<i32>} : memref<2x9xf32, #tpu.memory_space<vmem>>, vector<2x9xf32>,
    %c0_21 = arith.constant 0 : index
    %c0_22 = arith.constant 0 : index
    %45 = vector.load %arg7[%c0_21, %c0_22] : memref<54x128xf32, #tpu.memory_space<vmem>>, vector<54x128xf32>
    %c0_23 = arith.constant 0 : index
    %c0_24 = arith.constant 0 : index
    %46 = vector.load %arg8[%c0_23, %c0_24] : memref<128x256xf32, #tpu.memory_space<vmem>>, vector<128x256xf32>
    %c0_25 = arith.constant 0 : index
    %c0_26 = arith.constant 0 : index
    %47 = vector.load %arg9[%c0_25, %c0_26] : memref<128x128xf32, #tpu.memory_space<vmem>>, vector<128x128xf32>
    %c0_27 = arith.constant 0 : index
    %c0_28 = arith.constant 0 : index
    %48 = vector.load %arg10[%c0_27, %c0_28] : memref<1x128xf32, #tpu.memory_space<vmem>>, vector<1x128xf32>
    %c0_29 = arith.constant 0 : index
    %c0_30 = arith.constant 0 : index
    %49 = vector.load %arg11[%c0_29, %c0_30] : memref<128x3xf32, #tpu.memory_space<vmem>>, vector<128x3xf32>
    %c0_31 = arith.constant 0 : index
    %c0_32 = arith.constant 0 : index
    %50 = vector.load %arg12[%c0_31, %c0_32] : memref<17x54xf32, #tpu.memory_space<vmem>>, vector<17x54xf32>
    %51 = tpu.iota {dimensions = array<i32: 1>} : vector<54x128xi32>
    %52 = vector.extract_strided_slice %30 {offsets = [0, 0, 0], sizes = [1, 49, 128], strides = [1, 1, 1]} : vector<2x49x128xf32> to vector<1x49x128xf32>
    %53 = vector.shape_cast %52 : vector<1x49x128xf32> to vector<49x128xf32>
    %cst_33 = arith.constant dense<0.000000e+00> : vector<49x256xf32>
    %54 = tpu.matmul %53, %46, %cst_33 {dimension_numbers = #tpu.dot_dimension_numbers<[1], [0], [0], [1], [0, 0, 1, 1], [], []>} : vector<49x128xf32>, vector<128x256xf32>, vector<49x256xf32> -> vector<49x256xf32>
    %55 = vector.extract_strided_slice %54 {offsets = [0, 0], sizes = [49, 128], strides = [1, 1]} : vector<49x256xf32> to vector<49x128xf32>
    %56 = vector.extract_strided_slice %54 {offsets = [0, 128], sizes = [49, 128], strides = [1, 1]} : vector<49x256xf32> to vector<49x128xf32>
    %cst_34 = arith.constant dense<0.000000e+00> : vector<54x49xf32>
    %57 = tpu.matmul %45, %55, %cst_34 {dimension_numbers = #tpu.dot_dimension_numbers<[1], [1], [0], [0], [0, 0, 1, 0], [], []>} : vector<54x128xf32>, vector<49x128xf32>, vector<54x49xf32> -> vector<54x49xf32>
    %cst_35 = arith.constant 0.0883883461 : f32
    %58 = vector.broadcast %cst_35 : f32 to vector<54x49xf32>
    %59 = arith.mulf %57, %58 : vector<54x49xf32>
    %cst_36 = arith.constant dense<0xFF800000> : vector<54xf32>
    %60 = vector.multi_reduction <maximumf>, %59, %cst_36 [1] : vector<54x49xf32> to vector<54xf32>
    %61 = vector.shape_cast %60 : vector<54xf32> to vector<54x1xf32>
    %62 = vector.broadcast %61 : vector<54x1xf32> to vector<54x49xf32>
    %63 = arith.subf %59, %62 : vector<54x49xf32>
    %64 = math.exp %63 : vector<54x49xf32>
    %cst_37 = arith.constant dense<0.000000e+00> : vector<54xf32>
    %65 = vector.multi_reduction <add>, %64, %cst_37 [1] : vector<54x49xf32> to vector<54xf32>
    %66 = vector.shape_cast %65 : vector<54xf32> to vector<54x1xf32>
    %67 = vector.broadcast %66 : vector<54x1xf32> to vector<54x49xf32>
    %68 = arith.divf %64, %67 : vector<54x49xf32>
    %cst_38 = arith.constant dense<0.000000e+00> : vector<54x128xf32>
    %69 = tpu.matmul %68, %56, %cst_38 {dimension_numbers = #tpu.dot_dimension_numbers<[1], [0], [0], [1], [0, 0, 1, 1], [], []>} : vector<54x49xf32>, vector<49x128xf32>, vector<54x128xf32> -> vector<54x128xf32>
    %cst_39 = arith.constant dense<0.000000e+00> : vector<54x128xf32>
    %70 = tpu.matmul %69, %47, %cst_39 {dimension_numbers = #tpu.dot_dimension_numbers<[1], [0], [0], [1], [0, 0, 1, 1], [], []>} : vector<54x128xf32>, vector<128x128xf32>, vector<54x128xf32> -> vector<54x128xf32>
    %71 = vector.broadcast %48 : vector<1x128xf32> to vector<54x128xf32>
    %72 = arith.addf %70, %71 : vector<54x128xf32>
    %c0_40 = arith.constant 0 : index
    %c0_41 = arith.constant 0 : index
    %c0_42 = arith.constant 0 : index
    %73 = vector.load %arg14[%c0_40, %c0_41, %c0_42] : memref<2x54x128xf32, #tpu.memory_space<vmem>>, vector<1x54x128xf32>
    %74 = vector.shape_cast %73 : vector<1x54x128xf32> to vector<54x128xf32>
    %75 = vector.shape_cast %72 : vector<54x128xf32> to vector<1x54x128xf32>
    tpu.vector_store %arg14[%c0_40, %c0_41, %c0_42], %75 {strides = array<i32>} : memref<2x54x128xf32, #tpu.memory_space<vmem>>, vector<1x54x128xf32>,
    %cst_43 = arith.constant dense<0xFF800000> : vector<54xf32>
    %76 = vector.multi_reduction <maximumf>, %72, %cst_43 [1] : vector<54x128xf32> to vector<54xf32>
    %77 = vector.shape_cast %76 : vector<54xf32> to vector<54x1xf32>
    %78 = vector.broadcast %77 : vector<54x1xf32> to vector<54x128xf32>
    %79 = arith.cmpf oeq, %72, %78 : vector<54x128xf32>
    %c128_i32 = arith.constant 128 : i32
    %80 = vector.broadcast %c128_i32 : i32 to vector<54x128xi32>
    %81 = arith.select %79, %51, %80 : vector<54x128xi1>, vector<54x128xi32>
    %cst_44 = arith.constant dense<2147483647> : vector<54xi32>
    %82 = vector.multi_reduction <minsi>, %81, %cst_44 [1] : vector<54x128xi32> to vector<54xi32>
    %83 = vector.shape_cast %82 : vector<54xi32> to vector<1x54xi32>
    %c0_45 = arith.constant 0 : index
    %c0_46 = arith.constant 0 : index
    %c0_47 = arith.constant 0 : index
    %84 = vector.load %arg15[%c0_45, %c0_46, %c0_47] : memref<2x1x54xi32, #tpu.memory_space<vmem>>, vector<1x1x54xi32>
    %85 = vector.shape_cast %84 : vector<1x1x54xi32> to vector<1x54xi32>
    %86 = vector.shape_cast %83 : vector<1x54xi32> to vector<1x1x54xi32>
    tpu.vector_store %arg15[%c0_45, %c0_46, %c0_47], %86 {strides = array<i32>} : memref<2x1x54xi32, #tpu.memory_space<vmem>>, vector<1x1x54xi32>,
    %87 = vector.shape_cast %82 : vector<54xi32> to vector<54x1xi32>
    %88 = vector.broadcast %87 : vector<54x1xi32> to vector<54x128xi32>
    %89 = arith.cmpi eq, %51, %88 : vector<54x128xi32>
    %90 = arith.extui %89 : vector<54x128xi1> to vector<54x128xi32>
    %91 = arith.sitofp %90 : vector<54x128xi32> to vector<54x128xf32>
    %cst_48 = arith.constant dense<0.000000e+00> : vector<54x3xf32>
    %92 = tpu.matmul %91, %49, %cst_48 {dimension_numbers = #tpu.dot_dimension_numbers<[1], [0], [0], [1], [0, 0, 1, 1], [], []>} : vector<54x128xf32>, vector<128x3xf32>, vector<54x3xf32> -> vector<54x3xf32>
    %c0_49 = arith.constant 0 : index
    %c0_50 = arith.constant 0 : index
    %c0_51 = arith.constant 0 : index
    %93 = vector.load %arg16[%c0_49, %c0_50, %c0_51] : memref<2x54x3xf32, #tpu.memory_space<vmem>>, vector<1x54x3xf32>
    %94 = vector.shape_cast %93 : vector<1x54x3xf32> to vector<54x3xf32>
    %95 = vector.shape_cast %92 : vector<54x3xf32> to vector<1x54x3xf32>
    tpu.vector_store %arg16[%c0_49, %c0_50, %c0_51], %95 {strides = array<i32>} : memref<2x54x3xf32, #tpu.memory_space<vmem>>, vector<1x54x3xf32>,
    %96 = vector.extract_strided_slice %43 {offsets = [0, 0], sizes = [1, 6], strides = [1, 1]} : vector<2x9xf32> to vector<1x6xf32>
    %97 = vector.extract_strided_slice %96 {offsets = [0, 0], sizes = [1, 3], strides = [1, 1]} : vector<1x6xf32> to vector<1x3xf32>
    %98 = vector.extract_strided_slice %96 {offsets = [0, 3], sizes = [1, 3], strides = [1, 1]} : vector<1x6xf32> to vector<1x3xf32>
    %99 = arith.mulf %97, %97 : vector<1x3xf32>
    %cst_52 = arith.constant dense<0.000000e+00> : vector<1xf32>
    %100 = vector.multi_reduction <add>, %99, %cst_52 [1] : vector<1x3xf32> to vector<1xf32>
    %101 = vector.shape_cast %100 : vector<1xf32> to vector<1x1xf32>
    %102 = math.sqrt %101 : vector<1x1xf32>
    %cst_53 = arith.constant 9.99999996E-13 : f32
    %103 = vector.broadcast %cst_53 : f32 to vector<1x1xf32>
    %104 = arith.maximumf %102, %103 : vector<1x1xf32>
    %105 = vector.broadcast %104 : vector<1x1xf32> to vector<1x3xf32>
    %106 = arith.divf %97, %105 : vector<1x3xf32>
    %107 = arith.mulf %106, %98 : vector<1x3xf32>
    %cst_54 = arith.constant dense<0.000000e+00> : vector<1xf32>
    %108 = vector.multi_reduction <add>, %107, %cst_54 [1] : vector<1x3xf32> to vector<1xf32>
    %109 = vector.shape_cast %108 : vector<1xf32> to vector<1x1xf32>
    %110 = vector.broadcast %109 : vector<1x1xf32> to vector<1x3xf32>
    %111 = arith.mulf %110, %106 : vector<1x3xf32>
    %112 = arith.subf %98, %111 : vector<1x3xf32>
    %113 = arith.mulf %112, %112 : vector<1x3xf32>
    %cst_55 = arith.constant dense<0.000000e+00> : vector<1xf32>
    %114 = vector.multi_reduction <add>, %113, %cst_55 [1] : vector<1x3xf32> to vector<1xf32>
    %115 = vector.shape_cast %114 : vector<1xf32> to vector<1x1xf32>
    %116 = math.sqrt %115 : vector<1x1xf32>
    %cst_56 = arith.constant 9.99999996E-13 : f32
    %117 = vector.broadcast %cst_56 : f32 to vector<1x1xf32>
    %118 = arith.maximumf %116, %117 : vector<1x1xf32>
    %119 = vector.broadcast %118 : vector<1x1xf32> to vector<1x3xf32>
    %120 = arith.divf %112, %119 : vector<1x3xf32>
    %121 = vector.extract_strided_slice %106 {offsets = [0, 1], sizes = [1, 1], strides = [1, 1]} : vector<1x3xf32> to vector<1x1xf32>
    %122 = vector.extract_strided_slice %120 {offsets = [0, 2], sizes = [1, 1], strides = [1, 1]} : vector<1x3xf32> to vector<1x1xf32>
    %123 = arith.mulf %121, %122 : vector<1x1xf32>
    %124 = vector.extract_strided_slice %106 {offsets = [0, 2], sizes = [1, 1], strides = [1, 1]} : vector<1x3xf32> to vector<1x1xf32>
    %125 = vector.extract_strided_slice %120 {offsets = [0, 1], sizes = [1, 1], strides = [1, 1]} : vector<1x3xf32> to vector<1x1xf32>
    %126 = arith.mulf %124, %125 : vector<1x1xf32>
    %127 = arith.subf %123, %126 : vector<1x1xf32>
    %128 = vector.extract_strided_slice %106 {offsets = [0, 2], sizes = [1, 1], strides = [1, 1]} : vector<1x3xf32> to vector<1x1xf32>
    %129 = vector.extract_strided_slice %120 {offsets = [0, 0], sizes = [1, 1], strides = [1, 1]} : vector<1x3xf32> to vector<1x1xf32>
    %130 = arith.mulf %128, %129 : vector<1x1xf32>
    %131 = vector.extract_strided_slice %106 {offsets = [0, 0], sizes = [1, 1], strides = [1, 1]} : vector<1x3xf32> to vector<1x1xf32>
    %132 = vector.extract_strided_slice %120 {offsets = [0, 2], sizes = [1, 1], strides = [1, 1]} : vector<1x3xf32> to vector<1x1xf32>
    %133 = arith.mulf %131, %132 : vector<1x1xf32>
    %134 = arith.subf %130, %133 : vector<1x1xf32>
    %135 = vector.extract_strided_slice %106 {offsets = [0, 0], sizes = [1, 1], strides = [1, 1]} : vector<1x3xf32> to vector<1x1xf32>
    %136 = vector.extract_strided_slice %120 {offsets = [0, 1], sizes = [1, 1], strides = [1, 1]} : vector<1x3xf32> to vector<1x1xf32>
    %137 = arith.mulf %135, %136 : vector<1x1xf32>
    %138 = vector.extract_strided_slice %106 {offsets = [0, 1], sizes = [1, 1], strides = [1, 1]} : vector<1x3xf32> to vector<1x1xf32>
    %139 = vector.extract_strided_slice %120 {offsets = [0, 0], sizes = [1, 1], strides = [1, 1]} : vector<1x3xf32> to vector<1x1xf32>
    %140 = arith.mulf %138, %139 : vector<1x1xf32>
    %141 = arith.subf %137, %140 : vector<1x1xf32>
    %142 = tpu.concatenate %127, %134, %141 in 1 : vector<1x1xf32>, vector<1x1xf32>, vector<1x1xf32> -> vector<1x3xf32>
    %143 = tpu.concatenate %106, %120, %142 in 0 : vector<1x3xf32>, vector<1x3xf32>, vector<1x3xf32> -> vector<3x3xf32>
    %cst_57 = arith.constant dense<0.000000e+00> : vector<54x3xf32>
    %144 = tpu.matmul %92, %143, %cst_57 {dimension_numbers = #tpu.dot_dimension_numbers<[1], [1], [0], [0], [0, 0, 1, 0], [], []>} : vector<54x3xf32>, vector<3x3xf32>, vector<54x3xf32> -> vector<54x3xf32>
    %c0_58 = arith.constant 0 : index
    %c0_59 = arith.constant 0 : index
    %c0_60 = arith.constant 0 : index
    %145 = vector.load %arg17[%c0_58, %c0_59, %c0_60] : memref<2x54x3xf32, #tpu.memory_space<vmem>>, vector<1x54x3xf32>
    %146 = vector.shape_cast %145 : vector<1x54x3xf32> to vector<54x3xf32>
    %147 = vector.shape_cast %144 : vector<54x3xf32> to vector<1x54x3xf32>
    tpu.vector_store %arg17[%c0_58, %c0_59, %c0_60], %147 {strides = array<i32>} : memref<2x54x3xf32, #tpu.memory_space<vmem>>, vector<1x54x3xf32>,
    %cst_61 = arith.constant dense<0.000000e+00> : vector<17x3xf32>
    %148 = tpu.matmul %50, %144, %cst_61 {dimension_numbers = #tpu.dot_dimension_numbers<[1], [0], [0], [1], [0, 0, 1, 1], [], []>} : vector<17x54xf32>, vector<54x3xf32>, vector<17x3xf32> -> vector<17x3xf32>
    %c0_62 = arith.constant 0 : index
    %c0_63 = arith.constant 0 : index
    %c0_64 = arith.constant 0 : index
    %149 = vector.load %arg18[%c0_62, %c0_63, %c0_64] : memref<2x17x3xf32, #tpu.memory_space<vmem>>, vector<1x17x3xf32>
    %150 = vector.shape_cast %149 : vector<1x17x3xf32> to vector<17x3xf32>
    %151 = vector.shape_cast %148 : vector<17x3xf32> to vector<1x17x3xf32>
    tpu.vector_store %arg18[%c0_62, %c0_63, %c0_64], %151 {strides = array<i32>} : memref<2x17x3xf32, #tpu.memory_space<vmem>>, vector<1x17x3xf32>,
    %152 = vector.extract_strided_slice %30 {offsets = [1, 0, 0], sizes = [1, 49, 128], strides = [1, 1, 1]} : vector<2x49x128xf32> to vector<1x49x128xf32>
    %153 = vector.shape_cast %152 : vector<1x49x128xf32> to vector<49x128xf32>
    %cst_65 = arith.constant dense<0.000000e+00> : vector<49x256xf32>
    %154 = tpu.matmul %153, %46, %cst_65 {dimension_numbers = #tpu.dot_dimension_numbers<[1], [0], [0], [1], [0, 0, 1, 1], [], []>} : vector<49x128xf32>, vector<128x256xf32>, vector<49x256xf32> -> vector<49x256xf32>
    %155 = vector.extract_strided_slice %154 {offsets = [0, 0], sizes = [49, 128], strides = [1, 1]} : vector<49x256xf32> to vector<49x128xf32>
    %156 = vector.extract_strided_slice %154 {offsets = [0, 128], sizes = [49, 128], strides = [1, 1]} : vector<49x256xf32> to vector<49x128xf32>
    %cst_66 = arith.constant dense<0.000000e+00> : vector<54x49xf32>
    %157 = tpu.matmul %45, %155, %cst_66 {dimension_numbers = #tpu.dot_dimension_numbers<[1], [1], [0], [0], [0, 0, 1, 0], [], []>} : vector<54x128xf32>, vector<49x128xf32>, vector<54x49xf32> -> vector<54x49xf32>
    %cst_67 = arith.constant 0.0883883461 : f32
    %158 = vector.broadcast %cst_67 : f32 to vector<54x49xf32>
    %159 = arith.mulf %157, %158 : vector<54x49xf32>
    %cst_68 = arith.constant dense<0xFF800000> : vector<54xf32>
    %160 = vector.multi_reduction <maximumf>, %159, %cst_68 [1] : vector<54x49xf32> to vector<54xf32>
    %161 = vector.shape_cast %160 : vector<54xf32> to vector<54x1xf32>
    %162 = vector.broadcast %161 : vector<54x1xf32> to vector<54x49xf32>
    %163 = arith.subf %159, %162 : vector<54x49xf32>
    %164 = math.exp %163 : vector<54x49xf32>
    %cst_69 = arith.constant dense<0.000000e+00> : vector<54xf32>
    %165 = vector.multi_reduction <add>, %164, %cst_69 [1] : vector<54x49xf32> to vector<54xf32>
    %166 = vector.shape_cast %165 : vector<54xf32> to vector<54x1xf32>
    %167 = vector.broadcast %166 : vector<54x1xf32> to vector<54x49xf32>
    %168 = arith.divf %164, %167 : vector<54x49xf32>
    %cst_70 = arith.constant dense<0.000000e+00> : vector<54x128xf32>
    %169 = tpu.matmul %168, %156, %cst_70 {dimension_numbers = #tpu.dot_dimension_numbers<[1], [0], [0], [1], [0, 0, 1, 1], [], []>} : vector<54x49xf32>, vector<49x128xf32>, vector<54x128xf32> -> vector<54x128xf32>
    %cst_71 = arith.constant dense<0.000000e+00> : vector<54x128xf32>
    %170 = tpu.matmul %169, %47, %cst_71 {dimension_numbers = #tpu.dot_dimension_numbers<[1], [0], [0], [1], [0, 0, 1, 1], [], []>} : vector<54x128xf32>, vector<128x128xf32>, vector<54x128xf32> -> vector<54x128xf32>
    %171 = vector.broadcast %48 : vector<1x128xf32> to vector<54x128xf32>
    %172 = arith.addf %170, %171 : vector<54x128xf32>
    %c1_72 = arith.constant 1 : index
    %c0_73 = arith.constant 0 : index
    %c0_74 = arith.constant 0 : index
    %173 = vector.load %arg14[%c1_72, %c0_73, %c0_74] : memref<2x54x128xf32, #tpu.memory_space<vmem>>, vector<1x54x128xf32>
    %174 = vector.shape_cast %173 : vector<1x54x128xf32> to vector<54x128xf32>
    %175 = vector.shape_cast %172 : vector<54x128xf32> to vector<1x54x128xf32>
    tpu.vector_store %arg14[%c1_72, %c0_73, %c0_74], %175 {strides = array<i32>} : memref<2x54x128xf32, #tpu.memory_space<vmem>>, vector<1x54x128xf32>,
    %cst_75 = arith.constant dense<0xFF800000> : vector<54xf32>
    %176 = vector.multi_reduction <maximumf>, %172, %cst_75 [1] : vector<54x128xf32> to vector<54xf32>
    %177 = vector.shape_cast %176 : vector<54xf32> to vector<54x1xf32>
    %178 = vector.broadcast %177 : vector<54x1xf32> to vector<54x128xf32>
    %179 = arith.cmpf oeq, %172, %178 : vector<54x128xf32>
    %c128_i32_76 = arith.constant 128 : i32
    %180 = vector.broadcast %c128_i32_76 : i32 to vector<54x128xi32>
    %181 = arith.select %179, %51, %180 : vector<54x128xi1>, vector<54x128xi32>
    %cst_77 = arith.constant dense<2147483647> : vector<54xi32>
    %182 = vector.multi_reduction <minsi>, %181, %cst_77 [1] : vector<54x128xi32> to vector<54xi32>
    %183 = vector.shape_cast %182 : vector<54xi32> to vector<1x54xi32>
    %c1_78 = arith.constant 1 : index
    %c0_79 = arith.constant 0 : index
    %c0_80 = arith.constant 0 : index
    %184 = vector.load %arg15[%c1_78, %c0_79, %c0_80] : memref<2x1x54xi32, #tpu.memory_space<vmem>>, vector<1x1x54xi32>
    %185 = vector.shape_cast %184 : vector<1x1x54xi32> to vector<1x54xi32>
    %186 = vector.shape_cast %183 : vector<1x54xi32> to vector<1x1x54xi32>
    tpu.vector_store %arg15[%c1_78, %c0_79, %c0_80], %186 {strides = array<i32>} : memref<2x1x54xi32, #tpu.memory_space<vmem>>, vector<1x1x54xi32>,
    %187 = vector.shape_cast %182 : vector<54xi32> to vector<54x1xi32>
    %188 = vector.broadcast %187 : vector<54x1xi32> to vector<54x128xi32>
    %189 = arith.cmpi eq, %51, %188 : vector<54x128xi32>
    %190 = arith.extui %189 : vector<54x128xi1> to vector<54x128xi32>
    %191 = arith.sitofp %190 : vector<54x128xi32> to vector<54x128xf32>
    %cst_81 = arith.constant dense<0.000000e+00> : vector<54x3xf32>
    %192 = tpu.matmul %191, %49, %cst_81 {dimension_numbers = #tpu.dot_dimension_numbers<[1], [0], [0], [1], [0, 0, 1, 1], [], []>} : vector<54x128xf32>, vector<128x3xf32>, vector<54x3xf32> -> vector<54x3xf32>
    %c1_82 = arith.constant 1 : index
    %c0_83 = arith.constant 0 : index
    %c0_84 = arith.constant 0 : index
    %193 = vector.load %arg16[%c1_82, %c0_83, %c0_84] : memref<2x54x3xf32, #tpu.memory_space<vmem>>, vector<1x54x3xf32>
    %194 = vector.shape_cast %193 : vector<1x54x3xf32> to vector<54x3xf32>
    %195 = vector.shape_cast %192 : vector<54x3xf32> to vector<1x54x3xf32>
    tpu.vector_store %arg16[%c1_82, %c0_83, %c0_84], %195 {strides = array<i32>} : memref<2x54x3xf32, #tpu.memory_space<vmem>>, vector<1x54x3xf32>,
    %196 = vector.extract_strided_slice %43 {offsets = [1, 0], sizes = [1, 6], strides = [1, 1]} : vector<2x9xf32> to vector<1x6xf32>
    %197 = vector.extract_strided_slice %196 {offsets = [0, 0], sizes = [1, 3], strides = [1, 1]} : vector<1x6xf32> to vector<1x3xf32>
    %198 = vector.extract_strided_slice %196 {offsets = [0, 3], sizes = [1, 3], strides = [1, 1]} : vector<1x6xf32> to vector<1x3xf32>
    %199 = arith.mulf %197, %197 : vector<1x3xf32>
    %cst_85 = arith.constant dense<0.000000e+00> : vector<1xf32>
    %200 = vector.multi_reduction <add>, %199, %cst_85 [1] : vector<1x3xf32> to vector<1xf32>
    %201 = vector.shape_cast %200 : vector<1xf32> to vector<1x1xf32>
    %202 = math.sqrt %201 : vector<1x1xf32>
    %cst_86 = arith.constant 9.99999996E-13 : f32
    %203 = vector.broadcast %cst_86 : f32 to vector<1x1xf32>
    %204 = arith.maximumf %202, %203 : vector<1x1xf32>
    %205 = vector.broadcast %204 : vector<1x1xf32> to vector<1x3xf32>
    %206 = arith.divf %197, %205 : vector<1x3xf32>
    %207 = arith.mulf %206, %198 : vector<1x3xf32>
    %cst_87 = arith.constant dense<0.000000e+00> : vector<1xf32>
    %208 = vector.multi_reduction <add>, %207, %cst_87 [1] : vector<1x3xf32> to vector<1xf32>
    %209 = vector.shape_cast %208 : vector<1xf32> to vector<1x1xf32>
    %210 = vector.broadcast %209 : vector<1x1xf32> to vector<1x3xf32>
    %211 = arith.mulf %210, %206 : vector<1x3xf32>
    %212 = arith.subf %198, %211 : vector<1x3xf32>
    %213 = arith.mulf %212, %212 : vector<1x3xf32>
    %cst_88 = arith.constant dense<0.000000e+00> : vector<1xf32>
    %214 = vector.multi_reduction <add>, %213, %cst_88 [1] : vector<1x3xf32> to vector<1xf32>
    %215 = vector.shape_cast %214 : vector<1xf32> to vector<1x1xf32>
    %216 = math.sqrt %215 : vector<1x1xf32>
    %cst_89 = arith.constant 9.99999996E-13 : f32
    %217 = vector.broadcast %cst_89 : f32 to vector<1x1xf32>
    %218 = arith.maximumf %216, %217 : vector<1x1xf32>
    %219 = vector.broadcast %218 : vector<1x1xf32> to vector<1x3xf32>
    %220 = arith.divf %212, %219 : vector<1x3xf32>
    %221 = vector.extract_strided_slice %206 {offsets = [0, 1], sizes = [1, 1], strides = [1, 1]} : vector<1x3xf32> to vector<1x1xf32>
    %222 = vector.extract_strided_slice %220 {offsets = [0, 2], sizes = [1, 1], strides = [1, 1]} : vector<1x3xf32> to vector<1x1xf32>
    %223 = arith.mulf %221, %222 : vector<1x1xf32>
    %224 = vector.extract_strided_slice %206 {offsets = [0, 2], sizes = [1, 1], strides = [1, 1]} : vector<1x3xf32> to vector<1x1xf32>
    %225 = vector.extract_strided_slice %220 {offsets = [0, 1], sizes = [1, 1], strides = [1, 1]} : vector<1x3xf32> to vector<1x1xf32>
    %226 = arith.mulf %224, %225 : vector<1x1xf32>
    %227 = arith.subf %223, %226 : vector<1x1xf32>
    %228 = vector.extract_strided_slice %206 {offsets = [0, 2], sizes = [1, 1], strides = [1, 1]} : vector<1x3xf32> to vector<1x1xf32>
    %229 = vector.extract_strided_slice %220 {offsets = [0, 0], sizes = [1, 1], strides = [1, 1]} : vector<1x3xf32> to vector<1x1xf32>
    %230 = arith.mulf %228, %229 : vector<1x1xf32>
    %231 = vector.extract_strided_slice %206 {offsets = [0, 0], sizes = [1, 1], strides = [1, 1]} : vector<1x3xf32> to vector<1x1xf32>
    %232 = vector.extract_strided_slice %220 {offsets = [0, 2], sizes = [1, 1], strides = [1, 1]} : vector<1x3xf32> to vector<1x1xf32>
    %233 = arith.mulf %231, %232 : vector<1x1xf32>
    %234 = arith.subf %230, %233 : vector<1x1xf32>
    %235 = vector.extract_strided_slice %206 {offsets = [0, 0], sizes = [1, 1], strides = [1, 1]} : vector<1x3xf32> to vector<1x1xf32>
    %236 = vector.extract_strided_slice %220 {offsets = [0, 1], sizes = [1, 1], strides = [1, 1]} : vector<1x3xf32> to vector<1x1xf32>
    %237 = arith.mulf %235, %236 : vector<1x1xf32>
    %238 = vector.extract_strided_slice %206 {offsets = [0, 1], sizes = [1, 1], strides = [1, 1]} : vector<1x3xf32> to vector<1x1xf32>
    %239 = vector.extract_strided_slice %220 {offsets = [0, 0], sizes = [1, 1], strides = [1, 1]} : vector<1x3xf32> to vector<1x1xf32>
    %240 = arith.mulf %238, %239 : vector<1x1xf32>
    %241 = arith.subf %237, %240 : vector<1x1xf32>
    %242 = tpu.concatenate %227, %234, %241 in 1 : vector<1x1xf32>, vector<1x1xf32>, vector<1x1xf32> -> vector<1x3xf32>
    %243 = tpu.concatenate %206, %220, %242 in 0 : vector<1x3xf32>, vector<1x3xf32>, vector<1x3xf32> -> vector<3x3xf32>
    %cst_90 = arith.constant dense<0.000000e+00> : vector<54x3xf32>
    %244 = tpu.matmul %192, %243, %cst_90 {dimension_numbers = #tpu.dot_dimension_numbers<[1], [1], [0], [0], [0, 0, 1, 0], [], []>} : vector<54x3xf32>, vector<3x3xf32>, vector<54x3xf32> -> vector<54x3xf32>
    %c1_91 = arith.constant 1 : index
    %c0_92 = arith.constant 0 : index
    %c0_93 = arith.constant 0 : index
    %245 = vector.load %arg17[%c1_91, %c0_92, %c0_93] : memref<2x54x3xf32, #tpu.memory_space<vmem>>, vector<1x54x3xf32>
    %246 = vector.shape_cast %245 : vector<1x54x3xf32> to vector<54x3xf32>
    %247 = vector.shape_cast %244 : vector<54x3xf32> to vector<1x54x3xf32>
    tpu.vector_store %arg17[%c1_91, %c0_92, %c0_93], %247 {strides = array<i32>} : memref<2x54x3xf32, #tpu.memory_space<vmem>>, vector<1x54x3xf32>,
    %cst_94 = arith.constant dense<0.000000e+00> : vector<17x3xf32>
    %248 = tpu.matmul %50, %244, %cst_94 {dimension_numbers = #tpu.dot_dimension_numbers<[1], [0], [0], [1], [0, 0, 1, 1], [], []>} : vector<17x54xf32>, vector<54x3xf32>, vector<17x3xf32> -> vector<17x3xf32>
    %c1_95 = arith.constant 1 : index
    %c0_96 = arith.constant 0 : index
    %c0_97 = arith.constant 0 : index
    %249 = vector.load %arg18[%c1_95, %c0_96, %c0_97] : memref<2x17x3xf32, #tpu.memory_space<vmem>>, vector<1x17x3xf32>
    %250 = vector.shape_cast %249 : vector<1x17x3xf32> to vector<17x3xf32>
    %251 = vector.shape_cast %248 : vector<17x3xf32> to vector<1x17x3xf32>
    tpu.vector_store %arg18[%c1_95, %c0_96, %c0_97], %251 {strides = array<i32>} : memref<2x17x3xf32, #tpu.memory_space<vmem>>, vector<1x17x3xf32>,
    return
  }
}

</mosaic_0001>

<bundles_post_ra>
// kernel: mesh_regressor_forward.1
= control target key start
LH: loop header
LB: loop body
LE: loop exit
PB: predicated region body
PF: predicated region fallthrough
CT: control target
= control target key end

     0   :  { %s4397_s0 = inlined_call_operand.vmem [shape: f32[2,49,3], index: 0, kind: input, shape index: {}]   ;;  %s4398_s1 = inlined_call_operand.vmem [shape: f32[2,51], index: 1, kind: input, shape index: {}]   ;;  %s4399_s2 = inlined_call_operand.vmem [shape: f32[49,128], index: 2, kind: input, shape index: {}]   ;;  %s4400_s3 = inlined_call_operand.vmem [shape: f32[3,256], index: 3, kind: input, shape index: {}]   ;;  %s4401_s4 = inlined_call_operand.vmem [shape: f32[1,256], index: 4, kind: input, shape index: {}]   ;;  %s4402_s5 = inlined_call_operand.vmem [shape: f32[179,9], index: 5, kind: input, shape index: {}]   ;;  %s4403_s6 = inlined_call_operand.vmem [shape: f32[1,9], index: 6, kind: input, shape index: {}]   ;;  %s4404_s7 = inlined_call_operand.vmem [shape: f32[54,128], index: 7, kind: input, shape index: {}]   ;;  %s4405_s8 = inlined_call_operand.vmem [shape: f32[128,256], index: 8, kind: input, shape index: {}]   ;;  %s4406_s9 = inlined_call_operand.vmem [shape: f32[128,128], index: 9, kind: input, shape index: {}]   ;;  %s4407_s10 = inlined_call_operand.vmem [shape: f32[1,128], index: 10, kind: input, shape index: {}]   ;;  %s4408_s11 = inlined_call_operand.vmem [shape: f32[128,3], index: 11, kind: input, shape index: {}]   ;;  %s4409_s12 = inlined_call_operand.vmem [shape: f32[17,54], index: 12, kind: input, shape index: {}]   ;;  %s4410_s13 = inlined_call_operand.vmem [shape: f32[2,9], index: 13, kind: output, shape index: {0}]   ;;  %s4411_s14 = inlined_call_operand.vmem [shape: f32[2,54,128], index: 14, kind: output, shape index: {1}]   ;;  %s4412_s15 = inlined_call_operand.hbm [shape: s32[2,1,54], index: 15, kind: output, shape index: {2}]   ;;  %s4413_s16 = inlined_call_operand.vmem [shape: f32[2,54,3], index: 16, kind: output, shape index: {3}]   ;;  %s4414_s17 = inlined_call_operand.vmem [shape: f32[2,54,3], index: 17, kind: output, shape index: {4}]   ;;  %s4415_s18 = inlined_call_operand.hbm [shape: f32[2,17,3], index: 18, kind: output, shape index: {5}]  }
   0x1   :  { %4427 = sst [smem:[#allocation8_spill]] %s4397_s0 }
   0x2   :  { %4428 = sst [smem:[#allocation9_spill]] %s4398_s1 }
   0x3   :  { %4429 = sst [smem:[#allocation10_spill]] %s4399_s2 }
   0x4   :  { %24 = vsyncpa [#allocation3], 0  ;;  %s4430_s29 = sld [smem:[#allocation8_spill]]  ;;  %v2764_v1 = vmov 2   ;;  %v2765_v2 = vmov 0  }
   0x5   :  { %2551 = vset.pattern.permute.xlu1 %v2764_v1  ;;  %2549 = vset.pattern.permute.xlu0 %v2765_v2 }
   0xa   :  { %v52_v0 = vld [vmem:[%s4430_s29] sm:$0xff] }
   0xb   :  { %292 = vperm.xlu1 %2551, %v52_v0   ;;  %69 = vperm.xlu0 %2549, %v52_v0  }
   0xc   :  { %25 = vsyncpa [#allocation5], 0  ;;  %v53_v3 = vld [vmem:[%s4430_s29 + $0x8] sm:$0xff]  ;;  %v2766_v4 = vmov 1   ;;  %v54_v5 = vld [vmem:[%s4430_s29 + $0x10] sm:$0xff]  ;;  %s4431_s26 = sld [smem:[#allocation10_spill]] }
   0xd   :  { %2553 = vset.pattern.permute.xlu2 %v2766_v4  ;;  %v55_v6 = vld [vmem:[%s4430_s29 + $0x18] sm:$0xff]  ;;  %v56_v7 = vld [vmem:[%s4430_s29 + $0x20] sm:$0xff]  ;;  %v58_v8 = vld [vmem:[%s4430_s29 + $0x30] sm:$0x1]  ;;  %vm4422_vm0 = vcmask 1040384   ;;  %vm527_vm1 = vcmask 1042432  }
   0xe   :  { %177 = vperm.xlu2 %2553, %v53_v3   ;;  %v2906_v9 = vld [vmem:[%s4430_s29 + $0x38] sm:$0xff]  ;;  %v57_v10 = vld [vmem:[%s4430_s29 + $0x28] sm:$0xff]  ;;  %v2915_v11 = vld [vmem:[%s4430_s29 + $0x40] sm:$0xff]  ;;  %s4432_s24 = sld [smem:[#allocation9_spill]]  ;;  %vm523_vm2 = vcmask 416768   ;;  %vm781_vm3 = vcmask 400384  }
   0xf   :  { %v2923_v12 = vld [vmem:[%s4430_s29 + $0x48] sm:$0xff]  ;;  %v620_v13 = vld [vmem:[%s4405_s8 + $0xf0] sm:$0xff]  ;;  %v621_v14 = vld [vmem:[%s4405_s8 + $0xf8] sm:$0xff]  ;;  %vm800_vm4 = vcmask 398336   ;;  %vm553_vm6 = vcmask 1041409   ;;  %s2768_s25 = smov 125  }
  0x10   :  { %v618_v15 = vld [vmem:[%s4405_s8 + $0xe0] sm:$0xff]  ;;  %660 = vmatpush.msra.mxu2 %v620_v13  ;;  %v619_v16 = vld [vmem:[%s4405_s8 + $0xe8] sm:$0xff]  ;;  %v2944_v17 = vld [vmem:[%s4430_s29 + $0x50] sm:$0xff]  ;;  %698 = vmatpush.msra.mxu3 %v621_v14  ;;  %s2769_s2 = smov 3   ;;  %s2775_s30 = smov 2  }
  0x11   :  { %v616_v18 = vld [vmem:[%s4405_s8 + $0xd0] sm:$0xff]  ;;  %v617_v19 = vld [vmem:[%s4405_s8 + $0xd8] sm:$0xff]  ;;  %v2955_v20 = vld [vmem:[%s4430_s29 + $0x60] sm:$0xff]  ;;  %s2777_s27 = smov 16   ;;  %s2397_s28 = sshll.u32 %s4415_s18, 4  ;;  %s2398_s28 = int_to_ptr.hbm [resolvable:$true] %s2397_s28 }
  0x12   :  { %661 = vmatpush.msra.mxu2 %v618_v15  ;;  %699 = vmatpush.msra.mxu3 %v619_v16  ;;  %v614_v21 = vld [vmem:[%s4405_s8 + $0xc0] sm:$0xff]  ;;  %v615_v22 = vld [vmem:[%s4405_s8 + $0xc8] sm:$0xff]  ;;  %v612_v23 = vld [vmem:[%s4405_s8 + $0xb0] sm:$0xff] }
  0x13   :  { %2552 = vset.pattern.permute.xlu1 %v2765_v2  ;;  %2550 = vset.pattern.permute.xlu0 %v2766_v4  ;;  %v613_v24 = vld [vmem:[%s4405_s8 + $0xb8] sm:$0xff]  ;;  %v610_v25 = vld [vmem:[%s4405_s8 + $0xa0] sm:$0xff]  ;;  %v611_v26 = vld [vmem:[%s4405_s8 + $0xa8] sm:$0xff] }
  0x14   :  { %74 = vperm.xlu1 %2552, %v53_v3   ;;  %173 = vperm.xlu0 %2550, %v52_v0   ;;  %v2981_v27 = vld [vmem:[%s4430_s29 + $0x58] sm:$0xff]  ;;  %v2986_v28 = vld [vmem:[%s4430_s29 + $0x68] sm:$0x1]  ;;  %v608_v29 = vld [vmem:[%s4405_s8 + $0x90] sm:$0xff]  ;;  %s2770_s29 = smov 124  }
  0x15   :  { %662 = vmatpush.msra.mxu2 %v616_v18  ;;  %700 = vmatpush.msra.mxu3 %v617_v19  ;;  %v609_v30 = vld [vmem:[%s4405_s8 + $0x98] sm:$0xff]  ;;  %v606_v31 = vld [vmem:[%s4405_s8 + $0x80] sm:$0xff]  ;;  %v607_v32 = vld [vmem:[%s4405_s8 + $0x88] sm:$0xff] }
  0x16   :  { %2554 = vset.pattern.permute.xlu2 %v2764_v1  ;;  %v2422_v33 = vld [vmem:[%s4400_s3 + $0x1] ss:$4 sm:$0x3]  ;;  %v604_v34 = vld [vmem:[%s4405_s8 + $0x70] sm:$0xff]  ;;  %v605_v35 = vld [vmem:[%s4405_s8 + $0x78] sm:$0xff] }
  0x17   :  { %296 = vperm.xlu2 %2554, %v53_v3   ;;  %663 = vmatpush.msra.mxu2 %v614_v21  ;;  %v602_v36 = vld [vmem:[%s4405_s8 + $0x60] sm:$0xff]  ;;  %v603_v37 = vld [vmem:[%s4405_s8 + $0x68] sm:$0xff]  ;;  %v600_v38 = vld [vmem:[%s4405_s8 + $0x50] sm:$0xff]  ;;  %v3021_v39 = vperm.slane %v2422_v33, 0 }
  0x18   :  { %701 = vmatpush.msra.mxu3 %v615_v22  ;;  %v601_v40 = vld [vmem:[%s4405_s8 + $0x58] sm:$0xff]  ;;  %v598_v42 = vld [vmem:[%s4405_s8 + $0x40] sm:$0xff]  ;;  %v599_v43 = vld [vmem:[%s4405_s8 + $0x48] sm:$0xff] }
  0x19   :  { %664 = vmatpush.msra.mxu2 %v612_v23  ;;  %v596_v45 = vld [vmem:[%s4405_s8 + $0x30] sm:$0xff]  ;;  %v597_v46 = vld [vmem:[%s4405_s8 + $0x38] sm:$0xff]  ;;  %v594_v47 = vld [vmem:[%s4405_s8 + $0x20] sm:$0xff] }
  0x1a   :  { %702 = vmatpush.msra.mxu3 %v613_v24  ;;  %v595_v48 = vld [vmem:[%s4405_s8 + $0x28] sm:$0xff]  ;;  %v2423_v49 = vld [vmem:[%s4400_s3 + $0x2] ss:$4 sm:$0x3]  ;;  %v592_v50 = vld [vmem:[%s4405_s8 + $0x10] sm:$0xff] }
  0x1b   :  { %665 = vmatpush.msra.mxu2 %v610_v25  ;;  %v593_v51 = vld [vmem:[%s4405_s8 + $0x18] sm:$0xff]  ;;  %v3057_v52 = vperm.slane %v2423_v49, 0  ;;  %v590_v53 = vld [vmem:[%s4405_s8] sm:$0xff]  ;;  %v591_v54 = vld [vmem:[%s4405_s8 + $0x8] sm:$0xff] }
  0x1c   :  { %79 = vperm.xlu1 %2552, %v54_v5   ;;  %2556 = vset.pattern.permute.xlu0 %v2764_v1  ;;  %v66_v62 = vld [vmem:[%s4400_s3] ss:$4 sm:$0x3]  ;;  %s2771_s3 = smov 126  }
  0x1d   :  { %300 = vperm.xlu0 %2556, %v54_v5   ;;  %703 = vmatpush.msra.mxu3 %v611_v26  ;;  %v3076_v0 = vperm.slane %v66_v62, 0  ;;  %v3078_v3 = vperm.slane %v66_v62, 1 }
  0x1e   :  { %666 = vmatpush.msra.mxu2 %v608_v29 }
  0x1f   :  { %2555 = vset.pattern.permute.xlu2 %v2766_v4  ;;  %704 = vmatpush.msra.mxu3 %v609_v30 }
  0x20   :  { %181 = vperm.xlu2 %2555, %v54_v5   ;;  %667 = vmatpush.msra.mxu2 %v606_v31  ;;  %v3082_v5 = vperm.slane %v2422_v33, 1  ;;  %v442_v33 = vld [vmem:[%s4431_s26] sm:$0xff] }
  0x21   :  { %705 = vmatpush.msra.mxu3 %v607_v32 }
  0x22   :  { %668 = vmatpush.msra.mxu2 %v604_v34 }
  0x23   :  { %706 = vmatpush.msra.mxu3 %v605_v35 }
  0x24   :  { %84 = vperm.xlu1 %2552, %v55_v6   ;;  %669 = vmatpush.msra.mxu2 %v602_v36 }
  0x25   :  { %2559 = vset.pattern.permute.xlu0 %v2766_v4  ;;  %707 = vmatpush.msra.mxu3 %v603_v37 }
  0x26   :  { %189 = vperm.xlu0 %2559, %v56_v7   ;;  %670 = vmatpush.msra.mxu2 %v600_v38 }
  0x27   :  { %708 = vmatpush.msra.mxu3 %v601_v40 }
  0x28   :  { %185 = vperm.xlu2 %2555, %v55_v6   ;;  %671 = vmatpush.msra.mxu2 %v598_v42 }
  0x29   :  { %709 = vmatpush.msra.mxu3 %v599_v43 }
  0x2a   :  { %672 = vmatpush.msra.mxu2 %v596_v45 }
  0x2b   :  { %710 = vmatpush.msra.mxu3 %v597_v46 }
  0x2c   :  { %2557 = vset.pattern.permute.xlu1 %v2764_v1  ;;  %673 = vmatpush.msra.mxu2 %v594_v47 }
  0x2d   :  { %304 = vperm.xlu1 %2557, %v55_v6   ;;  %711 = vmatpush.msra.mxu3 %v595_v48  ;;  %v3084_v6 = vperm.slane %v2423_v49, 1 }
  0x2e   :  { %2562 = vset.pattern.permute.xlu0 %v2765_v2  ;;  %674 = vmatpush.msra.mxu2 %v592_v50 }
  0x2f   :  { %99 = vperm.xlu0 %2562, %v58_v8   ;;  %712 = vmatpush.msra.mxu3 %v593_v51 }
  0x30   :  { %2558 = vset.pattern.permute.xlu2 %v2765_v2  ;;  %675 = vmatpush.msra.mxu2 %v590_v53 }
  0x31   :  { %89 = vperm.xlu2 %2558, %v56_v7   ;;  %713 = vmatpush.msra.mxu3 %v591_v54 }
  0x35   :  { %308 = vperm.xlu1 %2557, %v56_v7   ;;  %v408_v7 = vld [vmem:[%s4401_s4] sm:$0x3]  ;;  %s2772_s4 = smov 127  }
  0x36   :  { %v3098_v18 = vperm.slane %v408_v7, 1 }
  0x37   :  { %104 = vperm.xlu0 %2562, %v2906_v9  }
  0x39   :  { %94 = vperm.xlu2 %2558, %v57_v10  }
  0x3d   :  { %2560 = vset.pattern.permute.xlu1 %v2766_v4 }
  0x3e   :  { %193 = vperm.xlu1 %2560, %v57_v10  }
  0x3f   :  { %109 = vperm.xlu0 %2562, %v2915_v11  }
  0x41   :  { %2561 = vset.pattern.permute.xlu2 %v2764_v1 }
  0x42   :  { %312 = vperm.xlu2 %2561, %v57_v10  }
  0x46   :  { %197 = vperm.xlu1 %2560, %v58_v8  }
  0x47   :  { %2563 = vset.pattern.permute.xlu0 %v2766_v4 }
  0x48   :  { %201 = vperm.xlu0 %2563, %v2906_v9  }
  0x4a   :  { %316 = vperm.xlu2 %2561, %v58_v8  }
  0x4e   :  { %209 = vperm.xlu1 %2560, %v2923_v12  }
  0x50   :  { %205 = vperm.xlu0 %2563, %v2915_v11  }
  0x52   :  { %2564 = vset.pattern.permute.xlu2 %v2765_v2 }
  0x53   :  { %114 = vperm.xlu2 %2564, %v2923_v12  }
  0x56   :  { %213 = vperm.xlu1 %2560, %v2944_v17  }
  0x58   :  { %221 = vperm.xlu0 %2563, %v2955_v20  }
  0x5b   :  { %119 = vperm.xlu2 %2564, %v2944_v17  }
  0x5e   :  { %217 = vperm.xlu1 %2560, %v2981_v27  }
  0x60   :  { %225 = vperm.xlu0 %2563, %v2986_v28  }
  0x63   :  { %124 = vperm.xlu2 %2564, %v2981_v27  }
  0x66   :  { %2565 = vset.pattern.permute.xlu1 %v2765_v2 }
  0x68   :  { %v178_v41 = vpop.permute.xlu2 %177  ;;  %2568 = vset.pattern.permute.xlu0 %v2764_v1 }
  0x69   :  { %v235_v44 = vmul.f32 %v3021_v39, %v178_v41  ;;  %320 = vperm.xlu0 %2568, %v2906_v9   ;;  %v236_v16 = vmul.f32 %v3082_v5, %v178_v41 }
  0x71   :  { %v297_v55 = vpop.permute.xlu2 %296  ;;  %324 = vperm.xlu0 %2568, %v2915_v11  }
  0x72   :  { %v354_v56 = vmul.f32 %v3057_v52, %v297_v55  ;;  %v355_v24 = vmul.f32 %v3084_v6, %v297_v55  ;;  %v443_v55 = vld [vmem:[%s4431_s26 + $0x8] sm:$0xff] }
  0x79   :  { %328 = vperm.xlu0 %2568, %v2923_v12  }
  0x7a   :  { %v182_v57 = vpop.permute.xlu2 %181 }
  0x7b   :  { %v237_v58 = vmul.f32 %v3021_v39, %v182_v57  ;;  %v238_v37 = vmul.f32 %v3082_v5, %v182_v57 }
  0x7d   :  { %v293_v59 = vpop.permute.xlu1 %292  ;;  %v70_v60 = vpop.permute.xlu0 %69 }
  0x7e   :  { %v352_v61 = vmul.f32 %v3057_v52, %v293_v59  ;;  %v142_v8 = vmul.f32 %v3076_v0, %v70_v60  ;;  %v143_v9 = vmul.f32 %v3078_v3, %v70_v60  ;;  %v353_v19 = vmul.f32 %v3084_v6, %v293_v59 }
  0x81   :  { %332 = vperm.xlu0 %2568, %v2944_v17   ;;  %v3096_v17 = vperm.slane %v408_v7, 0 }
  0x82   :  { %v3074_v63 = vpop.permute.xlu2 %185 }
  0x83   :  { %v239_v4 = vmul.f32 %v3021_v39, %v3074_v63 }
  0x86   :  { %v75_v10 = vpop.permute.xlu1 %74  ;;  %v174_v11 = vpop.permute.xlu0 %173 }
  0x87   :  { %v144_v12 = vmul.f32 %v3076_v0, %v75_v10  ;;  %v145_v13 = vmul.f32 %v3078_v3, %v75_v10  ;;  %v233_v14 = vmul.f32 %v3021_v39, %v174_v11  ;;  %v234_v15 = vmul.f32 %v3082_v5, %v174_v11 }
  0x89   :  { %v263_v21 = vadd.f32 %v235_v44, %v144_v12  ;;  %v261_v22 = vadd.f32 %v233_v14, %v142_v8  ;;  %v262_v23 = vadd.f32 %v234_v15, %v143_v9  ;;  %344 = vperm.xlu0 %2568, %v2986_v28   ;;  %v264_v25 = vadd.f32 %v236_v16, %v145_v13  ;;  %v444_v13 = vld [vmem:[%s4431_s26 + $0x10] sm:$0xff] }
  0x8a   :  { %v240_v15 = vmul.f32 %v3082_v5, %v3074_v63 }
  0x8b   :  { %v90_v26 = vpop.permute.xlu2 %89  ;;  %v382_v29 = vadd.f32 %v354_v56, %v263_v21  ;;  %v380_v30 = vadd.f32 %v352_v61, %v261_v22  ;;  %v381_v31 = vadd.f32 %v353_v19, %v262_v23  ;;  %v383_v40 = vadd.f32 %v355_v24, %v264_v25 }
  0x8c   :  { %v150_v32 = vmul.f32 %v3076_v0, %v90_v26 }
  0x8d   :  { %v416_v34 = vadd.f32 %v3096_v17, %v382_v29  ;;  %v414_v35 = vadd.f32 %v3096_v17, %v380_v30  ;;  %v415_v36 = vadd.f32 %v3098_v18, %v381_v31  ;;  %v417_v48 = vadd.f32 %v3098_v18, %v383_v40  ;;  %v445_v30 = vld [vmem:[%s4431_s26 + $0x18] sm:$0xff] }
  0x8e   :  { %v80_v38 = vpop.permute.xlu1 %79  ;;  %v151_v29 = vmul.f32 %v3078_v3, %v90_v26 }
  0x8f   :  { %v146_v41 = vmul.f32 %v3076_v0, %v80_v38  ;;  %v147_v42 = vmul.f32 %v3078_v3, %v80_v38  ;;  %v463_v43 = vadd.f32 %v416_v34, %v414_v35  ;;  %v301_v44 = vpop.permute.xlu0 %300  ;;  %v449_v45 = vadd.f32 %v442_v33, %v415_v36 }
  0x90   :  { %v356_v46 = vmul.f32 %v3057_v52, %v301_v44  ;;  %v357_v51 = vmul.f32 %v3084_v6, %v301_v44  ;;  %v450_v60 = vadd.f32 %v443_v55, %v417_v48  ;;  %v446_v44 = vld [vmem:[%s4431_s26 + $0x20] sm:$0xff] }
  0x91   :  { %v265_v47 = vadd.f32 %v237_v58, %v146_v41  ;;  %676 = vmatmul.f32.vlgmr.msra.gmra.mxu2 %v449_v45  ;;  %714 = vmatmul.f32.vlgmr.msra.gmra.mxu3 %v449_v45  ;;  %v266_v50 = vadd.f32 %v238_v37, %v147_v42 }
  0x93   :  { %v95_v49 = vpop.permute.xlu2 %94  ;;  %v384_v53 = vadd.f32 %v356_v46, %v265_v47  ;;  %v385_v61 = vadd.f32 %v357_v51, %v266_v50 }
  0x94   :  { %v152_v54 = vmul.f32 %v3076_v0, %v95_v49  ;;  %v153_v50 = vmul.f32 %v3078_v3, %v95_v49 }
  0x95   :  { %v418_v56 = vadd.f32 %v3096_v17, %v384_v53  ;;  %v419_v10 = vadd.f32 %v3098_v18, %v385_v61 }
  0x96   :  { %v85_v57 = vpop.permute.xlu1 %84 }
  0x97   :  { %v464_v59 = vadd.f32 %v463_v43, %v418_v56  ;;  %v148_v58 = vmul.f32 %v3076_v0, %v85_v57  ;;  %v149_v12 = vmul.f32 %v3078_v3, %v85_v57  ;;  %v451_v16 = vadd.f32 %v444_v13, %v419_v10 }
  0x98   :  { %v190_v62 = vpop.permute.xlu0 %189 }
  0x99   :  { %v267_v7 = vadd.f32 %v239_v4, %v148_v58  ;;  %679 = vmatmul.f32.gmra.mxu2 %v450_v60  ;;  %717 = vmatmul.f32.gmra.mxu3 %v450_v60  ;;  %v241_v8 = vmul.f32 %v3021_v39, %v190_v62  ;;  %v268_v19 = vadd.f32 %v240_v15, %v149_v12 }
  0x9a   :  { %v242_v63 = vmul.f32 %v3082_v5, %v190_v62  ;;  %v447_v62 = vld [vmem:[%s4431_s26 + $0x28] sm:$0xff] }
  0x9b   :  { %v269_v9 = vadd.f32 %v241_v8, %v150_v32 }
  0x9c   :  { %v313_v11 = vpop.permute.xlu2 %312  ;;  %v270_v38 = vadd.f32 %v242_v63, %v151_v29  ;;  %v448_v29 = vld [vmem:[%s4431_s26 + $0x30] sm:$0x1] }
  0x9d   :  { %v362_v14 = vmul.f32 %v3057_v52, %v313_v11  ;;  %v363_v53 = vmul.f32 %v3084_v6, %v313_v11 }
  0x9f   :  { %v305_v4 = vpop.permute.xlu1 %304 }
  0xa0   :  { %v358_v21 = vmul.f32 %v3057_v52, %v305_v4  ;;  %v359_v22 = vmul.f32 %v3084_v6, %v305_v4 }
  0xa1   :  { %682 = vmatmul.f32.gmra.mxu2 %v451_v16  ;;  %720 = vmatmul.f32.gmra.mxu3 %v451_v16  ;;  %v100_v23 = vpop.permute.xlu0 %99 }
  0xa2   :  { %v386_v24 = vadd.f32 %v358_v21, %v267_v7  ;;  %v387_v25 = vadd.f32 %v359_v22, %v268_v19  ;;  %v154_v49 = vmul.f32 %v3076_v0, %v100_v23  ;;  %v155_v7 = vmul.f32 %v3078_v3, %v100_v23 }
  0xa4   :  { %v317_v31 = vpop.permute.xlu2 %316  ;;  %v420_v32 = vadd.f32 %v3096_v17, %v386_v24  ;;  %v421_v33 = vadd.f32 %v3098_v18, %v387_v25 }
  0xa5   :  { %v364_v34 = vmul.f32 %v3057_v52, %v317_v31  ;;  %v365_v15 = vmul.f32 %v3084_v6, %v317_v31 }
  0xa6   :  { %v465_v35 = vadd.f32 %v464_v59, %v420_v32  ;;  %v452_v36 = vadd.f32 %v445_v30, %v421_v33 }
  0xa7   :  { %v309_v37 = vpop.permute.xlu1 %308 }
  0xa8   :  { %v360_v40 = vmul.f32 %v3057_v52, %v309_v37  ;;  %v361_v26 = vmul.f32 %v3084_v6, %v309_v37 }
  0xa9   :  { %685 = vmatmul.f32.gmra.mxu2 %v452_v36  ;;  %723 = vmatmul.f32.gmra.mxu3 %v452_v36  ;;  %v3143_v41 = vpop.permute.xlu0 %104 }
  0xaa   :  { %v388_v42 = vadd.f32 %v360_v40, %v269_v9  ;;  %v389_v43 = vadd.f32 %v361_v26, %v270_v38  ;;  %v156_v16 = vmul.f32 %v3076_v0, %v3143_v41 }
  0xac   :  { %v422_v45 = vadd.f32 %v3096_v17, %v388_v42  ;;  %v423_v46 = vadd.f32 %v3098_v18, %v389_v43 }
  0xad   :  { %v115_v11 = vpop.permute.xlu2 %114 }
  0xae   :  { %v466_v47 = vadd.f32 %v465_v35, %v422_v45  ;;  %v453_v48 = vadd.f32 %v446_v44, %v423_v46  ;;  %v160_v31 = vmul.f32 %v3076_v0, %v115_v11  ;;  %v161_v63 = vmul.f32 %v3078_v3, %v115_v11 }
  0xb0   :  { %v194_v51 = vpop.permute.xlu1 %193 }
  0xb1   :  { %v243_v55 = vmul.f32 %v3021_v39, %v194_v51  ;;  %v244_v56 = vmul.f32 %v3082_v5, %v194_v51  ;;  %688 = vmatmul.f32.gmra.mxu2 %v453_v48  ;;  %726 = vmatmul.f32.gmra.mxu3 %v453_v48  ;;  %v3154_v57 = vpop.permute.xlu0 %109 }
  0xb2   :  { %v158_v42 = vmul.f32 %v3076_v0, %v3154_v57 }
  0xb3   :  { %v271_v59 = vadd.f32 %v243_v55, %v152_v54  ;;  %v272_v58 = vadd.f32 %v244_v56, %v153_v50 }
  0xb5   :  { %v390_v60 = vadd.f32 %v362_v14, %v271_v59  ;;  %v391_v61 = vadd.f32 %v363_v53, %v272_v58  ;;  %v120_v40 = vpop.permute.xlu2 %119 }
  0xb6   :  { %v163_v48 = vmul.f32 %v3078_v3, %v120_v40 }
  0xb7   :  { %v424_v8 = vadd.f32 %v3096_v17, %v390_v60  ;;  %v425_v9 = vadd.f32 %v3098_v18, %v391_v61 }
  0xb8   :  { %v198_v10 = vpop.permute.xlu1 %197 }
  0xb9   :  { %v467_v12 = vadd.f32 %v466_v47, %v424_v8  ;;  %v245_v54 = vmul.f32 %v3021_v39, %v198_v10  ;;  %v246_v13 = vmul.f32 %v3082_v5, %v198_v10  ;;  %v454_v14 = vadd.f32 %v447_v62, %v425_v9 }
  0xba   :  { %v202_v4 = vpop.permute.xlu0 %201  ;;  %v162_v47 = vmul.f32 %v3076_v0, %v120_v40  ;;  %v157_v9 = vmul.f32 %v3078_v3, %v3143_v41 }
  0xbb   :  { %v273_v19 = vadd.f32 %v245_v54, %v154_v49  ;;  %v274_v21 = vadd.f32 %v246_v13, %v155_v7  ;;  %v247_v22 = vmul.f32 %v3021_v39, %v202_v4  ;;  %691 = vmatmul.f32.gmra.mxu2 %v454_v14  ;;  %729 = vmatmul.f32.gmra.mxu3 %v454_v14 }
  0xbc   :  { %v248_v8 = vmul.f32 %v3082_v5, %v202_v4 }
  0xbd   :  { %v392_v23 = vadd.f32 %v364_v34, %v273_v19  ;;  %v275_v24 = vadd.f32 %v247_v22, %v156_v16  ;;  %v393_v25 = vadd.f32 %v365_v15, %v274_v21  ;;  %v3192_v58 = vpop.permute.xlu2 %124  ;;  %v159_v19 = vmul.f32 %v3078_v3, %v3154_v57 }
  0xbe   :  { %v164_v60 = vmul.f32 %v3076_v0, %v3192_v58  ;;  %v276_v11 = vadd.f32 %v248_v8, %v157_v9  ;;  %v505_v8 = vld [vmem:[%s4402_s5 + $0x30] sm:$0xff]  ;;  %v519_v9 = vld [vmem:[%s4402_s5 + $0xa0] sm:$0xff] }
  0xbf   :  { %v426_v30 = vadd.f32 %v3096_v17, %v392_v23  ;;  %v427_v32 = vadd.f32 %v3098_v18, %v393_v25 }
  0xc0   :  { %v210_v33 = vpop.permute.xlu1 %209 }
  0xc1   :  { %v251_v35 = vmul.f32 %v3021_v39, %v210_v33  ;;  %v252_v34 = vmul.f32 %v3082_v5, %v210_v33  ;;  %v455_v36 = vadd.f32 %v448_v29, %v427_v32  ;;  %v469_v37 = vsel %vm4422_vm0, %v426_v30, 0.0 }
  0xc2   :  { %v206_v38 = vpop.permute.xlu0 %205  ;;  %v3179_v26 = vadd.f32 %v469_v37, %v467_v12 }
  0xc3   :  { %v279_v43 = vadd.f32 %v251_v35, %v160_v31  ;;  %v280_v44 = vadd.f32 %v252_v34, %v161_v63  ;;  %v249_v45 = vmul.f32 %v3021_v39, %v206_v38  ;;  %694 = vmatmul.f32.gmra.mxu2 %v455_v36  ;;  %732 = vmatmul.f32.gmra.mxu3 %v455_v36 }
  0xc4   :  { %v250_v15 = vmul.f32 %v3082_v5, %v206_v38 }
  0xc5   :  { %v277_v46 = vadd.f32 %v249_v45, %v158_v42  ;;  %v514_v42 = vld [vmem:[%s4402_s5 + $0x78] sm:$0xff]  ;;  %v511_v45 = vld [vmem:[%s4402_s5 + $0x60] sm:$0xff] }
  0xc6   :  { %v278_v21 = vadd.f32 %v250_v15, %v159_v19  ;;  %556 = vmatpush.msra.mxu1 %v514_v42  ;;  %v502_v15 = vld [vmem:[%s4402_s5 + $0x18] sm:$0xff]  ;;  %v501_v19 = vld [vmem:[%s4402_s5 + $0x10] sm:$0xff]  ;;  %v584_v42 = vld [vmem:[%s4404_s7 + $0x8] sm:$0xff] }
  0xc8   :  { %v214_v50 = vpop.permute.xlu1 %213 }
  0xc9   :  { %v253_v51 = vmul.f32 %v3021_v39, %v214_v50  ;;  %v254_v53 = vmul.f32 %v3082_v5, %v214_v50 }
  0xca   :  { %v3188_v55 = vpop.permute.xlu0 %221 }
  0xcb   :  { %v281_v56 = vadd.f32 %v253_v51, %v162_v47  ;;  %v3190_v59 = vadd.f32 %v254_v53, %v163_v48  ;;  %v509_v47 = vld [vmem:[%s4402_s5 + $0x50] sm:$0xff]  ;;  %v508_v48 = vld [vmem:[%s4402_s5 + $0x48] sm:$0xff]  ;;  %v507_v53 = vld [vmem:[%s4402_s5 + $0x40] sm:$0xff] }
  0xd0   :  { %v3196_v61 = vpop.permute.xlu1 %217 }
  0xd1   :  { %v255_v62 = vmul.f32 %v3021_v39, %v3196_v61 }
  0xd2   :  { %v3200_v49 = vpop.permute.xlu0 %225 }
  0xd3   :  { %v3202_v7 = vadd.f32 %v255_v62, %v164_v60  ;;  %v521_v60 = vld [vmem:[%s4402_s5 + $0xb0] sm:$0x7]  ;;  %v520_v62 = vld [vmem:[%s4402_s5 + $0xa8] sm:$0xff] }
  0xd4   :  { %2424 = vmatpush.msk.msra.mxu0 %vm527_vm1, %v521_v60 }
  0xd6   :  { %541 = vmatpush.msra.mxu0 %v520_v62 }
  0xd8   :  { %542 = vmatpush.msra.mxu0 %v519_v9 }
  0xdb   :  { %v321_v10 = vpop.permute.xlu0 %320 }
  0xdc   :  { %v366_v12 = vmul.f32 %v3057_v52, %v321_v10  ;;  %v367_v54 = vmul.f32 %v3084_v6, %v321_v10  ;;  %v504_v10 = vld [vmem:[%s4402_s5 + $0x28] sm:$0xff] }
  0xde   :  { %v394_v13 = vadd.f32 %v366_v12, %v275_v24  ;;  %v3209_v14 = vadd.f32 %v367_v54, %v276_v11  ;;  %v503_v11 = vld [vmem:[%s4402_s5 + $0x20] sm:$0xff] }
  0xe0   :  { %v428_v16 = vadd.f32 %v3096_v17, %v394_v13  ;;  %v518_v13 = vld [vmem:[%s4402_s5 + $0x98] sm:$0xff] }
  0xe1   :  { %543 = vmatpush.msra.mxu0 %v518_v13 }
  0xe3   :  { %v325_v4 = vpop.permute.xlu0 %324 }
  0xe4   :  { %v368_v41 = vmul.f32 %v3057_v52, %v325_v4  ;;  %v369_v22 = vmul.f32 %v3084_v6, %v325_v4  ;;  %v516_v4 = vld [vmem:[%s4402_s5 + $0x88] sm:$0xff] }
  0xe6   :  { %v396_v23 = vadd.f32 %v368_v41, %v277_v46  ;;  %v3217_v25 = vadd.f32 %v369_v22, %v278_v21  ;;  %v510_v46 = vld [vmem:[%s4402_s5 + $0x58] sm:$0xff]  ;;  %v500_v21 = vld [vmem:[%s4402_s5 + $0x8] sm:$0xff]  ;;  %v515_v41 = vld [vmem:[%s4402_s5 + $0x80] sm:$0xff] }
  0xe7   :  { %v499_v22 = vld [vmem:[%s4402_s5] sm:$0xff] }
  0xe8   :  { %v430_v24 = vadd.f32 %v3096_v17, %v396_v23 }
  0xea   :  { %v477_v29 = vadd.f32 %v430_v24, %v428_v16  ;;  %v517_v16 = vld [vmem:[%s4402_s5 + $0x90] sm:$0xff] }
  0xeb   :  { %v329_v30 = vpop.permute.xlu0 %328  ;;  %544 = vmatpush.msra.mxu0 %v517_v16 }
  0xec   :  { %v370_v31 = vmul.f32 %v3057_v52, %v329_v30  ;;  %v371_v63 = vmul.f32 %v3084_v6, %v329_v30 }
  0xed   :  { %545 = vmatpush.msra.mxu0 %v516_v4 }
  0xee   :  { %v398_v32 = vadd.f32 %v370_v31, %v279_v43  ;;  %v3222_v33 = vadd.f32 %v371_v63, %v280_v44  ;;  %v513_v43 = vld [vmem:[%s4402_s5 + $0x70] sm:$0xff]  ;;  %v512_v44 = vld [vmem:[%s4402_s5 + $0x68] sm:$0xff] }
  0xef   :  { %557 = vmatpush.msra.mxu1 %v513_v43  ;;  %546 = vmatpush.msra.mxu0 %v515_v41  ;;  %v585_v43 = vld [vmem:[%s4404_s7 + $0x10] sm:$0xff] }
  0xf0   :  { %v432_v57 = vadd.f32 %v3096_v17, %v398_v32  ;;  %v522_v32 = vld [vmem:[%s4432_s24] sm:$0x3] }
  0xf1   :  { %558 = vmatpush.msra.mxu1 %v512_v44  ;;  %2425 = vmatmul.msk.f32.vlgmr.msra.gmra.mxu0 %vm523_vm2, %v522_v32  ;;  %v586_v44 = vld [vmem:[%s4404_s7 + $0x18] sm:$0xff] }
  0xf2   :  { %v478_v35 = vadd.f32 %v477_v29, %v432_v57 }
  0xf3   :  { %v3225_v34 = vpop.permute.xlu0 %332  ;;  %559 = vmatpush.msra.mxu1 %v511_v45  ;;  %v587_v45 = vld [vmem:[%s4404_s7 + $0x20] sm:$0xff] }
  0xf4   :  { %v372_v36 = vmul.f32 %v3057_v52, %v3225_v34 }
  0xf5   :  { %560 = vmatpush.msra.mxu1 %v510_v46  ;;  %v588_v46 = vld [vmem:[%s4404_s7 + $0x28] sm:$0xff] }
  0xf6   :  { %v400_v37 = vadd.f32 %v372_v36, %v281_v56  ;;  %v506_v56 = vld [vmem:[%s4402_s5 + $0x38] sm:$0xff]  ;;  %s2776_s5 = smov [#allocation2]  }
  0xf7   :  { %561 = vmatpush.msra.mxu1 %v509_v47  ;;  %v589_v47 = vld [vmem:[%s4404_s7 + $0x30] sm:$0x3f] }
  0xf8   :  { %v434_v38 = vadd.f32 %v3096_v17, %v400_v37 }
  0xf9   :  { %562 = vmatpush.msra.mxu1 %v508_v48 }
  0xfa   :  { %v3230_v40 = vadd.f32 %v478_v35, %v434_v38  ;;  %v583_v38 = vld [vmem:[%s4404_s7] sm:$0xff] }
  0xfb   :  { %563 = vmatpush.msra.mxu1 %v507_v53 }
  0xfd   :  { %564 = vmatpush.msra.mxu1 %v506_v56 }
  0xff   :  { %565 = vmatpush.msra.mxu1 %v505_v8 }
 0x101   :  { %566 = vmatpush.msra.mxu1 %v504_v10 }
 0x103   :  { %567 = vmatpush.msra.mxu1 %v503_v11 }
 0x105   :  { %568 = vmatpush.msra.mxu1 %v502_v15 }
 0x107   :  { %569 = vmatpush.msra.mxu1 %v501_v19 }
 0x109   :  { %570 = vmatpush.msra.mxu1 %v500_v21 }
 0x10b   :  { %571 = vmatpush.msra.mxu1 %v499_v22 }
 0x114   :  { %v677_v50 = vpop.f32.mrf.mxu2  ;;  %v715_v51 = vpop.f32.mrf.mxu3 }
 0x11c   :  { %v680_v12 = vpop.f32.mrf.mxu2  ;;  %v718_v54 = vpop.f32.mrf.mxu3 }
 0x124   :  { %v683_v23 = vpop.f32.mrf.mxu2  ;;  %v721_v24 = vpop.f32.mrf.mxu3 }
 0x12c   :  { %v686_v29 = vpop.f32.mrf.mxu2  ;;  %v724_v30 = vpop.f32.mrf.mxu3 }
 0x134   :  { %v689_v31 = vpop.f32.mrf.mxu2  ;;  %v727_v63 = vpop.f32.mrf.mxu3 }
 0x13e   :  { %v692_v57 = vpop.f32.mrf.mxu2  ;;  %v730_v35 = vpop.f32.mrf.mxu3 }
 0x146   :  { %v695_v36 = vpop.f32.mrf.mxu2  ;;  %v733_v37 = vpop.f32.mrf.mxu3 }
 0x147   :  { %745 = vmatpush.xpose.msrb.mxu0 %v695_v36  ;;  %2426 = vmatpush.msk.msrb.mxu1 %vm4422_vm0, %v733_v37  ;;  %v257_v37 = vmul.f32 %v3021_v39, %v3188_v55 }
 0x149   :  { %985 = vmatpush.msrb.mxu1 %v730_v35 }
 0x14b   :  { %746 = vmatpush.xpose.msrb.mxu0 %v692_v57  ;;  %986 = vmatpush.msrb.mxu1 %v727_v63 }
 0x14d   :  { %987 = vmatpush.msrb.mxu1 %v724_v30 }
 0x14f   :  { %747 = vmatpush.xpose.msrb.mxu0 %v689_v31  ;;  %988 = vmatpush.msrb.mxu1 %v721_v24 }
 0x151   :  { %989 = vmatpush.msrb.mxu1 %v718_v54 }
 0x153   :  { %748 = vmatpush.xpose.msrb.mxu0 %v686_v29  ;;  %990 = vmatpush.msrb.mxu1 %v715_v51 }
 0x157   :  { %749 = vmatpush.xpose.msrb.mxu0 %v683_v23 }
 0x15b   :  { %750 = vmatpush.xpose.msrb.mxu0 %v680_v12 }
 0x15f   :  { %751 = vmatpush.xpose.msrb.mxu0 %v677_v50 }
 0x162   :  { %752 = vmatmul.f32.vlgmr.msrb.gmra.mxu0 %v583_v38  ;;  %v258_v38 = vmul.f32 %v3082_v5, %v3188_v55 }
 0x16a   :  { %755 = vmatmul.f32.gmra.mxu0 %v584_v42 }
 0x16e   :  { %v3326_v48 = vpop.f32.mrf.mxu0 }
 0x172   :  { %758 = vmatmul.f32.gmra.mxu0 %v585_v43 }
 0x17a   :  { %761 = vmatmul.f32.gmra.mxu0 %v586_v44 }
 0x182   :  { %764 = vmatmul.f32.gmra.mxu0 %v587_v45 }
 0x18a   :  { %767 = vmatmul.f32.gmra.mxu0 %v588_v46 }
 0x192   :  { %770 = vmatmul.f32.gmra.mxu0 %v589_v47 }
 0x1df   :  { %v753_v50 = vpop.f32.mrf.mxu0 }
 0x1e0   :  { %v774_v51 = vmul.f32 0.088388346, %v753_v50 }
 0x1e2   :  { %v782_v53 = vsel %vm781_vm3, %v774_v51, -inf }
 0x1e3   :  { %783 = vmax.xlane.f32.xlu1 %v782_v53 }
 0x1e7   :  { %v756_v56 = vpop.f32.mrf.mxu0 }
 0x1e8   :  { %v775_v60 = vmul.f32 0.088388346, %v756_v56 }
 0x1ea   :  { %v785_v62 = vsel %vm781_vm3, %v775_v60, -inf }
 0x1eb   :  { %786 = vmax.xlane.f32.xlu2 %v785_v62 }
 0x1ef   :  { %v759_v8 = vpop.f32.mrf.mxu0 }
 0x1f0   :  { %v776_v9 = vmul.f32 0.088388346, %v759_v8 }
 0x1f2   :  { %v788_v10 = vsel %vm781_vm3, %v776_v9, -inf }
 0x1f3   :  { %789 = vmax.xlane.f32.xlu2 %v788_v10 }
 0x1f7   :  { %v762_v11 = vpop.f32.mrf.mxu0 }
 0x1fc   :  { %129 = vperm.xlu1 %2565, %v2955_v20  }
 0x1ff   :  { %v765_v12 = vpop.f32.mrf.mxu0 }
 0x200   :  { %v778_v54 = vmul.f32 0.088388346, %v765_v12  ;;  %v259_v12 = vmul.f32 %v3021_v39, %v3200_v49 }
 0x202   :  { %v794_v13 = vsel %vm781_vm3, %v778_v54, -inf }
 0x203   :  { %795 = vmax.xlane.f32.xlu2 %v794_v13 }
 0x204   :  { %2566 = vset.pattern.permute.xlu1 %v2764_v1 }
 0x205   :  { %336 = vperm.xlu1 %2566, %v2981_v27  }
 0x207   :  { %v768_v15 = vpop.f32.mrf.mxu0 }
 0x208   :  { %v3343_v21 = vmul.f32 0.088388346, %v768_v15 }
 0x20a   :  { %v797_v27 = vsel %vm781_vm3, %v3343_v21, -inf }
 0x20b   :  { %798 = vmax.xlane.f32.xlu0 %v797_v27  ;;  %v2767_v27 = vmov 49.0  }
 0x20d   :  { %2567 = vset.pattern.permute.xlu1 %v2765_v2  ;;  %v3347_v2 = vmul.f32 0.088388346, %v762_v11 }
 0x20e   :  { %134 = vperm.xlu1 %2567, %v2986_v28  }
 0x20f   :  { %v771_v16 = vpop.f32.mrf.mxu0  ;;  %v791_v28 = vsel %vm781_vm3, %v3347_v2, -inf }
 0x210   :  { %v3337_v19 = vmul.f32 0.088388346, %v771_v16 }
 0x212   :  { %v801_v4 = vsel %vm800_vm4, %v3337_v19, -inf }
 0x213   :  { %802 = vmax.xlane.f32.xlu2 %v801_v4 }
 0x216   :  { %2569 = vset.pattern.permute.xlu1 %v2764_v1 }
 0x217   :  { %340 = vperm.xlu1 %2569, %v2955_v20  }
 0x241   :  { %792 = vmax.xlane.f32.xlu1 %v791_v28 }
 0x256   :  { %v784_v41 = vpop.xlane.xlu1 %783 }
 0x257   :  { %v804_v22 = vsub.f32 %v774_v51, %v784_v41  ;;  %v471_v41 = vrot.slane %v3179_v26, 4 }
 0x259   :  { %v811_v23 = vmul.f32 1.442695, %v804_v22 }
 0x25b   :  { %2572 = vpow2.f32 %v811_v23 }
 0x25e   :  { %v787_v24 = vpop.xlane.xlu2 %786 }
 0x25f   :  { %v805_v1 = vsub.f32 %v775_v60, %v787_v24 }
 0x261   :  { %v3351_v29 = vpop.eup %2572  ;;  %v813_v20 = vmul.f32 1.442695, %v805_v1 }
 0x262   :  { %v825_v30 = vsel %vm781_vm3, %v3351_v29, 0.0 }
 0x263   :  { %2574 = vpow2.f32 %v813_v20  ;;  %826 = vadd.xlane.f32.xlu2 %v825_v30 }
 0x266   :  { %v790_v31 = vpop.xlane.xlu2 %789 }
 0x267   :  { %v806_v63 = vsub.f32 %v776_v9, %v790_v31  ;;  %v3376_v9 = vpop.permute.xlu0 %344 }
 0x269   :  { %v3355_v32 = vpop.eup %2574  ;;  %v815_v57 = vmul.f32 1.442695, %v806_v63  ;;  %v472_v63 = vadd.f32 %v471_v41, %v3179_v26 }
 0x26a   :  { %v828_v35 = vsel %vm781_vm3, %v3355_v32, 0.0 }
 0x26b   :  { %2576 = vpow2.f32 %v815_v57  ;;  %829 = vadd.xlane.f32.xlu2 %v828_v35 }
 0x26e   :  { %v130_v36 = vpop.permute.xlu1 %129 }
 0x26f   :  { %v166_v42 = vmul.f32 %v3076_v0, %v130_v36  ;;  %v167_v43 = vmul.f32 %v3078_v3, %v130_v36 }
 0x271   :  { %v3365_v44 = vpop.eup %2576  ;;  %v285_v45 = vadd.f32 %v257_v37, %v166_v42  ;;  %v286_v46 = vadd.f32 %v258_v38, %v167_v43 }
 0x272   :  { %v831_v47 = vsel %vm781_vm3, %v3365_v44, 0.0 }
 0x273   :  { %832 = vadd.xlane.f32.xlu2 %v831_v47 }
 0x276   :  { %v796_v50 = vpop.xlane.xlu2 %795 }
 0x277   :  { %v808_v51 = vsub.f32 %v778_v54, %v796_v50  ;;  %v3369_v53 = vpop.permute.xlu1 %336  ;;  %v260_v54 = vmul.f32 %v3082_v5, %v3200_v49 }
 0x278   :  { %v374_v56 = vmul.f32 %v3057_v52, %v3369_v53 }
 0x279   :  { %v819_v55 = vmul.f32 1.442695, %v808_v51 }
 0x27a   :  { %v402_v60 = vadd.f32 %v374_v56, %v3202_v7 }
 0x27b   :  { %2578 = vpow2.f32 %v819_v55 }
 0x27c   :  { %v436_v62 = vadd.f32 %v3096_v17, %v402_v60  ;;  %2580 = vrcp.f32 %v2767_v27 }
 0x27e   :  { %v480_v8 = vadd.f32 %v3230_v40, %v436_v62  ;;  %v378_v40 = vmul.f32 %v3057_v52, %v3376_v9 }
 0x280   :  { %v135_v10 = vpop.permute.xlu1 %134 }
 0x281   :  { %v3378_v11 = vpop.eup %2578  ;;  %v168_v13 = vmul.f32 %v3076_v0, %v135_v10  ;;  %v169_v7 = vmul.f32 %v3078_v3, %v135_v10 }
 0x282   :  { %v837_v15 = vsel %vm781_vm3, %v3378_v11, 0.0  ;;  %v2581_v24 = vpop.eup %2580 }
 0x283   :  { %v287_v16 = vadd.f32 %v259_v12, %v168_v13  ;;  %v3390_v4 = vadd.f32 %v260_v54, %v169_v7  ;;  %838 = vadd.xlane.f32.xlu2 %v837_v15  ;;  %v491_v57 = vmul.f32 49.0, %v2581_v24  ;;  %vm495_vm5 = vweird.f32 %v2581_v24  ;;  %v799_v7 = vpop.xlane.xlu0 %798 }
 0x285   :  { %v406_v39 = vadd.f32 %v378_v40, %v287_v16  ;;  %v492_v42 = vsub.f32 1.0, %v491_v57  ;;  %v809_v16 = vsub.f32 %v3343_v21, %v799_v7 }
 0x286   :  { %v803_v28 = vpop.xlane.xlu2 %802 }
 0x287   :  { %v440_v49 = vadd.f32 %v3096_v17, %v406_v39  ;;  %v810_v0 = vsub.f32 %v3337_v19, %v803_v28  ;;  %v473_v19 = vrot.slane %v472_v63, 2  ;;  %v493_v47 = vmul.f32 %v2581_v24, %v492_v42 }
 0x288   :  { %v821_v27 = vmul.f32 1.442695, %v809_v16 }
 0x289   :  { %v823_v22 = vmul.f32 1.442695, %v810_v0  ;;  %v341_v23 = vpop.permute.xlu1 %340  ;;  %v482_v38 = vsel %vm4422_vm0, %v440_v49, 0.0  ;;  %v494_v56 = vadd.f32 %v2581_v24, %v493_v47 }
 0x28a   :  { %v376_v1 = vmul.f32 %v3057_v52, %v341_v23  ;;  %v377_v20 = vmul.f32 %v3084_v6, %v341_v23 }
 0x28b   :  { %2582 = vpow2.f32 %v823_v22  ;;  %v496_v62 = vsel %vm495_vm5, %v2581_v24, %v494_v56 }
 0x28c   :  { %v404_v30 = vadd.f32 %v376_v1, %v285_v45  ;;  %v3397_v31 = vadd.f32 %v377_v20, %v286_v46  ;;  %v474_v46 = vadd.f32 %v473_v19, %v472_v63 }
 0x28e   :  { %v438_v35 = vadd.f32 %v3096_v17, %v404_v30  ;;  %v475_v26 = vrot.slane %v474_v46, 1 }
 0x290   :  { %v481_v36 = vadd.f32 %v480_v8, %v438_v35  ;;  %v476_v55 = vadd.f32 %v475_v26, %v474_v46 }
 0x291   :  { %v3401_v37 = vpop.eup %2582 }
 0x292   :  { %v483_v43 = vadd.f32 %v482_v38, %v481_v36  ;;  %v843_v52 = vsel %vm800_vm4, %v3401_v37, 0.0  ;;  %v497_v10 = vmul.f32 %v496_v62, %v476_v55 }
 0x293   :  { %844 = vadd.xlane.f32.xlu0 %v843_v52 }
 0x294   :  { %v484_v45 = vrot.slane %v483_v43, 4 }
 0x296   :  { %v485_v50 = vadd.f32 %v484_v45, %v483_v43 }
 0x298   :  { %v486_v51 = vrot.slane %v485_v50, 2 }
 0x29a   :  { %v487_v17 = vadd.f32 %v486_v51, %v485_v50 }
 0x29c   :  { %v488_v60 = vrot.slane %v487_v17, 1 }
 0x29e   :  { %v489_v8 = vadd.f32 %v488_v60, %v487_v17 }
 0x2a0   :  { %v498_v12 = vmul.f32 %v496_v62, %v489_v8 }
 0x2a2   :  { %v554_v54 = vsel %vm553_vm6, %v498_v12, %v497_v10  ;;  %vm581_vm6 = vcmask 66560  }
 0x2a3   :  { %572 = vmatmul.f32.vlgmr.msra.gmra.mxu1 %v554_v54 }
 0x2b4   :  { %v793_v13 = vpop.xlane.xlu1 %792 }
 0x2b5   :  { %v807_v15 = vsub.f32 %v3347_v2, %v793_v13 }
 0x2b7   :  { %v817_v40 = vmul.f32 1.442695, %v807_v15  ;;  %v2570_v15 = vld [vmem:[%s4403_s6] ss:$0 sm:$0xff] }
 0x2b9   :  { %2584 = vpow2.f32 %v817_v40 }
 0x2ba   :  { %2586 = vpow2.f32 %v821_v27  ;;  %v637_v27 = vld [vmem:[%s4406_s9 + $0x78] sm:$0xff] }
 0x2bb   :  { %1016 = vmatpush.msra.mxu0 %v637_v27  ;;  %2515 = vmatpush.msrb.mxu2 %v637_v27  ;;  %v622_v27 = vld [vmem:[%s4406_s9] sm:$0xff] }
 0x2bf   :  { %v3408_v39 = vpop.eup %2584 }
 0x2c0   :  { %v834_v28 = vsel %vm781_vm3, %v3408_v39, 0.0  ;;  %v3412_v49 = vpop.eup %2586 }
 0x2c1   :  { %835 = vadd.xlane.f32.xlu1 %v834_v28  ;;  %v840_v0 = vsel %vm781_vm3, %v3412_v49, 0.0  ;;  %v636_v28 = vld [vmem:[%s4406_s9 + $0x70] sm:$0xff] }
 0x2c2   :  { %1017 = vmatpush.msra.mxu0 %v636_v28  ;;  %2516 = vmatpush.msrb.mxu2 %v636_v28 }
 0x2c9   :  { %841 = vadd.xlane.f32.xlu1 %v840_v0  ;;  %v635_v0 = vld [vmem:[%s4406_s9 + $0x68] sm:$0xff] }
 0x2ca   :  { %1018 = vmatpush.msra.mxu0 %v635_v0  ;;  %2517 = vmatpush.msrb.mxu2 %v635_v0 }
 0x2d6   :  { %v827_v41 = vpop.xlane.xlu2 %826 }
 0x2d7   :  { %2588 = vrcp.f32 %v827_v41  ;;  %v857_v24 = vand.u32 2147483648, %v827_v41  ;;  %v855_v20 = vand.u32 2147483647, %v827_v41  ;;  %vm851_vm8 = vweird.f32 %v827_v41 }
 0x2d9   :  { %v858_v57 = vor.u32 1.1754944e-38, %v857_v24  ;;  %vm856_vm10 = vcmp.eq.f32.partialorder %v855_v20, 8.507059e+37 }
 0x2dd   :  { %v2589_v2 = vpop.eup %2588 }
 0x2de   :  { %v847_v22 = vmul.f32 %v2589_v2, %v827_v41  ;;  %v830_v21 = vpop.xlane.xlu2 %829  ;;  %vm852_vm7 = vweird.f32 %v2589_v2 }
 0x2df   :  { %2590 = vrcp.f32 %v830_v21  ;;  %vm853_vm9 = vmor %vm851_vm8, %vm852_vm7  ;;  %vm866_vm11 = vweird.f32 %v830_v21  ;;  %v872_v38 = vand.u32 2147483648, %v830_v21  ;;  %v870_v45 = vand.u32 2147483647, %v830_v21 }
 0x2e0   :  { %v848_v23 = vsub.f32 1.0, %v847_v22  ;;  %vm4420_vm7 = vcmask 16384   ;;  %v633_v22 = vld [vmem:[%s4406_s9 + $0x58] sm:$0xff] }
 0x2e1   :  { %v873_v47 = vor.u32 1.1754944e-38, %v872_v38  ;;  %vm871_vm14 = vcmp.eq.f32.partialorder %v870_v45, 8.507059e+37 }
 0x2e2   :  { %v849_v1 = vmul.f32 %v2589_v2, %v848_v23  ;;  %v631_v23 = vld [vmem:[%s4406_s9 + $0x48] sm:$0xff] }
 0x2e4   :  { %v850_v30 = vadd.f32 %v2589_v2, %v849_v1  ;;  %v630_v1 = vld [vmem:[%s4406_s9 + $0x40] sm:$0xff] }
 0x2e5   :  { %v2591_v63 = vpop.eup %2590 }
 0x2e6   :  { %v862_v35 = vmul.f32 %v2591_v63, %v830_v21  ;;  %v833_v36 = vpop.xlane.xlu2 %832  ;;  %v854_v19 = vsel %vm853_vm9, %v2589_v2, %v850_v30  ;;  %vm867_vm12 = vweird.f32 %v2591_v63  ;;  %v634_v2 = vld [vmem:[%s4406_s9 + $0x60] sm:$0xff]  ;;  %v632_v21 = vld [vmem:[%s4406_s9 + $0x50] sm:$0xff] }
 0x2e7   :  { %2592 = vrcp.f32 %v833_v36  ;;  %v859_v42 = vsel %vm856_vm10, %v858_v57, %v854_v19  ;;  %vm868_vm13 = vmor %vm866_vm11, %vm867_vm12  ;;  %vm881_vm15 = vweird.f32 %v833_v36  ;;  %v887_v17 = vand.u32 2147483648, %v833_v36  ;;  %1019 = vmatpush.msra.mxu0 %v634_v2  ;;  %2518 = vmatpush.msrb.mxu2 %v634_v2  ;;  %v628_v57 = vld [vmem:[%s4406_s9 + $0x30] sm:$0xff] }
 0x2e8   :  { %v863_v43 = vsub.f32 1.0, %v862_v35  ;;  %v860_v52 = vmul.f32 %v3351_v29, %v859_v42  ;;  %v885_v29 = vand.u32 2147483647, %v833_v36  ;;  %v627_v35 = vld [vmem:[%s4406_s9 + $0x28] sm:$0xff] }
 0x2e9   :  { %v888_v10 = vor.u32 1.1754944e-38, %v887_v17  ;;  %1020 = vmatpush.msra.mxu0 %v633_v22  ;;  %2519 = vmatpush.msrb.mxu2 %v633_v22 }
 0x2ea   :  { %v864_v46 = vmul.f32 %v2591_v63, %v863_v43  ;;  %2427 = vmatmul.msk.f32.vlgmr.msrb.gmra.mxu1 %vm781_vm3, %v860_v52  ;;  %vm886_vm5 = vcmp.eq.f32.partialorder %v885_v29, 8.507059e+37  ;;  %v626_v52 = vld [vmem:[%s4406_s9 + $0x20] sm:$0xff] }
 0x2eb   :  { %1021 = vmatpush.msra.mxu0 %v632_v21  ;;  %2520 = vmatpush.msrb.mxu2 %v632_v21 }
 0x2ec   :  { %v865_v50 = vadd.f32 %v2591_v63, %v864_v46 }
 0x2ed   :  { %v2593_v26 = vpop.eup %2592  ;;  %1022 = vmatpush.msra.mxu0 %v631_v23  ;;  %2521 = vmatpush.msrb.mxu2 %v631_v23  ;;  %v2647_v23 = vld [vmem:[%s4405_s8 + $0xe8] sm:$0xff] }
 0x2ee   :  { %v877_v51 = vmul.f32 %v2593_v26, %v833_v36  ;;  %v869_v56 = vsel %vm868_vm13, %v2591_v63, %v865_v50  ;;  %vm882_vm1 = vweird.f32 %v2593_v26  ;;  %v629_v63 = vld [vmem:[%s4406_s9 + $0x38] sm:$0xff] }
 0x2ef   :  { %v874_v55 = vsel %vm871_vm14, %v873_v47, %v869_v56  ;;  %vm883_vm2 = vmor %vm881_vm15, %vm882_vm1  ;;  %1023 = vmatpush.msra.mxu0 %v630_v1  ;;  %2522 = vmatpush.msrb.mxu2 %v630_v1  ;;  %v624_v56 = vld [vmem:[%s4406_s9 + $0x10] sm:$0xff] }
 0x2f0   :  { %v878_v60 = vsub.f32 1.0, %v877_v51  ;;  %v875_v62 = vmul.f32 %v3355_v32, %v874_v55  ;;  %v625_v51 = vld [vmem:[%s4406_s9 + $0x18] sm:$0xff]  ;;  %v623_v55 = vld [vmem:[%s4406_s9 + $0x8] sm:$0xff] }
 0x2f1   :  { %1024 = vmatpush.msra.mxu0 %v629_v63  ;;  %2523 = vmatpush.msrb.mxu2 %v629_v63 }
 0x2f2   :  { %v879_v8 = vmul.f32 %v2593_v26, %v878_v60  ;;  %2428 = vmatmul.msk.f32.gmra.mxu1 %vm781_vm3, %v875_v62 }
 0x2f3   :  { %1025 = vmatpush.msra.mxu0 %v628_v57  ;;  %2524 = vmatpush.msrb.mxu2 %v628_v57 }
 0x2f4   :  { %v880_v12 = vadd.f32 %v2593_v26, %v879_v8 }
 0x2f5   :  { %1026 = vmatpush.msra.mxu0 %v627_v35  ;;  %2525 = vmatpush.msrb.mxu2 %v627_v35  ;;  %v2649_v35 = vld [vmem:[%s4405_s8 + $0xc8] sm:$0xff] }
 0x2f6   :  { %v884_v54 = vsel %vm883_vm2, %v2593_v26, %v880_v12  ;;  %v3449_v41 = vpop.xlane.xlu2 %838 }
 0x2f7   :  { %v889_v13 = vsel %vm886_vm5, %v888_v10, %v884_v54  ;;  %2594 = vrcp.f32 %v3449_v41  ;;  %1027 = vmatpush.msra.mxu0 %v626_v52  ;;  %2526 = vmatpush.msrb.mxu2 %v626_v52  ;;  %vm911_vm9 = vweird.f32 %v3449_v41  ;;  %v917_v62 = vand.u32 2147483648, %v3449_v41 }
 0x2f8   :  { %v890_v7 = vmul.f32 %v3365_v44, %v889_v13  ;;  %v915_v8 = vand.u32 2147483647, %v3449_v41 }
 0x2f9   :  { %1028 = vmatpush.msra.mxu0 %v625_v51  ;;  %2527 = vmatpush.msrb.mxu2 %v625_v51  ;;  %v2654_v51 = vld [vmem:[%s4405_s8 + $0x78] sm:$0xff] }
 0x2fa   :  { %2429 = vmatmul.msk.f32.gmra.mxu1 %vm781_vm3, %v890_v7  ;;  %vm916_vm15 = vcmp.eq.f32.partialorder %v915_v8, 8.507059e+37 }
 0x2fb   :  { %1029 = vmatpush.msra.mxu0 %v624_v56  ;;  %2528 = vmatpush.msrb.mxu2 %v624_v56  ;;  %v2655_v56 = vld [vmem:[%s4405_s8 + $0x68] sm:$0xff] }
 0x2fd   :  { %v3467_v20 = vpop.eup %2594  ;;  %1030 = vmatpush.msra.mxu0 %v623_v55  ;;  %2529 = vmatpush.msrb.mxu2 %v623_v55  ;;  %v2656_v55 = vld [vmem:[%s4405_s8 + $0x58] sm:$0xff] }
 0x2fe   :  { %v907_v30 = vmul.f32 %v3467_v20, %v3449_v41  ;;  %vm912_vm11 = vweird.f32 %v3467_v20 }
 0x2ff   :  { %vm3509_vm14 = vmor %vm911_vm9, %vm912_vm11  ;;  %1031 = vmatpush.msra.mxu0 %v622_v27  ;;  %2530 = vmatpush.msrb.mxu2 %v622_v27 }
 0x300   :  { %v908_v19 = vsub.f32 1.0, %v907_v30  ;;  %v2648_v30 = vld [vmem:[%s4405_s8 + $0xd8] sm:$0xff] }
 0x302   :  { %v909_v47 = vmul.f32 %v3467_v20, %v908_v19 }
 0x304   :  { %v910_v54 = vadd.f32 %v3467_v20, %v909_v47  ;;  %v2652_v47 = vld [vmem:[%s4405_s8 + $0x98] sm:$0xff] }
 0x306   :  { %v3480_v38 = vpop.xlane.xlu0 %844  ;;  %v914_v41 = vsel %vm3509_vm14, %v3467_v20, %v910_v54 }
 0x307   :  { %v947_v19 = vand.u32 2147483648, %v3480_v38  ;;  %v945_v52 = vand.u32 2147483647, %v3480_v38 }
 0x309   :  { %vm946_vm11 = vcmp.eq.f32.partialorder %v945_v52, 8.507059e+37 }
 0x320   :  { %v573_v32 = vpop.f32.mrf.mxu1 }
 0x321   :  { %v574_v40 = vadd.f32 %v573_v32, %v3326_v48 }
 0x323   :  { %v3426_v16 = vadd.f32 %v2570_v15, %v574_v40 }
 0x325   :  { %582 = vst.msk [vmem:[%s4410_s13] sm:$0x3] %vm581_vm6, %v3426_v16  ;;  %1319 = vrot.lane.b32.xlu1 %v3426_v16, %s2768_s25  ;;  %v3436_v44 = vmul.f32 %v3426_v16, %v3426_v16  ;;  %vm941_vm6 = vweird.f32 %v3480_v38 }
 0x327   :  { %v1287_v48 = vsel %vm4420_vm7, %v3436_v44, 0.0 }
 0x328   :  { %1288 = vadd.xlane.f32.xlu2 %v1287_v48  ;;  %v918_v48 = vor.u32 1.1754944e-38, %v917_v62  ;;  %v2658_v62 = vld [vmem:[%s4405_s8 + $0x38] sm:$0xff] }
 0x32a   :  { %v919_v2 = vsel %vm916_vm15, %v918_v48, %v914_v41 }
 0x32b   :  { %v920_v1 = vmul.f32 %v3378_v11, %v919_v2  ;;  %v2650_v11 = vld [vmem:[%s4405_s8 + $0xb8] sm:$0xff] }
 0x334   :  { %v836_v24 = vpop.xlane.xlu1 %835 }
 0x335   :  { %2596 = vrcp.f32 %v836_v24  ;;  %v902_v46 = vand.u32 2147483648, %v836_v24  ;;  %v900_v26 = vand.u32 2147483647, %v836_v24  ;;  %vm896_vm10 = vweird.f32 %v836_v24 }
 0x337   :  { %v903_v29 = vor.u32 1.1754944e-38, %v902_v46  ;;  %vm901_vm13 = vcmp.eq.f32.partialorder %v900_v26, 8.507059e+37 }
 0x33b   :  { %v2597_v36 = vpop.eup %2596 }
 0x33c   :  { %v892_v42 = vmul.f32 %v2597_v36, %v836_v24  ;;  %v3482_v43 = vpop.xlane.xlu1 %841  ;;  %vm897_vm8 = vweird.f32 %v2597_v36 }
 0x33d   :  { %2598 = vrcp.f32 %v3482_v43  ;;  %vm898_vm12 = vmor %vm896_vm10, %vm897_vm8  ;;  %v932_v24 = vand.u32 2147483648, %v3482_v43  ;;  %vm926_vm2 = vweird.f32 %v3482_v43  ;;  %v930_v20 = vand.u32 2147483647, %v3482_v43 }
 0x33e   :  { %v893_v45 = vsub.f32 1.0, %v892_v42  ;;  %2600 = vrcp.f32 %v3480_v38 }
 0x33f   :  { %vm931_vm8 = vcmp.eq.f32.partialorder %v930_v20, 8.507059e+37 }
 0x340   :  { %v894_v50 = vmul.f32 %v2597_v36, %v893_v45  ;;  %v2651_v45 = vld [vmem:[%s4405_s8 + $0xa8] sm:$0xff] }
 0x342   :  { %v895_v17 = vadd.f32 %v2597_v36, %v894_v50  ;;  %v948_v50 = vor.u32 1.1754944e-38, %v947_v19 }
 0x343   :  { %v2599_v60 = vpop.eup %2598 }
 0x344   :  { %v922_v10 = vmul.f32 %v2599_v60, %v3482_v43  ;;  %v899_v12 = vsel %vm898_vm12, %v2597_v36, %v895_v17  ;;  %v2601_v13 = vpop.eup %2600  ;;  %vm927_vm1 = vweird.f32 %v2599_v60  ;;  %v933_v36 = vor.u32 1.1754944e-38, %v932_v24 }
 0x345   :  { %v904_v7 = vsel %vm901_vm13, %v903_v29, %v899_v12  ;;  %v937_v28 = vmul.f32 %v2601_v13, %v3480_v38  ;;  %vm928_vm5 = vmor %vm926_vm2, %vm927_vm1  ;;  %vm942_vm9 = vweird.f32 %v2601_v13  ;;  %v2653_v38 = vld [vmem:[%s4405_s8 + $0x88] sm:$0xff]  ;;  %v2660_v29 = vld [vmem:[%s4405_s8 + $0x18] sm:$0xff] }
 0x346   :  { %v923_v32 = vsub.f32 1.0, %v922_v10  ;;  %v905_v40 = vmul.f32 %v3408_v39, %v904_v7  ;;  %v2646_v39 = vld [vmem:[%s4405_s8 + $0xf8] sm:$0xff]  ;;  %vm943_vm10 = vmor %vm941_vm6, %vm942_vm9  ;;  %v2661_v10 = vld [vmem:[%s4405_s8 + $0x8] sm:$0xff]  ;;  %vm1073_vm9 = vcmask 1045504  }
 0x347   :  { %1569 = vmatpush.msra.mxu2 %v2646_v39  ;;  %v938_v22 = vsub.f32 1.0, %v937_v28 }
 0x348   :  { %v924_v0 = vmul.f32 %v2599_v60, %v923_v32  ;;  %2430 = vmatmul.msk.f32.gmra.mxu1 %vm781_vm3, %v905_v40 }
 0x349   :  { %1570 = vmatpush.msra.mxu2 %v2647_v23  ;;  %v939_v63 = vmul.f32 %v2601_v13, %v938_v22 }
 0x34a   :  { %v925_v21 = vadd.f32 %v2599_v60, %v924_v0 }
 0x34b   :  { %1571 = vmatpush.msra.mxu2 %v2648_v30  ;;  %v940_v43 = vadd.f32 %v2601_v13, %v939_v63 }
 0x34c   :  { %v929_v57 = vsel %vm928_vm5, %v2599_v60, %v925_v21  ;;  %v2657_v60 = vld [vmem:[%s4405_s8 + $0x48] sm:$0xff] }
 0x34d   :  { %1572 = vmatpush.msra.mxu2 %v2649_v35  ;;  %v934_v42 = vsel %vm931_vm8, %v933_v36, %v929_v57  ;;  %v944_v26 = vsel %vm943_vm10, %v2601_v13, %v940_v43 }
 0x34e   :  { %v935_v46 = vmul.f32 %v3412_v49, %v934_v42  ;;  %v949_v49 = vsel %vm946_vm11, %v948_v50, %v944_v26  ;;  %v3595_v50 = vld [vmem:[%s4407_s10] ss:$0 sm:$0xff] }
 0x34f   :  { %1573 = vmatpush.msra.mxu2 %v2650_v11  ;;  %v950_v17 = vmul.f32 %v3401_v37, %v949_v49  ;;  %v2659_v37 = vld [vmem:[%s4405_s8 + $0x28] sm:$0xff]  ;;  %v2662_v26 = vld [vmem:[%s4431_s26] sm:$0xff] }
 0x350   :  { %2431 = vmatmul.msk.f32.gmra.mxu1 %vm781_vm3, %v920_v1 }
 0x351   :  { %1574 = vmatpush.msra.mxu2 %v2651_v45 }
 0x353   :  { %1575 = vmatpush.msra.mxu2 %v2652_v47  ;;  %v429_v47 = vadd.f32 %v3098_v18, %v3209_v14  ;;  %v431_v14 = vadd.f32 %v3098_v18, %v3217_v25  ;;  %v2664_v25 = vld [vmem:[%s4431_s26 + $0x10] sm:$0xff] }
 0x355   :  { %1576 = vmatpush.msra.mxu2 %v2653_v38  ;;  %v3600_v38 = vadd.f32 %v2662_v26, %v429_v47 }
 0x357   :  { %1577 = vmatpush.msra.mxu2 %v2654_v51 }
 0x358   :  { %2432 = vmatmul.msk.f32.gmra.mxu1 %vm781_vm3, %v935_v46 }
 0x359   :  { %1578 = vmatpush.msra.mxu2 %v2655_v56  ;;  %v2663_v56 = vld [vmem:[%s4431_s26 + $0x8] sm:$0xff] }
 0x35b   :  { %1579 = vmatpush.msra.mxu2 %v2656_v55  ;;  %v373_v55 = vmul.f32 %v3084_v6, %v3225_v34  ;;  %v256_v34 = vmul.f32 %v3082_v5, %v3196_v61  ;;  %v2665_v5 = vld [vmem:[%s4431_s26 + $0x18] sm:$0xff] }
 0x35d   :  { %1580 = vmatpush.msra.mxu2 %v2657_v60  ;;  %v433_v60 = vadd.f32 %v3098_v18, %v3222_v33 }
 0x35f   :  { %1581 = vmatpush.msra.mxu2 %v2658_v62 }
 0x360   :  { %2433 = vmatmul.msk.f32.gmra.mxu1 %vm781_vm3, %v950_v17  ;;  %v3616_v17 = vadd.f32 %v2663_v56, %v431_v14 }
 0x361   :  { %1582 = vmatpush.msra.mxu2 %v2659_v37  ;;  %v401_v37 = vadd.f32 %v373_v55, %v3190_v59  ;;  %v375_v59 = vmul.f32 %v3084_v6, %v3369_v53 }
 0x363   :  { %1583 = vmatpush.msra.mxu2 %v2660_v29  ;;  %v435_v33 = vadd.f32 %v3098_v18, %v401_v37 }
 0x365   :  { %1584 = vmatpush.msra.mxu2 %v2661_v10  ;;  %v165_v10 = vmul.f32 %v3078_v3, %v3192_v58  ;;  %v3649_v61 = vadd.f32 %v2665_v5, %v435_v33 }
 0x367   :  { %v992_v8 = vpop.f32.mrf.mxu1 }
 0x368   :  { %1032 = vmatmul.f32.vlgmr.msra.gmra.mxu0 %v992_v8  ;;  %v3630_v8 = vadd.f32 %v2664_v25, %v433_v60 }
 0x36f   :  { %v995_v12 = vpop.f32.mrf.mxu1 }
 0x370   :  { %1035 = vmatmul.f32.vlgmr.msrb.gmra.mxu2 %v995_v12  ;;  %v284_v12 = vadd.f32 %v256_v34, %v165_v10 }
 0x372   :  { %v403_v3 = vadd.f32 %v375_v59, %v284_v12 }
 0x374   :  { %v437_v53 = vadd.f32 %v3098_v18, %v403_v3 }
 0x377   :  { %v998_v54 = vpop.f32.mrf.mxu1 }
 0x378   :  { %1038 = vmatmul.f32.gmra.mxu2 %v998_v54 }
 0x397   :  { %v3585_v11 = vpop.permute.xlu1 %1319 }
 0x39b   :  { %v1289_v13 = vpop.xlane.xlu2 %1288 }
 0x39c   :  { %2602 = vrsqrt.f32 %v1289_v13  ;;  %vm1297_vm12 = vcmp.eq.f32.partialorder %v1289_v13, inf  ;;  %v1300_v0 = vand.u32 2147483648, %v1289_v13  ;;  %vm1299_vm13 = vcmp.eq.f32.partialorder %v1289_v13, 0.0 }
 0x3a2   :  { %v2603_v7 = vpop.eup %2602 }
 0x3a3   :  { %v1291_v15 = vmul.f32 %v2603_v7, %v1289_v13 }
 0x3a5   :  { %v1292_v32 = vmul.f32 %v2603_v7, %v1291_v15  ;;  %v439_v15 = vadd.f32 %v3098_v18, %v3397_v31 }
 0x3a7   :  { %v1293_v40 = vmul.f32 0.5, %v1292_v32  ;;  %v379_v32 = vmul.f32 %v3084_v6, %v3376_v9 }
 0x3a9   :  { %v1294_v48 = vsub.f32 1.5, %v1293_v40  ;;  %v2667_v40 = vld [vmem:[%s4431_s26 + $0x28] sm:$0xff] }
 0x3ab   :  { %v1295_v27 = vmul.f32 %v2603_v7, %v1294_v48  ;;  %v3669_v48 = vadd.f32 %v2667_v40, %v439_v15 }
 0x3ad   :  { %v1296_v28 = vmul.f32 %v1295_v27, %v1289_v13  ;;  %v407_v27 = vadd.f32 %v379_v32, %v3390_v4 }
 0x3af   :  { %v1298_v41 = vsel %vm1297_vm12, %v1289_v13, %v1296_v28  ;;  %v2666_v13 = vld [vmem:[%s4431_s26 + $0x20] sm:$0xff]  ;;  %v441_v28 = vadd.f32 %v3098_v18, %v407_v27 }
 0x3b0   :  { %v1301_v39 = vsel %vm1299_vm13, %v1300_v0, %v1298_v41  ;;  %v3659_v7 = vadd.f32 %v2666_v13, %v437_v53  ;;  %v2668_v0 = vld [vmem:[%s4431_s26 + $0x30] sm:$0x1] }
 0x3b1   :  { %v1302_v2 = vmax.f32 %v1301_v39, 1e-12  ;;  %v3677_v31 = vadd.f32 %v2668_v0, %v441_v28 }
 0x3b3   :  { %2604 = vrcp.f32 %v1302_v2  ;;  %v1314_v24 = vand.u32 2147483648, %v1302_v2  ;;  %v1312_v20 = vand.u32 2147483647, %v1302_v2  ;;  %vm1308_vm15 = vweird.f32 %v1302_v2 }
 0x3b5   :  { %v1315_v63 = vor.u32 1.1754944e-38, %v1314_v24  ;;  %vm1313_vm2 = vcmp.eq.f32.partialorder %v1312_v20, 8.507059e+37  ;;  %v658_v20 = vlaneseq }
 0x3b9   :  { %v2605_v22 = vpop.eup %2604 }
 0x3ba   :  { %v1304_v21 = vmul.f32 %v2605_v22, %v1302_v2  ;;  %vm1309_vm14 = vweird.f32 %v2605_v22 }
 0x3bb   :  { %vm1310_vm1 = vmor %vm1308_vm15, %vm1309_vm14 }
 0x3bc   :  { %v1305_v23 = vsub.f32 1.0, %v1304_v21 }
 0x3be   :  { %v1306_v1 = vmul.f32 %v2605_v22, %v1305_v23 }
 0x3c0   :  { %v1307_v30 = vadd.f32 %v2605_v22, %v1306_v1 }
 0x3c2   :  { %v1311_v57 = vsel %vm1310_vm1, %v2605_v22, %v1307_v30  ;;  %v3701_v30 = vand.u32 127, %v658_v20 }
 0x3c3   :  { %v1316_v35 = vsel %vm1313_vm2, %v1315_v63, %v1311_v57 }
 0x3c4   :  { %v3583_v36 = vmul.f32 %v1316_v35, %v3426_v16 }
 0x3c5   :  { %v1001_v19 = vpop.f32.mrf.mxu1 }
 0x3c6   :  { %1041 = vmatmul.f32.gmra.mxu2 %v1001_v19  ;;  %v1322_v42 = vmul.f32 %v3585_v11, %v3583_v36 }
 0x3c8   :  { %v1323_v43 = vsel %vm4420_vm7, %v1322_v42, 0.0 }
 0x3c9   :  { %1324 = vadd.xlane.f32.xlu0 %v1323_v43 }
 0x3cd   :  { %v1004_v52 = vpop.f32.mrf.mxu1 }
 0x3ce   :  { %1044 = vmatmul.f32.gmra.mxu2 %v1004_v52 }
 0x3d5   :  { %v1007_v45 = vpop.f32.mrf.mxu1 }
 0x3d6   :  { %1047 = vmatmul.f32.gmra.mxu2 %v1007_v45 }
 0x3dd   :  { %v1010_v46 = vpop.f32.mrf.mxu1 }
 0x3de   :  { %1050 = vmatmul.f32.gmra.mxu2 %v1010_v46 }
 0x3e5   :  { %v1033_v51 = vpop.f32.mrf.mxu0 }
 0x3e6   :  { %v3603_v49 = vadd.f32 %v3595_v50, %v1033_v51  ;;  %1585 = vmatmul.f32.vlgmr.msra.gmra.mxu2 %v3600_v38 }
 0x3e8   :  { %1054 = vst [vmem:[%s4411_s14] sm:$0xff] %v3603_v49  ;;  %1061 = vmax.xlane.f32.xlu0 %v3603_v49 }
 0x3ee   :  { %1588 = vmatmul.f32.gmra.mxu2 %v3616_v17 }
 0x3f3   :  { %v1036_v62 = vpop.f32.mrf.mxu2 }
 0x3f4   :  { %v3625_v29 = vadd.f32 %v3595_v50, %v1036_v62 }
 0x3f6   :  { %1055 = vst [vmem:[%s4411_s14 + $0x8] sm:$0xff] %v3625_v29  ;;  %1063 = vmax.xlane.f32.xlu0 %v3625_v29  ;;  %1591 = vmatmul.f32.gmra.mxu2 %v3630_v8 }
 0x3fb   :  { %v1039_v54 = vpop.f32.mrf.mxu2 }
 0x3fc   :  { %v1040_v58 = vadd.f32 %v3595_v50, %v1039_v54 }
 0x3fe   :  { %1056 = vst [vmem:[%s4411_s14 + $0x10] sm:$0xff] %v1040_v58  ;;  %1065 = vmax.xlane.f32.xlu0 %v1040_v58  ;;  %1594 = vmatmul.f32.gmra.mxu2 %v3649_v61 }
 0x406   :  { %1597 = vmatmul.f32.gmra.mxu2 %v3659_v7 }
 0x40e   :  { %1600 = vmatmul.f32.gmra.mxu2 %v3669_v48 }
 0x416   :  { %1603 = vmatmul.f32.gmra.mxu2 %v3677_v31 }
 0x43c   :  { %v1325_v6 = vpop.xlane.xlu0 %1324 }
 0x43d   :  { %v1326_v9 = vmul.f32 %v1325_v6, %v3583_v36 }
 0x43f   :  { %1328 = vrot.lane.b32.xlu2 %v1326_v9, %s2769_s2 }
 0x449   :  { %v1042_v41 = vpop.f32.mrf.mxu2 }
 0x44a   :  { %v1043_v4 = vadd.f32 %v3595_v50, %v1042_v41 }
 0x44c   :  { %1057 = vst [vmem:[%s4411_s14 + $0x18] sm:$0xff] %v1043_v4 }
 0x451   :  { %v1045_v18 = vpop.f32.mrf.mxu2 }
 0x452   :  { %v1046_v39 = vadd.f32 %v3595_v50, %v1045_v18 }
 0x454   :  { %1058 = vst [vmem:[%s4411_s14 + $0x20] sm:$0xff] %v1046_v39 }
 0x459   :  { %v1048_v2 = vpop.f32.mrf.mxu2 }
 0x45a   :  { %v1049_v22 = vadd.f32 %v3595_v50, %v1048_v2 }
 0x45b   :  { %v1062_v21 = vpop.xlane.xlu0 %1061 }
 0x45c   :  { %1059 = vst [vmem:[%s4411_s14 + $0x28] sm:$0xff] %v1049_v22  ;;  %vm1077_vm8 = vcmp.eq.f32.partialorder %v3603_v49, %v1062_v21 }
 0x45d   :  { %v1084_v14 = vsel %vm1077_vm8, %v3701_v30, 128 }
 0x45e   :  { %v1092_v55 = vshra.s32 %v1084_v14, 16  ;;  %v1091_v9 = vand.u32 65535, %v1084_v14 }
 0x460   :  { %v1094_v60 = vcvt.s32.f32 %v1092_v55  ;;  %v1093_v21 = vcvt.s32.f32 %v1091_v9  ;;  %v641_v9 = vld [vmem:[%s4408_s11 + $0x10] sm:$0xff] }
 0x461   :  { %v1051_v23 = vpop.f32.mrf.mxu2 }
 0x462   :  { %v3695_v24 = vadd.f32 %v3595_v50, %v1051_v23 }
 0x464   :  { %1060 = vst [vmem:[%s4411_s14 + $0x30] sm:$0x3f] %v3695_v24  ;;  %v1074_v56 = vsel %vm1073_vm9, %v3695_v24, -inf }
 0x468   :  { %1067 = vmax.xlane.f32.xlu2 %v1043_v4 }
 0x469   :  { %v1064_v1 = vpop.xlane.xlu0 %1063 }
 0x46a   :  { %vm1078_vm10 = vcmp.eq.f32.partialorder %v3625_v29, %v1064_v1 }
 0x46b   :  { %v1085_v62 = vsel %vm1078_vm10, %v3701_v30, 128 }
 0x46c   :  { %v1106_v37 = vshra.s32 %v1085_v62, 16  ;;  %v1105_v20 = vand.u32 65535, %v1085_v62 }
 0x46e   :  { %v1108_v25 = vcvt.s32.f32 %v1106_v37 }
 0x471   :  { %v1066_v63 = vpop.xlane.xlu0 %1065 }
 0x472   :  { %vm1079_vm5 = vcmp.eq.f32.partialorder %v1040_v58, %v1066_v63 }
 0x473   :  { %v3704_v57 = vsel %vm1079_vm5, %v3701_v30, 128 }
 0x474   :  { %v1120_v35 = vshra.s32 %v3704_v57, 16  ;;  %v1119_v63 = vand.u32 65535, %v3704_v57 }
 0x476   :  { %v3707_v19 = vcvt.s32.f32 %v1120_v35 }
 0x478   :  { %1123 = vmin.xlane.f32.xlu2 %v3707_v19 }
 0x499   :  { %v1329_v42 = vpop.permute.xlu2 %1328 }
 0x49a   :  { %v3711_v43 = vsub.f32 %v3426_v16, %v1329_v42 }
 0x49c   :  { %v1332_v52 = vmul.f32 %v3711_v43, %v3711_v43 }
 0x49e   :  { %1334 = vrot.lane.b32.xlu1 %v1332_v52, %s2768_s25 }
 0x4c8   :  { %1069 = vmax.xlane.f32.xlu1 %v1046_v39 }
 0x4db   :  { %v1068_v45 = vpop.xlane.xlu2 %1067 }
 0x4dc   :  { %vm1080_vm6 = vcmp.eq.f32.partialorder %v1043_v4, %v1068_v45 }
 0x4dd   :  { %v3717_v46 = vsel %vm1080_vm6, %v3701_v30, 128 }
 0x4de   :  { %v1134_v47 = vshra.s32 %v3717_v46, 16  ;;  %v1133_v23 = vand.u32 65535, %v3717_v46 }
 0x4e0   :  { %v3720_v50 = vcvt.s32.f32 %v1134_v47  ;;  %v1135_v42 = vcvt.s32.f32 %v1133_v23 }
 0x4e2   :  { %1137 = vmin.xlane.f32.xlu1 %v3720_v50 }
 0x4eb   :  { %v3760_v35 = vpop.xlane.xlu2 %1123 }
 0x4ec   :  { %vm1125_vm5 = vcmp.eq.f32.partialorder %v3707_v19, %v3760_v35 }
 0x510   :  { %v1335_v26 = vpop.permute.xlu1 %1334 }
 0x511   :  { %v1337_v51 = vsel %vm4420_vm7, %v1335_v26, 0.0  ;;  %v1121_v26 = vcvt.s32.f32 %v1119_v63 }
 0x512   :  { %1338 = vadd.xlane.f32.xlu0 %v1337_v51  ;;  %v1107_v51 = vcvt.s32.f32 %v1105_v20 }
 0x513   :  { %v1126_v14 = vsel %vm1125_vm5, %v1121_v26, inf  ;;  %vm1197_vm5 = vcmask 195712  }
 0x51a   :  { %1071 = vmax.xlane.f32.xlu0 %v1049_v22 }
 0x522   :  { %1075 = vmax.xlane.f32.xlu0 %v1074_v56 }
 0x52a   :  { %1095 = vmin.xlane.f32.xlu0 %v1094_v60 }
 0x532   :  { %1109 = vmin.xlane.f32.xlu0 %v1108_v25 }
 0x53b   :  { %v1070_v10 = vpop.xlane.xlu1 %1069 }
 0x53c   :  { %vm1081_vm11 = vcmp.eq.f32.partialorder %v1046_v39, %v1070_v10 }
 0x53d   :  { %v3731_v49 = vsel %vm1081_vm11, %v3701_v30, 128 }
 0x53e   :  { %v1148_v34 = vshra.s32 %v3731_v49, 16  ;;  %v1147_v19 = vand.u32 65535, %v3731_v49  ;;  %v653_v49 = vld [vmem:[%s4408_s11 + $0x70] sm:$0xff] }
 0x540   :  { %v3734_v59 = vcvt.s32.f32 %v1148_v34 }
 0x542   :  { %1151 = vmin.xlane.f32.xlu0 %v3734_v59 }
 0x585   :  { %v1339_v33 = vpop.xlane.xlu0 %1338 }
 0x586   :  { %2606 = vrsqrt.f32 %v1339_v33  ;;  %vm1347_vm14 = vcmp.eq.f32.partialorder %v1339_v33, inf  ;;  %v1350_v0 = vand.u32 2147483648, %v1339_v33  ;;  %vm1349_vm15 = vcmp.eq.f32.partialorder %v1339_v33, 0.0 }
 0x58c   :  { %v2607_v29 = vpop.eup %2606 }
 0x58d   :  { %v1341_v12 = vmul.f32 %v2607_v29, %v1339_v33  ;;  %v1072_v54 = vpop.xlane.xlu0 %1071 }
 0x58e   :  { %vm1082_vm12 = vcmp.eq.f32.partialorder %v1049_v22, %v1072_v54  ;;  %v654_v54 = vld [vmem:[%s4408_s11 + $0x78] sm:$0xff] }
 0x58f   :  { %v1342_v3 = vmul.f32 %v2607_v29, %v1341_v12  ;;  %v3738_v58 = vsel %vm1082_vm12, %v3701_v30, 128  ;;  %1238 = vmatpush.msrb.mxu3 %v654_v54  ;;  %2092 = vmatpush.msrb.mxu2 %v654_v54 }
 0x590   :  { %v1162_v5 = vshra.s32 %v3738_v58, 16 }
 0x591   :  { %v1343_v53 = vmul.f32 0.5, %v1342_v3  ;;  %1239 = vmatpush.msrb.mxu3 %v653_v49  ;;  %2093 = vmatpush.msrb.mxu2 %v653_v49  ;;  %v650_v3 = vld [vmem:[%s4408_s11 + $0x58] sm:$0xff] }
 0x592   :  { %v3741_v13 = vcvt.s32.f32 %v1162_v5  ;;  %v649_v5 = vld [vmem:[%s4408_s11 + $0x50] sm:$0xff] }
 0x593   :  { %v1344_v15 = vsub.f32 1.5, %v1343_v53  ;;  %v648_v53 = vld [vmem:[%s4408_s11 + $0x48] sm:$0xff] }
 0x594   :  { %1165 = vmin.xlane.f32.xlu2 %v3741_v13 }
 0x595   :  { %v1345_v32 = vmul.f32 %v2607_v29, %v1344_v15  ;;  %v1076_v40 = vpop.xlane.xlu0 %1075  ;;  %v647_v15 = vld [vmem:[%s4408_s11 + $0x40] sm:$0xff] }
 0x596   :  { %vm1083_vm13 = vcmp.eq.f32.partialorder %v3695_v24, %v1076_v40  ;;  %v3756_v24 = vpop.xlane.xlu1 %1137  ;;  %v645_v40 = vld [vmem:[%s4408_s11 + $0x30] sm:$0xff] }
 0x597   :  { %v1346_v27 = vmul.f32 %v1345_v32, %v1339_v33  ;;  %v1090_v28 = vsel %vm1083_vm13, %v3701_v30, 128  ;;  %vm1139_vm2 = vcmp.eq.f32.partialorder %v3720_v50, %v3756_v24  ;;  %v646_v32 = vld [vmem:[%s4408_s11 + $0x38] sm:$0xff] }
 0x598   :  { %v3747_v6 = vsel %vm1073_vm9, %v1090_v28, 2147483647  ;;  %v1140_v45 = vsel %vm1139_vm2, %v1135_v42, inf  ;;  %v643_v28 = vld [vmem:[%s4408_s11 + $0x20] sm:$0xff]  ;;  %vm1193_vm2 = vcmask 130112  }
 0x599   :  { %v1348_v41 = vsel %vm1347_vm14, %v1339_v33, %v1346_v27  ;;  %v1177_v4 = vshra.s32 %v3747_v6, 16  ;;  %v644_v27 = vld [vmem:[%s4408_s11 + $0x28] sm:$0xff] }
 0x59a   :  { %v1351_v18 = vsel %vm1349_vm15, %v1350_v0, %v1348_v41  ;;  %v642_v0 = vld [vmem:[%s4408_s11 + $0x18] sm:$0xff]  ;;  %v640_v41 = vld [vmem:[%s4408_s11 + $0x8] sm:$0xff] }
 0x59b   :  { %v1352_v39 = vmax.f32 %v1351_v18, 1e-12  ;;  %v3750_v2 = vcvt.s32.f32 %v1177_v4  ;;  %v639_v4 = vld [vmem:[%s4408_s11] sm:$0xff]  ;;  %v1161_v18 = vand.u32 65535, %v3738_v58 }
 0x59d   :  { %2608 = vrcp.f32 %v1352_v39  ;;  %1180 = vmin.xlane.f32.xlu0 %v3750_v2  ;;  %v3753_v22 = vpop.xlane.xlu0 %1095  ;;  %vm1358_vm10 = vweird.f32 %v1352_v39  ;;  %v1362_v62 = vand.u32 2147483647, %v1352_v39 }
 0x59e   :  { %vm1097_vm1 = vcmp.eq.f32.partialorder %v1094_v60, %v3753_v22  ;;  %v1364_v60 = vand.u32 2147483648, %v1352_v39  ;;  %v1102_v20 = vcvt.f32.s32 %v3753_v22  ;;  %v2773_v22 = vmov 1.0  }
 0x59f   :  { %v1098_v1 = vsel %vm1097_vm1, %v1093_v21, inf  ;;  %vm1363_vm12 = vcmp.eq.f32.partialorder %v1362_v62, 8.507059e+37  ;;  %v1163_v21 = vcvt.s32.f32 %v1161_v18  ;;  %v3848_v62 = vadd.s32 4294967280, %v3701_v30 }
 0x5a0   :  { %1099 = vmin.xlane.f32.xlu1 %v1098_v1  ;;  %v1365_v10 = vor.u32 1.1754944e-38, %v1364_v60  ;;  %v1176_v1 = vand.u32 65535, %v3747_v6 }
 0x5a2   :  { %v1178_v42 = vcvt.s32.f32 %v1176_v1 }
 0x5a3   :  { %v2609_v52 = vpop.eup %2608 }
 0x5a4   :  { %v1354_v46 = vmul.f32 %v2609_v52, %v1352_v39  ;;  %vm1359_vm8 = vweird.f32 %v2609_v52 }
 0x5a5   :  { %1141 = vmin.xlane.f32.xlu0 %v1140_v45  ;;  %v3766_v47 = vpop.xlane.xlu0 %1109  ;;  %vm1360_vm11 = vmor %vm1358_vm10, %vm1359_vm8  ;;  %v1103_v45 = vshll.u32 %v1102_v20, 16  ;;  %vm1201_vm8 = vcmask 261312  }
 0x5a6   :  { %vm1111_vm6 = vcmp.eq.f32.partialorder %v1108_v25, %v3766_v47  ;;  %v1355_v57 = vsub.f32 1.0, %v1354_v46  ;;  %v1149_v25 = vcvt.s32.f32 %v1147_v19  ;;  %v1116_v6 = vcvt.f32.s32 %v3766_v47 }
 0x5a7   :  { %v1112_v56 = vsel %vm1111_vm6, %v1107_v51, inf  ;;  %v1144_v51 = vcvt.f32.s32 %v3756_v24  ;;  %v3851_v24 = vadd.s32 4294967288, %v3701_v30  ;;  %v3854_v19 = vadd.s32 4294967272, %v3701_v30 }
 0x5a8   :  { %1127 = vmin.xlane.f32.xlu1 %v1126_v14  ;;  %1113 = vmin.xlane.f32.xlu2 %v1112_v56  ;;  %v1356_v50 = vmul.f32 %v2609_v52, %v1355_v57 }
 0x5a9   :  { %v1145_v56 = vshll.u32 %v1144_v51, 16 }
 0x5aa   :  { %v1357_v55 = vadd.f32 %v2609_v52, %v1356_v50  ;;  %v1117_v50 = vshll.u32 %v1116_v6, 16 }
 0x5ac   :  { %v1361_v37 = vsel %vm1360_vm11, %v2609_v52, %v1357_v55  ;;  %vm1205_vm11 = vcmask 326912  }
 0x5ad   :  { %v1366_v34 = vsel %vm1363_vm12, %v1365_v10, %v1361_v37 }
 0x5ae   :  { %v3775_v12 = vmul.f32 %v1366_v34, %v3711_v43  ;;  %v651_v43 = vld [vmem:[%s4408_s11 + $0x60] sm:$0xff] }
 0x5b5   :  { %v3770_v33 = vpop.xlane.xlu0 %1151 }
 0x5b6   :  { %vm1153_vm13 = vcmp.eq.f32.partialorder %v3734_v59, %v3770_v33  ;;  %v652_v59 = vld [vmem:[%s4408_s11 + $0x68] sm:$0xff]  ;;  %s2774_s11 = smov 123  }
 0x5b7   :  { %v1154_v29 = vsel %vm1153_vm13, %v1149_v25, inf  ;;  %1240 = vmatpush.msrb.mxu3 %v652_v59  ;;  %2094 = vmatpush.msrb.mxu2 %v652_v59 }
 0x5b8   :  { %1155 = vmin.xlane.f32.xlu2 %v1154_v29 }
 0x5b9   :  { %1369 = vrot.lane.b32.xlu0 %v3775_v12, %s2770_s29  ;;  %1241 = vmatpush.msrb.mxu3 %v651_v43 }
 0x5ba   :  { %2095 = vmatpush.msrb.mxu2 %v651_v43 }
 0x5bb   :  { %1242 = vmatpush.msrb.mxu3 %v650_v3 }
 0x5bc   :  { %2096 = vmatpush.msrb.mxu2 %v650_v3 }
 0x5bd   :  { %1243 = vmatpush.msrb.mxu3 %v649_v5 }
 0x5be   :  { %2097 = vmatpush.msrb.mxu2 %v649_v5  ;;  %v1158_v5 = vcvt.f32.s32 %v3770_v33 }
 0x5bf   :  { %1244 = vmatpush.msrb.mxu3 %v648_v53 }
 0x5c0   :  { %2098 = vmatpush.msrb.mxu2 %v648_v53 }
 0x5c1   :  { %1245 = vmatpush.msrb.mxu3 %v647_v15 }
 0x5c2   :  { %2099 = vmatpush.msrb.mxu2 %v647_v15  ;;  %v1159_v15 = vshll.u32 %v1158_v5, 16 }
 0x5c3   :  { %1246 = vmatpush.msrb.mxu3 %v646_v32 }
 0x5c4   :  { %2100 = vmatpush.msrb.mxu2 %v646_v32  ;;  %v3871_v32 = vadd.s32 4294967264, %v3701_v30 }
 0x5c5   :  { %1247 = vmatpush.msrb.mxu3 %v645_v40 }
 0x5c6   :  { %2101 = vmatpush.msrb.mxu2 %v645_v40 }
 0x5c7   :  { %1248 = vmatpush.msrb.mxu3 %v644_v27 }
 0x5c8   :  { %2102 = vmatpush.msrb.mxu2 %v644_v27 }
 0x5c9   :  { %1249 = vmatpush.msrb.mxu3 %v643_v28 }
 0x5ca   :  { %2103 = vmatpush.msrb.mxu2 %v643_v28 }
 0x5cb   :  { %1250 = vmatpush.msrb.mxu3 %v642_v0 }
 0x5cc   :  { %2104 = vmatpush.msrb.mxu2 %v642_v0 }
 0x5cd   :  { %1251 = vmatpush.msrb.mxu3 %v641_v9 }
 0x5ce   :  { %2105 = vmatpush.msrb.mxu2 %v641_v9 }
 0x5cf   :  { %1252 = vmatpush.msrb.mxu3 %v640_v41 }
 0x5d0   :  { %1373 = vrot.lane.b32.xlu2 %v3775_v12, %s2771_s3  ;;  %2106 = vmatpush.msrb.mxu2 %v640_v41 }
 0x5d1   :  { %1253 = vmatpush.msrb.mxu3 %v639_v4 }
 0x5d2   :  { %2107 = vmatpush.msrb.mxu2 %v639_v4 }
 0x5d8   :  { %1382 = vrot.lane.b32.xlu2 %v3775_v12, %s2772_s4 }
 0x607   :  { %v3832_v39 = vpop.xlane.xlu2 %1165 }
 0x608   :  { %vm1167_vm14 = vcmp.eq.f32.partialorder %v3741_v13, %v3832_v39  ;;  %v1130_v13 = vcvt.f32.s32 %v3760_v35  ;;  %v1172_v41 = vcvt.f32.s32 %v3832_v39 }
 0x609   :  { %v1168_v23 = vsel %vm1167_vm14, %v1163_v21, inf  ;;  %vm1209_vm14 = vcmask 392512  }
 0x60a   :  { %1169 = vmin.xlane.f32.xlu1 %v1168_v23  ;;  %v1173_v18 = vshll.u32 %v1172_v41, 16  ;;  %v3883_v23 = vadd.s32 4294967256, %v3701_v30 }
 0x610   :  { %v3838_v63 = vpop.xlane.xlu0 %1180 }
 0x611   :  { %vm1182_vm15 = vcmp.eq.f32.partialorder %v3750_v2, %v3838_v63  ;;  %v1131_v2 = vshll.u32 %v1130_v13, 16 }
 0x612   :  { %v1183_v52 = vsel %vm1182_vm15, %v1178_v42, inf }
 0x613   :  { %v1100_v58 = vpop.xlane.xlu1 %1099  ;;  %1184 = vmin.xlane.f32.xlu0 %v1183_v52  ;;  %v1187_v52 = vcvt.f32.s32 %v3838_v63 }
 0x614   :  { %v1101_v46 = vcvt.f32.s32 %v1100_v58 }
 0x616   :  { %v1104_v26 = vadd.s32 %v1103_v45, %v1101_v46  ;;  %v1188_v45 = vshll.u32 %v1187_v52, 16  ;;  %v3891_v46 = vadd.s32 4294967248, %v3701_v30 }
 0x618   :  { %v1142_v57 = vpop.xlane.xlu0 %1141  ;;  %vm1217_vm1 = vcmp.eq.s32.totalorder %v3701_v30, %v1104_v26  ;;  %v1190_v25 = vperm.slane %v1104_v26, %v3701_v30 }
 0x619   :  { %2441 = vmatmul.msk.f32.vlgmr.msrb.gmra.mxu3 %vm1217_vm1, %v2773_v22  ;;  %v1143_v14 = vcvt.f32.s32 %v1142_v57  ;;  %vm1213_vm1 = vcmask 458112  }
 0x61b   :  { %v1128_v55 = vpop.xlane.xlu1 %1127  ;;  %v1114_v60 = vpop.xlane.xlu2 %1113  ;;  %v1146_v37 = vadd.s32 %v1145_v56, %v1143_v14 }
 0x61c   :  { %v1129_v35 = vcvt.f32.s32 %v1128_v55  ;;  %v1115_v47 = vcvt.f32.s32 %v1114_v60 }
 0x61d   :  { %v1200_v49 = vperm.slane %v1146_v37, %v3854_v19  ;;  %vm1220_vm12 = vcmp.eq.s32.totalorder %v3701_v30, %v1146_v37 }
 0x61e   :  { %v1132_v10 = vadd.s32 %v1131_v2, %v1129_v35  ;;  %v1118_v34 = vadd.s32 %v1117_v50, %v1115_v47  ;;  %v1410_v35 = vrot.slane %v3775_v12, 7 }
 0x620   :  { %v1196_v29 = vperm.slane %v1132_v10, %v3848_v62  ;;  %v1192_v54 = vperm.slane %v1118_v34, %v3851_v24  ;;  %vm1218_vm6 = vcmp.eq.s32.totalorder %v3701_v30, %v1118_v34  ;;  %vm1219_vm10 = vcmp.eq.s32.totalorder %v3701_v30, %v1132_v10 }
 0x621   :  { %2442 = vmatmul.msk.f32.gmra.mxu3 %vm1218_vm6, %v2773_v22 }
 0x622   :  { %v1194_v59 = vsel %vm1193_vm2, %v1192_v54, %v1190_v25 }
 0x623   :  { %v1198_v43 = vsel %vm1197_vm5, %v1196_v29, %v1194_v59  ;;  %1386 = vrot.lane.b32.xlu1 %v3775_v12, %s2774_s11 }
 0x624   :  { %v1202_v3 = vsel %vm1201_vm8, %v1200_v49, %v1198_v43  ;;  %v1586_v49 = vpop.f32.mrf.mxu2 }
 0x629   :  { %2443 = vmatmul.msk.f32.gmra.mxu3 %vm1219_vm10, %v2773_v22  ;;  %vm4418_vm10 = vcmask 434176  }
 0x62b   :  { %v1156_v53 = vpop.xlane.xlu2 %1155  ;;  %v1370_v21 = vpop.permute.xlu0 %1369 }
 0x62c   :  { %v1157_v40 = vcvt.f32.s32 %v1156_v53  ;;  %v1372_v56 = vmul.f32 %v1370_v21, %v3583_v36  ;;  %v1589_v59 = vpop.f32.mrf.mxu2 }
 0x62e   :  { %v1160_v27 = vadd.s32 %v1159_v15, %v1157_v40 }
 0x630   :  { %v1204_v28 = vperm.slane %v1160_v27, %v3871_v32  ;;  %vm1221_vm13 = vcmp.eq.s32.totalorder %v3701_v30, %v1160_v27 }
 0x631   :  { %2444 = vmatmul.msk.f32.gmra.mxu3 %vm1220_vm12, %v2773_v22  ;;  %vm4426_vm12 = vcmask 23552  }
 0x632   :  { %v1206_v33 = vsel %vm1205_vm11, %v1204_v28, %v1202_v3 }
 0x633   :  { %v1374_v0 = vpop.permute.xlu2 %1373 }
 0x634   :  { %v1376_v9 = vmul.f32 %v1374_v0, %v3583_v36  ;;  %v1592_v43 = vpop.f32.mrf.mxu2 }
 0x636   :  { %1378 = vrot.lane.b32.xlu0 %v1376_v9, %s2772_s4 }
 0x639   :  { %2445 = vmatmul.msk.f32.gmra.mxu3 %vm1221_vm13, %v2773_v22  ;;  %vm4425_vm13 = vcmask 21504  }
 0x63b   :  { %v1383_v10 = vpop.permute.xlu2 %1382 }
 0x63c   :  { %v1385_v12 = vmul.f32 %v1383_v10, %v3583_v36  ;;  %v1595_v3 = vpop.f32.mrf.mxu2  ;;  %v2683_v10 = vld [vmem:[%s4405_s8 + $0x10] sm:$0xff] }
 0x644   :  { %v1598_v5 = vpop.f32.mrf.mxu2 }
 0x64c   :  { %v1601_v15 = vpop.f32.mrf.mxu2 }
 0x67d   :  { %v1170_v4 = vpop.xlane.xlu1 %1169 }
 0x67e   :  { %v1171_v1 = vcvt.f32.s32 %v1170_v4 }
 0x680   :  { %v1174_v20 = vadd.s32 %v1173_v18, %v1171_v1  ;;  %v1604_v18 = vpop.f32.mrf.mxu2 }
 0x682   :  { %v1208_v42 = vperm.slane %v1174_v20, %v3883_v23  ;;  %vm1222_vm15 = vcmp.eq.s32.totalorder %v3701_v30, %v1174_v20 }
 0x683   :  { %2446 = vmatmul.msk.f32.gmra.mxu3 %vm1222_vm15, %v2773_v22  ;;  %vm4424_vm15 = vcmask 7168  }
 0x684   :  { %v1210_v58 = vsel %vm1209_vm14, %v1208_v42, %v1206_v33 }
 0x686   :  { %v1185_v39 = vpop.xlane.xlu0 %1184 }
 0x687   :  { %v1186_v26 = vcvt.f32.s32 %v1185_v39  ;;  %v655_v39 = vld [vmem:[%s4409_s12] sm:$0xff] }
 0x689   :  { %v1189_v13 = vadd.s32 %v1188_v45, %v1186_v26  ;;  %v2669_v45 = vld [vmem:[%s4405_s8 + $0xf0] sm:$0xff]  ;;  %v2670_v26 = vld [vmem:[%s4405_s8 + $0xe0] sm:$0xff] }
 0x68b   :  { %v1212_v51 = vperm.slane %v1189_v13, %v3891_v46  ;;  %vm1223_vm6 = vcmp.eq.s32.totalorder %v3701_v30, %v1189_v13  ;;  %v2671_v13 = vld [vmem:[%s4405_s8 + $0xd0] sm:$0xff] }
 0x68c   :  { %2447 = vmatmul.msk.f32.gmra.mxu3 %vm1223_vm6, %v2773_v22  ;;  %vm4423_vm6 = vcmask 15360  }
 0x68d   :  { %v1214_v63 = vsel %vm1213_vm1, %v1212_v51, %v1210_v58  ;;  %v2672_v51 = vld [vmem:[%s4405_s8 + $0xc0] sm:$0xff] }
 0x68e   :  { %1216 = vst.msk [vmem:[#allocation2] sm:$0x1] %vm4418_vm10, %v1214_v63  ;;  %vm4419_vm10 = vcmask 1041408   ;;  %v656_v63 = vld [vmem:[%s4409_s12 + $0x8] sm:$0xff] }
 0x695   :  { %v1387_v6 = vpop.permute.xlu1 %1386 }
 0x696   :  { %v1389_v57 = vmul.f32 %v1387_v6, %v3583_v36  ;;  %v2673_v6 = vld [vmem:[%s4405_s8 + $0xb0] sm:$0xff] }
 0x698   :  { %1391 = vrot.lane.b32.xlu1 %v1389_v57, %s2775_s30  ;;  %v2674_v57 = vld [vmem:[%s4405_s8 + $0xa0] sm:$0xff] }
 0x69c   :  { %v1255_v14 = vpop.f32.mrf.mxu3 }
 0x69d   :  { %1277 = vst.msk [vmem:[%s4413_s16] sm:$0xff] %vm4426_vm12, %v1255_v14 }
 0x6a4   :  { %v1258_v2 = vpop.f32.mrf.mxu3 }
 0x6a5   :  { %1278 = vst.msk [vmem:[%s4413_s16 + $0x8] sm:$0xff] %vm4426_vm12, %v1258_v2 }
 0x6a8   :  { %v1379_v50 = vpop.permute.xlu0 %1378 }
 0x6a9   :  { %v1381_v55 = vsub.f32 %v1372_v56, %v1379_v50  ;;  %v657_v56 = vld [vmem:[%s4409_s12 + $0x10] sm:$0x1] }
 0x6aa   :  { %v2677_v50 = vld [vmem:[%s4405_s8 + $0x70] sm:$0xff] }
 0x6ab   :  { %1403 = vrot.lane.b32.xlu1 %v1381_v55, %s2775_s30  ;;  %1396 = vrot.lane.b32.xlu2 %v1381_v55, %s2772_s4  ;;  %v2678_v55 = vld [vmem:[%s4405_s8 + $0x60] sm:$0xff] }
 0x6ac   :  { %v1261_v60 = vpop.f32.mrf.mxu3 }
 0x6ad   :  { %1279 = vst.msk [vmem:[%s4413_s16 + $0x10] sm:$0xff] %vm4426_vm12, %v1261_v60 }
 0x6b3   :  { %1411 = vrot.lane.b32.xlu2 %v1410_v35, %s2768_s25  ;;  %v2680_v35 = vld [vmem:[%s4405_s8 + $0x40] sm:$0xff] }
 0x6b4   :  { %v1264_v47 = vpop.f32.mrf.mxu3 }
 0x6b5   :  { %1280 = vst.msk [vmem:[%s4413_s16 + $0x18] sm:$0xff] %vm4426_vm12, %v1264_v47 }
 0x6bc   :  { %v1267_v37 = vpop.f32.mrf.mxu3 }
 0x6bd   :  { %1281 = vst.msk [vmem:[%s4413_s16 + $0x20] sm:$0xff] %vm4426_vm12, %v1267_v37 }
 0x705   :  { %v1397_v53 = vpop.permute.xlu2 %1396 }
 0x706   :  { %v1270_v34 = vpop.f32.mrf.mxu3 }
 0x707   :  { %1282 = vst.msk [vmem:[%s4413_s16 + $0x28] sm:$0xff] %vm4426_vm12, %v1270_v34 }
 0x70a   :  { %v1392_v25 = vpop.permute.xlu1 %1391 }
 0x70b   :  { %v1394_v29 = vsub.f32 %v1385_v12, %v1392_v25  ;;  %v2685_v12 = vld [vmem:[%s4406_s9 + $0x78] sm:$0xff]  ;;  %v2686_v25 = vld [vmem:[%s4406_s9 + $0x70] sm:$0xff] }
 0x70d   :  { %1400 = vrot.lane.b32.xlu0 %v1394_v29, %s2772_s4  ;;  %v1412_v27 = vpop.permute.xlu2 %1411  ;;  %v2687_v29 = vld [vmem:[%s4406_s9 + $0x68] sm:$0xff] }
 0x70e   :  { %v1417_v41 = vsel %vm4422_vm0, %v3583_v36, %v1412_v27  ;;  %v2700_v27 = vld [vmem:[%s4406_s9] sm:$0xff] }
 0x70f   :  { %v1273_v54 = vpop.f32.mrf.mxu3 }
 0x710   :  { %1284 = vst.msk [vmem:[%s4413_s16 + $0x30] sm:$0x3f] %vm4425_vm13, %v1273_v54 }
 0x71d   :  { %v1404_v28 = vpop.permute.xlu1 %1403 }
 0x77f   :  { %v1401_v40 = vpop.permute.xlu0 %1400 }
 0x780   :  { %v1407_v33 = vsel %vm4424_vm15, %v1397_v53, %v1401_v40  ;;  %v2696_v53 = vld [vmem:[%s4406_s9 + $0x20] sm:$0xff]  ;;  %v2699_v40 = vld [vmem:[%s4406_s9 + $0x8] sm:$0xff] }
 0x781   :  { %v1409_v0 = vsel %vm4423_vm6, %v1407_v33, %v1404_v28 }
 0x782   :  { %v1415_v9 = vrot.slane %v1409_v0, 6 }
 0x784   :  { %v1419_v4 = vsel %vm4419_vm10, %v1417_v41, %v1415_v9  ;;  %vm4421_vm10 = vcmask 441344  }
 0x785   :  { %2448 = vmatpush.xpose.msk.msrb.mxu0 %vm4426_vm12, %v1419_v4 }
 0x788   :  { %2449 = vmatmul.msk.f32.vlgmr.msrb.gmra.mxu0 %vm4426_vm12, %v1255_v14  ;;  %v2675_v14 = vld [vmem:[%s4405_s8 + $0x90] sm:$0xff] }
 0x789   :  { %2460 = vmatpush.msk.msra.mxu0 %vm4422_vm0, %v1604_v18 }
 0x78b   :  { %1854 = vmatpush.msra.mxu0 %v1601_v15  ;;  %v2698_v15 = vld [vmem:[%s4406_s9 + $0x10] sm:$0xff] }
 0x78d   :  { %1855 = vmatpush.msra.mxu0 %v1598_v5  ;;  %v2695_v5 = vld [vmem:[%s4406_s9 + $0x28] sm:$0xff] }
 0x78f   :  { %1856 = vmatpush.msra.mxu0 %v1595_v3  ;;  %v2694_v3 = vld [vmem:[%s4406_s9 + $0x30] sm:$0xff] }
 0x790   :  { %2450 = vmatmul.msk.f32.gmra.mxu0 %vm4426_vm12, %v1258_v2  ;;  %v2676_v2 = vld [vmem:[%s4405_s8 + $0x80] sm:$0xff] }
 0x791   :  { %1857 = vmatpush.msra.mxu0 %v1592_v43  ;;  %v2692_v43 = vld [vmem:[%s4406_s9 + $0x40] sm:$0xff] }
 0x793   :  { %1858 = vmatpush.msra.mxu0 %v1589_v59  ;;  %v2691_v59 = vld [vmem:[%s4406_s9 + $0x48] sm:$0xff] }
 0x795   :  { %1859 = vmatpush.msra.mxu0 %v1586_v49  ;;  %v2690_v49 = vld [vmem:[%s4406_s9 + $0x50] sm:$0xff] }
 0x798   :  { %2451 = vmatmul.msk.f32.gmra.mxu0 %vm4426_vm12, %v1261_v60  ;;  %v2679_v60 = vld [vmem:[%s4405_s8 + $0x50] sm:$0xff] }
 0x7a0   :  { %2452 = vmatmul.msk.f32.gmra.mxu0 %vm4426_vm12, %v1264_v47  ;;  %v2681_v47 = vld [vmem:[%s4405_s8 + $0x30] sm:$0xff] }
 0x7a8   :  { %2453 = vmatmul.msk.f32.gmra.mxu0 %vm4426_vm12, %v1267_v37  ;;  %v2682_v37 = vld [vmem:[%s4405_s8 + $0x20] sm:$0xff] }
 0x7b0   :  { %2454 = vmatmul.msk.f32.gmra.mxu0 %vm4426_vm12, %v1270_v34  ;;  %v2684_v34 = vld [vmem:[%s4405_s8] sm:$0xff] }
 0x7b8   :  { %2455 = vmatmul.msk.f32.gmra.mxu0 %vm4426_vm12, %v1273_v54  ;;  %v2688_v54 = vld [vmem:[%s4406_s9 + $0x60] sm:$0xff] }
 0x805   :  { %v1461_v36 = vpop.f32.mrf.mxu0 }
 0x806   :  { %1482 = vst.msk [vmem:[%s4414_s17] sm:$0xff] %vm4426_vm12, %v1461_v36 }
 0x80d   :  { %v1464_v21 = vpop.f32.mrf.mxu0 }
 0x80e   :  { %1483 = vst.msk [vmem:[%s4414_s17 + $0x8] sm:$0xff] %vm4426_vm12, %v1464_v21 }
 0x815   :  { %v1467_v1 = vpop.f32.mrf.mxu0 }
 0x816   :  { %1484 = vst.msk [vmem:[%s4414_s17 + $0x10] sm:$0xff] %vm4426_vm12, %v1467_v1 }
 0x81d   :  { %v1470_v20 = vpop.f32.mrf.mxu0 }
 0x81e   :  { %1485 = vst.msk [vmem:[%s4414_s17 + $0x18] sm:$0xff] %vm4426_vm12, %v1470_v20 }
 0x825   :  { %v1473_v42 = vpop.f32.mrf.mxu0 }
 0x826   :  { %1486 = vst.msk [vmem:[%s4414_s17 + $0x20] sm:$0xff] %vm4426_vm12, %v1473_v42 }
 0x82d   :  { %v1476_v52 = vpop.f32.mrf.mxu0 }
 0x82e   :  { %1487 = vst.msk [vmem:[%s4414_s17 + $0x28] sm:$0xff] %vm4426_vm12, %v1476_v52 }
 0x835   :  { %v1479_v58 = vpop.f32.mrf.mxu0 }
 0x836   :  { %1488 = vst.msk [vmem:[%s4414_s17 + $0x30] sm:$0x3f] %vm4425_vm13, %v1479_v58  ;;  %2456 = vmatpush.msk.msra.mxu1 %vm1073_vm9, %v1479_v58 }
 0x838   :  { %1512 = vmatpush.msra.mxu1 %v1476_v52  ;;  %v2707_v52 = vld [vmem:[%s4404_s7 + $0x30] sm:$0x3f] }
 0x83a   :  { %1513 = vmatpush.msra.mxu1 %v1473_v42  ;;  %v2706_v42 = vld [vmem:[%s4404_s7 + $0x28] sm:$0xff] }
 0x83c   :  { %1514 = vmatpush.msra.mxu1 %v1470_v20  ;;  %v2705_v20 = vld [vmem:[%s4404_s7 + $0x20] sm:$0xff] }
 0x83e   :  { %1515 = vmatpush.msra.mxu1 %v1467_v1  ;;  %v2704_v1 = vld [vmem:[%s4404_s7 + $0x18] sm:$0xff] }
 0x840   :  { %1516 = vmatpush.msra.mxu1 %v1464_v21  ;;  %v2703_v21 = vld [vmem:[%s4404_s7 + $0x10] sm:$0xff] }
 0x842   :  { %1517 = vmatpush.msra.mxu1 %v1461_v36 }
 0x843   :  { %2457 = vmatmul.msk.f32.vlgmr.msra.gmra.mxu1 %vm4421_vm10, %v655_v39 }
 0x844   :  { %1531 = vmatpush.msrb.mxu1 %v2669_v45 }
 0x846   :  { %1532 = vmatpush.msrb.mxu1 %v2670_v26 }
 0x848   :  { %1533 = vmatpush.msrb.mxu1 %v2671_v13 }
 0x84a   :  { %1534 = vmatpush.msrb.mxu1 %v2672_v51 }
 0x84b   :  { %2458 = vmatmul.msk.f32.gmra.mxu1 %vm4421_vm10, %v656_v63 }
 0x84c   :  { %1535 = vmatpush.msrb.mxu1 %v2673_v6 }
 0x84e   :  { %1536 = vmatpush.msrb.mxu1 %v2674_v57 }
 0x850   :  { %1537 = vmatpush.msrb.mxu1 %v2675_v14 }
 0x852   :  { %1538 = vmatpush.msrb.mxu1 %v2676_v2 }
 0x853   :  { %2459 = vmatmul.msk.f32.gmra.mxu1 %vm4421_vm10, %v657_v56 }
 0x854   :  { %1539 = vmatpush.msrb.mxu1 %v2677_v50 }
 0x856   :  { %1540 = vmatpush.msrb.mxu1 %v2678_v55 }
 0x858   :  { %1541 = vmatpush.msrb.mxu1 %v2679_v60 }
 0x85a   :  { %1542 = vmatpush.msrb.mxu1 %v2680_v35 }
 0x85c   :  { %1543 = vmatpush.msrb.mxu1 %v2681_v47 }
 0x85e   :  { %1544 = vmatpush.msrb.mxu1 %v2682_v37 }
 0x860   :  { %1545 = vmatpush.msrb.mxu1 %v2683_v10 }
 0x862   :  { %1546 = vmatpush.msrb.mxu1 %v2684_v34 }
 0x863   :  { %1547 = vmatmul.f32.vlgmr.msrb.gmra.mxu1 %v3600_v38  ;;  %v2689_v38 = vld [vmem:[%s4406_s9 + $0x58] sm:$0xff] }
 0x864   :  { %1882 = vmatpush.msra.mxu1 %v2685_v12 }
 0x866   :  { %1883 = vmatpush.msra.mxu1 %v2686_v25 }
 0x868   :  { %1884 = vmatpush.msra.mxu1 %v2687_v29 }
 0x86a   :  { %1885 = vmatpush.msra.mxu1 %v2688_v54 }
 0x86b   :  { %1550 = vmatmul.f32.gmra.mxu1 %v3616_v17  ;;  %v2693_v17 = vld [vmem:[%s4406_s9 + $0x38] sm:$0xff] }
 0x86c   :  { %1886 = vmatpush.msra.mxu1 %v2689_v38 }
 0x86e   :  { %1887 = vmatpush.msra.mxu1 %v2690_v49 }
 0x870   :  { %1888 = vmatpush.msra.mxu1 %v2691_v59 }
 0x872   :  { %1889 = vmatpush.msra.mxu1 %v2692_v43 }
 0x873   :  { %1553 = vmatmul.f32.gmra.mxu1 %v3630_v8  ;;  %v2697_v8 = vld [vmem:[%s4406_s9 + $0x18] sm:$0xff]  ;;  %s2778_s9 = smov 1  }
 0x874   :  { %1890 = vmatpush.msra.mxu1 %v2693_v17 }
 0x876   :  { %1891 = vmatpush.msra.mxu1 %v2694_v3 }
 0x878   :  { %1892 = vmatpush.msra.mxu1 %v2695_v5 }
 0x87a   :  { %1893 = vmatpush.msra.mxu1 %v2696_v53 }
 0x87b   :  { %1556 = vmatmul.f32.gmra.mxu1 %v3649_v61 }
 0x87c   :  { %1894 = vmatpush.msra.mxu1 %v2697_v8 }
 0x87e   :  { %1895 = vmatpush.msra.mxu1 %v2698_v15 }
 0x880   :  { %1896 = vmatpush.msra.mxu1 %v2699_v40 }
 0x882   :  { %1897 = vmatpush.msra.mxu1 %v2700_v27 }
 0x883   :  { %1559 = vmatmul.f32.gmra.mxu1 %v3659_v7 }
 0x88b   :  { %1562 = vmatmul.f32.gmra.mxu1 %v3669_v48  ;;  %v2701_v48 = vld [vmem:[%s4404_s7] sm:$0xff] }
 0x893   :  { %1565 = vmatmul.f32.gmra.mxu1 %v3677_v31  ;;  %v2702_v31 = vld [vmem:[%s4404_s7 + $0x8] sm:$0xff] }
 0x8c0   :  { %v1519_v61 = vpop.f32.mrf.mxu1 }
 0x8c1   :  { %1528 = vst.msk [vmem:[#allocation4] sm:$0xff] %vm4426_vm12, %v1519_v61 }
 0x8c8   :  { %v1522_v28 = vpop.f32.mrf.mxu1 }
 0x8c9   :  { %1529 = vst.msk [vmem:[#allocation4 + $0x8] sm:$0xff] %vm4426_vm12, %v1522_v28 }
 0x8d0   :  { %v1525_v33 = vpop.f32.mrf.mxu1 }
 0x8d1   :  { %1530 = vst.msk [vmem:[#allocation4 + $0x10] sm:$0x1] %vm4420_vm7, %v1525_v33  ;;  %vm2138_vm7 = vcmask 17409  }
 0x8e0   :  { %v1548_v0 = vpop.f32.mrf.mxu1 }
 0x8e8   :  { %v1551_v9 = vpop.f32.mrf.mxu1 }
 0x8f0   :  { %v1554_v41 = vpop.f32.mrf.mxu1 }
 0x8f8   :  { %v1557_v4 = vpop.f32.mrf.mxu1 }
 0x900   :  { %v1560_v18 = vpop.f32.mrf.mxu1 }
 0x908   :  { %v1563_v36 = vpop.f32.mrf.mxu1 }
 0x910   :  { %v1566_v7 = vpop.f32.mrf.mxu1 }
 0x911   :  { %1616 = vmatpush.xpose.msra.mxu3 %v1566_v7 }
 0x915   :  { %1617 = vmatpush.xpose.msra.mxu3 %v1563_v36 }
 0x919   :  { %1618 = vmatpush.xpose.msra.mxu3 %v1560_v18 }
 0x91d   :  { %1619 = vmatpush.xpose.msra.mxu3 %v1557_v4 }
 0x921   :  { %1620 = vmatpush.xpose.msra.mxu3 %v1554_v41 }
 0x925   :  { %1621 = vmatpush.xpose.msra.mxu3 %v1551_v9 }
 0x929   :  { %1622 = vmatpush.xpose.msra.mxu3 %v1548_v0 }
 0x92c   :  { %1623 = vmatmul.f32.vlgmr.msra.gmra.mxu3 %v2701_v48 }
 0x934   :  { %1626 = vmatmul.f32.gmra.mxu3 %v2702_v31 }
 0x93c   :  { %1629 = vmatmul.f32.gmra.mxu3 %v2703_v21 }
 0x944   :  { %1632 = vmatmul.f32.gmra.mxu3 %v2704_v1 }
 0x94c   :  { %1635 = vmatmul.f32.gmra.mxu3 %v2705_v20 }
 0x954   :  { %1638 = vmatmul.f32.gmra.mxu3 %v2706_v42 }
 0x95c   :  { %1641 = vmatmul.f32.gmra.mxu3 %v2707_v52 }
 0x9af   :  { %v1624_v58 = vpop.f32.mrf.mxu3 }
 0x9b0   :  { %v1645_v39 = vmul.f32 0.088388346, %v1624_v58  ;;  %v2139_v58 = vsel %vm2138_vm7, %v3436_v44, 0.0 }
 0x9b2   :  { %v1652_v45 = vsel %vm781_vm3, %v1645_v39, -inf }
 0x9b3   :  { %1653 = vmax.xlane.f32.xlu0 %v1652_v45 }
 0x9b7   :  { %v1627_v26 = vpop.f32.mrf.mxu3 }
 0x9b8   :  { %v1646_v13 = vmul.f32 0.088388346, %v1627_v26 }
 0x9ba   :  { %v1655_v51 = vsel %vm781_vm3, %v1646_v13, -inf }
 0x9bb   :  { %1656 = vmax.xlane.f32.xlu1 %v1655_v51 }
 0x9bf   :  { %v1630_v63 = vpop.f32.mrf.mxu3 }
 0x9c0   :  { %v1647_v6 = vmul.f32 0.088388346, %v1630_v63 }
 0x9c2   :  { %v1658_v57 = vsel %vm781_vm3, %v1647_v6, -inf }
 0x9c3   :  { %1659 = vmax.xlane.f32.xlu2 %v1658_v57 }
 0x9c7   :  { %v1633_v14 = vpop.f32.mrf.mxu3 }
 0x9c8   :  { %v1648_v2 = vmul.f32 0.088388346, %v1633_v14 }
 0x9ca   :  { %v1661_v56 = vsel %vm781_vm3, %v1648_v2, -inf }
 0x9cb   :  { %1662 = vmax.xlane.f32.xlu0 %v1661_v56 }
 0x9cf   :  { %v1636_v50 = vpop.f32.mrf.mxu3 }
 0x9d0   :  { %v1649_v55 = vmul.f32 0.088388346, %v1636_v50 }
 0x9d2   :  { %v1664_v60 = vsel %vm781_vm3, %v1649_v55, -inf }
 0x9d3   :  { %1665 = vmax.xlane.f32.xlu1 %v1664_v60 }
 0x9d7   :  { %v1639_v35 = vpop.f32.mrf.mxu3 }
 0x9d8   :  { %v1650_v47 = vmul.f32 0.088388346, %v1639_v35 }
 0x9da   :  { %v1667_v37 = vsel %vm781_vm3, %v1650_v47, -inf }
 0x9db   :  { %1668 = vmax.xlane.f32.xlu2 %v1667_v37 }
 0x9df   :  { %v1642_v10 = vpop.f32.mrf.mxu3 }
 0x9e0   :  { %v1651_v34 = vmul.f32 0.088388346, %v1642_v10 }
 0x9e2   :  { %v1670_v12 = vsel %vm800_vm4, %v1651_v34, -inf }
 0x9e3   :  { %1671 = vmax.xlane.f32.xlu0 %v1670_v12 }
 0xa26   :  { %v1654_v25 = vpop.xlane.xlu0 %1653 }
 0xa27   :  { %v1673_v29 = vsub.f32 %v1645_v39, %v1654_v25 }
 0xa29   :  { %v1680_v54 = vmul.f32 1.442695, %v1673_v29 }
 0xa2b   :  { %2610 = vpow2.f32 %v1680_v54 }
 0xa2e   :  { %v1657_v38 = vpop.xlane.xlu1 %1656 }
 0xa2f   :  { %v1674_v49 = vsub.f32 %v1646_v13, %v1657_v38 }
 0xa31   :  { %v4124_v59 = vpop.eup %2610  ;;  %v1682_v43 = vmul.f32 1.442695, %v1674_v49 }
 0xa32   :  { %v1694_v17 = vsel %vm781_vm3, %v4124_v59, 0.0 }
 0xa33   :  { %2612 = vpow2.f32 %v1682_v43  ;;  %1695 = vadd.xlane.f32.xlu1 %v1694_v17 }
 0xa36   :  { %v1660_v3 = vpop.xlane.xlu2 %1659 }
 0xa37   :  { %v1675_v5 = vsub.f32 %v1647_v6, %v1660_v3 }
 0xa39   :  { %v4128_v53 = vpop.eup %2612  ;;  %v1684_v8 = vmul.f32 1.442695, %v1675_v5 }
 0xa3a   :  { %v1697_v15 = vsel %vm781_vm3, %v4128_v53, 0.0 }
 0xa3b   :  { %2614 = vpow2.f32 %v1684_v8  ;;  %1698 = vadd.xlane.f32.xlu2 %v1697_v15 }
 0xa3e   :  { %v1663_v40 = vpop.xlane.xlu0 %1662 }
 0xa3f   :  { %v1676_v27 = vsub.f32 %v1648_v2, %v1663_v40 }
 0xa41   :  { %v4132_v61 = vpop.eup %2614  ;;  %v1686_v28 = vmul.f32 1.442695, %v1676_v27 }
 0xa42   :  { %v1700_v33 = vsel %vm781_vm3, %v4132_v61, 0.0 }
 0xa43   :  { %2616 = vpow2.f32 %v1686_v28  ;;  %1701 = vadd.xlane.f32.xlu0 %v1700_v33 }
 0xa46   :  { %v1666_v0 = vpop.xlane.xlu1 %1665 }
 0xa47   :  { %v1677_v9 = vsub.f32 %v1649_v55, %v1666_v0 }
 0xa49   :  { %v4136_v41 = vpop.eup %2616  ;;  %v1688_v4 = vmul.f32 1.442695, %v1677_v9 }
 0xa4a   :  { %v1703_v18 = vsel %vm781_vm3, %v4136_v41, 0.0 }
 0xa4b   :  { %2618 = vpow2.f32 %v1688_v4  ;;  %1704 = vadd.xlane.f32.xlu1 %v1703_v18 }
 0xa4e   :  { %v1669_v36 = vpop.xlane.xlu2 %1668 }
 0xa4f   :  { %v1678_v7 = vsub.f32 %v1650_v47, %v1669_v36 }
 0xa51   :  { %v4140_v48 = vpop.eup %2618  ;;  %v1690_v31 = vmul.f32 1.442695, %v1678_v7 }
 0xa52   :  { %v1706_v21 = vsel %vm781_vm3, %v4140_v48, 0.0 }
 0xa53   :  { %2620 = vpow2.f32 %v1690_v31  ;;  %1707 = vadd.xlane.f32.xlu2 %v1706_v21 }
 0xa56   :  { %v1672_v1 = vpop.xlane.xlu0 %1671 }
 0xa57   :  { %v1679_v20 = vsub.f32 %v1651_v34, %v1672_v1 }
 0xa59   :  { %v4144_v42 = vpop.eup %2620  ;;  %v1692_v52 = vmul.f32 1.442695, %v1679_v20 }
 0xa5a   :  { %v1709_v39 = vsel %vm781_vm3, %v4144_v42, 0.0 }
 0xa5b   :  { %2622 = vpow2.f32 %v1692_v52  ;;  %2140 = vadd.xlane.f32.xlu2 %v2139_v58  ;;  %1710 = vadd.xlane.f32.xlu0 %v1709_v39 }
 0xa61   :  { %v4150_v45 = vpop.eup %2622 }
 0xa62   :  { %v1712_v26 = vsel %vm800_vm4, %v4150_v45, 0.0 }
 0xa63   :  { %1713 = vadd.xlane.f32.xlu1 %v1712_v26 }
 0xaa6   :  { %v1696_v13 = vpop.xlane.xlu1 %1695 }
 0xaa7   :  { %2624 = vrcp.f32 %v1696_v13  ;;  %v1726_v44 = vand.u32 2147483648, %v1696_v13  ;;  %v1724_v2 = vand.u32 2147483647, %v1696_v13  ;;  %vm1720_vm0 = vweird.f32 %v1696_v13 }
 0xaa9   :  { %v1727_v55 = vor.u32 1.1754944e-38, %v1726_v44  ;;  %vm1725_vm15 = vcmp.eq.f32.partialorder %v1724_v2, 8.507059e+37 }
 0xaad   :  { %v2625_v51 = vpop.eup %2624 }
 0xaae   :  { %v1716_v63 = vmul.f32 %v2625_v51, %v1696_v13  ;;  %v1699_v6 = vpop.xlane.xlu2 %1698  ;;  %vm1721_vm10 = vweird.f32 %v2625_v51 }
 0xaaf   :  { %2626 = vrcp.f32 %v1699_v6  ;;  %vm1722_vm6 = vmor %vm1720_vm0, %vm1721_vm10  ;;  %v1741_v12 = vand.u32 2147483648, %v1699_v6  ;;  %v1739_v29 = vand.u32 2147483647, %v1699_v6  ;;  %vm1735_vm13 = vweird.f32 %v1699_v6 }
 0xab0   :  { %v1717_v57 = vsub.f32 1.0, %v1716_v63 }
 0xab1   :  { %v1742_v49 = vor.u32 1.1754944e-38, %v1741_v12  ;;  %vm1740_vm10 = vcmp.eq.f32.partialorder %v1739_v29, 8.507059e+37 }
 0xab2   :  { %v1718_v14 = vmul.f32 %v2625_v51, %v1717_v57 }
 0xab4   :  { %v1719_v56 = vadd.f32 %v2625_v51, %v1718_v14 }
 0xab5   :  { %v2627_v50 = vpop.eup %2626 }
 0xab6   :  { %v1723_v60 = vsel %vm1722_vm6, %v2625_v51, %v1719_v56  ;;  %v1731_v35 = vmul.f32 %v2627_v50, %v1699_v6  ;;  %v1702_v47 = vpop.xlane.xlu0 %1701  ;;  %vm1736_vm4 = vweird.f32 %v2627_v50 }
 0xab7   :  { %v1728_v37 = vsel %vm1725_vm15, %v1727_v55, %v1723_v60  ;;  %2628 = vrcp.f32 %v1702_v47  ;;  %vm1737_vm0 = vmor %vm1735_vm13, %vm1736_vm4  ;;  %v1756_v15 = vand.u32 2147483648, %v1702_v47  ;;  %v1754_v27 = vand.u32 2147483647, %v1702_v47 }
 0xab8   :  { %v1732_v10 = vsub.f32 1.0, %v1731_v35  ;;  %v1729_v34 = vmul.f32 %v4124_v59, %v1728_v37  ;;  %vm1750_vm6 = vweird.f32 %v1702_v47 }
 0xab9   :  { %v1757_v0 = vor.u32 1.1754944e-38, %v1756_v15  ;;  %vm1755_vm4 = vcmp.eq.f32.partialorder %v1754_v27, 8.507059e+37 }
 0xaba   :  { %v1733_v25 = vmul.f32 %v2627_v50, %v1732_v10  ;;  %2461 = vmatmul.msk.f32.vlgmr.msra.gmra.mxu0 %vm781_vm3, %v1729_v34 }
 0xabc   :  { %v1734_v54 = vadd.f32 %v2627_v50, %v1733_v25 }
 0xabd   :  { %v2629_v38 = vpop.eup %2628 }
 0xabe   :  { %v1746_v43 = vmul.f32 %v2629_v38, %v1702_v47  ;;  %v1705_v17 = vpop.xlane.xlu1 %1704  ;;  %v1738_v3 = vsel %vm1737_vm0, %v2627_v50, %v1734_v54  ;;  %vm1751_vm15 = vweird.f32 %v2629_v38 }
 0xabf   :  { %2630 = vrcp.f32 %v1705_v17  ;;  %v1743_v5 = vsel %vm1740_vm10, %v1742_v49, %v1738_v3  ;;  %vm1752_vm13 = vmor %vm1750_vm6, %vm1751_vm15  ;;  %v1771_v21 = vand.u32 2147483648, %v1705_v17  ;;  %vm1765_vm10 = vweird.f32 %v1705_v17 }
 0xac0   :  { %v1747_v8 = vsub.f32 1.0, %v1746_v43  ;;  %v1744_v59 = vmul.f32 %v4128_v53, %v1743_v5  ;;  %v1769_v20 = vand.u32 2147483647, %v1705_v17 }
 0xac1   :  { %v1772_v51 = vor.u32 1.1754944e-38, %v1771_v21 }
 0xac2   :  { %v1748_v40 = vmul.f32 %v2629_v38, %v1747_v8  ;;  %2462 = vmatmul.msk.f32.gmra.mxu0 %vm781_vm3, %v1744_v59  ;;  %vm1770_vm15 = vcmp.eq.f32.partialorder %v1769_v20, 8.507059e+37 }
 0xac4   :  { %v1749_v28 = vadd.f32 %v2629_v38, %v1748_v40 }
 0xac5   :  { %v2631_v33 = vpop.eup %2630 }
 0xac6   :  { %v1761_v9 = vmul.f32 %v2631_v33, %v1705_v17  ;;  %v1708_v4 = vpop.xlane.xlu2 %1707  ;;  %v1753_v18 = vsel %vm1752_vm13, %v2629_v38, %v1749_v28  ;;  %vm1766_vm0 = vweird.f32 %v2631_v33 }
 0xac7   :  { %2632 = vrcp.f32 %v1708_v4  ;;  %v1758_v36 = vsel %vm1755_vm4, %v1757_v0, %v1753_v18  ;;  %vm1767_vm12 = vmor %vm1765_vm10, %vm1766_vm0  ;;  %v1786_v57 = vand.u32 2147483648, %v1708_v4  ;;  %v1784_v14 = vand.u32 2147483647, %v1708_v4 }
 0xac8   :  { %v1762_v7 = vsub.f32 1.0, %v1761_v9  ;;  %v1759_v53 = vmul.f32 %v4132_v61, %v1758_v36  ;;  %vm1780_vm13 = vweird.f32 %v1708_v4 }
 0xac9   :  { %v1787_v55 = vor.u32 1.1754944e-38, %v1786_v57 }
 0xaca   :  { %v1763_v31 = vmul.f32 %v2631_v33, %v1762_v7  ;;  %2463 = vmatmul.msk.f32.gmra.mxu0 %vm781_vm3, %v1759_v53 }
 0xacc   :  { %v1764_v1 = vadd.f32 %v2631_v33, %v1763_v31 }
 0xacd   :  { %v2633_v52 = vpop.eup %2632 }
 0xace   :  { %v1776_v58 = vmul.f32 %v2633_v52, %v1708_v4  ;;  %v2141_v39 = vpop.xlane.xlu2 %2140  ;;  %v1711_v26 = vpop.xlane.xlu0 %1710  ;;  %v1768_v13 = vsel %vm1767_vm12, %v2631_v33, %v1764_v1  ;;  %vm1781_vm6 = vweird.f32 %v2633_v52  ;;  %vm1785_vm12 = vcmp.eq.f32.partialorder %v1784_v14, 8.507059e+37 }
 0xacf   :  { %2634 = vrsqrt.f32 %v2141_v39  ;;  %v1773_v61 = vsel %vm1770_vm15, %v1772_v51, %v1768_v13  ;;  %vm1782_vm4 = vmor %vm1780_vm13, %vm1781_vm6  ;;  %v1801_v29 = vand.u32 2147483648, %v1711_v26  ;;  %v1799_v38 = vand.u32 2147483647, %v1711_v26 }
 0xad0   :  { %v1777_v63 = vsub.f32 1.0, %v1776_v58  ;;  %2636 = vrcp.f32 %v1711_v26  ;;  %v1774_v44 = vmul.f32 %v4136_v41, %v1773_v61  ;;  %vm1795_vm10 = vweird.f32 %v1711_v26 }
 0xad1   :  { %v1802_v5 = vor.u32 1.1754944e-38, %v1801_v29  ;;  %vm1800_vm6 = vcmp.eq.f32.partialorder %v1799_v38, 8.507059e+37  ;;  %vm2149_vm13 = vcmp.eq.f32.partialorder %v2141_v39, inf  ;;  %v2152_v27 = vand.u32 2147483648, %v2141_v39 }
 0xad2   :  { %v1778_v6 = vmul.f32 %v2633_v52, %v1777_v63  ;;  %2464 = vmatmul.msk.f32.gmra.mxu0 %vm781_vm3, %v1774_v44 }
 0xad4   :  { %v1779_v2 = vadd.f32 %v2633_v52, %v1778_v6 }
 0xad5   :  { %v2635_v56 = vpop.eup %2634 }
 0xad6   :  { %v2637_v50 = vpop.eup %2636  ;;  %v2143_v60 = vmul.f32 %v2635_v56, %v2141_v39  ;;  %v1714_v35 = vpop.xlane.xlu1 %1713  ;;  %v1783_v47 = vsel %vm1782_vm4, %v2633_v52, %v1779_v2  ;;  %vm2151_vm4 = vcmp.eq.f32.partialorder %v2141_v39, 0.0 }
 0xad7   :  { %v1791_v37 = vmul.f32 %v2637_v50, %v1711_v26  ;;  %2638 = vrcp.f32 %v1714_v35  ;;  %v1788_v34 = vsel %vm1785_vm12, %v1787_v55, %v1783_v47  ;;  %vm1796_vm0 = vweird.f32 %v2637_v50 }
 0xad8   :  { %v2144_v10 = vmul.f32 %v2635_v56, %v2143_v60  ;;  %v1789_v41 = vmul.f32 %v4140_v48, %v1788_v34  ;;  %vm1797_vm15 = vmor %vm1795_vm10, %vm1796_vm0  ;;  %v1816_v9 = vand.u32 2147483648, %v1714_v35  ;;  %v1814_v18 = vand.u32 2147483647, %v1714_v35 }
 0xad9   :  { %v1792_v12 = vsub.f32 1.0, %v1791_v37  ;;  %vm1810_vm0 = vweird.f32 %v1714_v35  ;;  %v2708_v37 = vld [vmem:[%s4407_s10] ss:$0 sm:$0xff] }
 0xada   :  { %v2145_v25 = vmul.f32 0.5, %v2144_v10  ;;  %2465 = vmatmul.msk.f32.gmra.mxu0 %vm781_vm3, %v1789_v41  ;;  %v1817_v53 = vor.u32 1.1754944e-38, %v1816_v9 }
 0xadb   :  { %v1793_v54 = vmul.f32 %v2637_v50, %v1792_v12 }
 0xadc   :  { %v2146_v49 = vsub.f32 1.5, %v2145_v25 }
 0xadd   :  { %v2639_v43 = vpop.eup %2638  ;;  %v1794_v17 = vadd.f32 %v2637_v50, %v1793_v54 }
 0xade   :  { %v2147_v3 = vmul.f32 %v2635_v56, %v2146_v49  ;;  %v1806_v8 = vmul.f32 %v2639_v43, %v1714_v35  ;;  %vm1811_vm12 = vweird.f32 %v2639_v43 }
 0xadf   :  { %v1798_v59 = vsel %vm1797_vm15, %v2637_v50, %v1794_v17  ;;  %vm1812_vm10 = vmor %vm1810_vm0, %vm1811_vm12  ;;  %vm1815_vm15 = vcmp.eq.f32.partialorder %v1814_v18, 8.507059e+37 }
 0xae0   :  { %v2148_v15 = vmul.f32 %v2147_v3, %v2141_v39  ;;  %v1807_v40 = vsub.f32 1.0, %v1806_v8  ;;  %v1803_v48 = vsel %vm1800_vm6, %v1802_v5, %v1798_v59 }
 0xae1   :  { %v1804_v28 = vmul.f32 %v4144_v42, %v1803_v48 }
 0xae2   :  { %v2150_v33 = vsel %vm2149_vm13, %v2141_v39, %v2148_v15  ;;  %v1808_v0 = vmul.f32 %v2639_v43, %v1807_v40 }
 0xae3   :  { %v2153_v4 = vsel %vm2151_vm4, %v2152_v27, %v2150_v33  ;;  %2466 = vmatmul.msk.f32.gmra.mxu0 %vm781_vm3, %v1804_v28 }
 0xae4   :  { %v2154_v36 = vmax.f32 %v2153_v4, 1e-12  ;;  %v1809_v7 = vadd.f32 %v2639_v43, %v1808_v0 }
 0xae6   :  { %2640 = vrcp.f32 %v2154_v36  ;;  %v1813_v31 = vsel %vm1812_vm10, %v2639_v43, %v1809_v7  ;;  %v2166_v58 = vand.u32 2147483648, %v2154_v36  ;;  %v2164_v26 = vand.u32 2147483647, %v2154_v36 }
 0xae7   :  { %v1818_v21 = vsel %vm1815_vm15, %v1817_v53, %v1813_v31  ;;  %vm2160_vm13 = vweird.f32 %v2154_v36 }
 0xae8   :  { %v1819_v42 = vmul.f32 %v4150_v45, %v1818_v21  ;;  %v2167_v51 = vor.u32 1.1754944e-38, %v2166_v58  ;;  %vm2165_vm12 = vcmp.eq.f32.partialorder %v2164_v26, 8.507059e+37 }
 0xaeb   :  { %2467 = vmatmul.msk.f32.gmra.mxu0 %vm781_vm3, %v1819_v42 }
 0xaec   :  { %v2641_v1 = vpop.eup %2640 }
 0xaed   :  { %v2156_v20 = vmul.f32 %v2641_v1, %v2154_v36  ;;  %vm2161_vm6 = vweird.f32 %v2641_v1 }
 0xaee   :  { %vm2162_vm4 = vmor %vm2160_vm13, %vm2161_vm6 }
 0xaef   :  { %v2157_v52 = vsub.f32 1.0, %v2156_v20 }
 0xaf1   :  { %v2158_v39 = vmul.f32 %v2641_v1, %v2157_v52 }
 0xaf3   :  { %v2159_v13 = vadd.f32 %v2641_v1, %v2158_v39 }
 0xaf5   :  { %v2163_v63 = vsel %vm2162_vm4, %v2641_v1, %v2159_v13 }
 0xaf6   :  { %v2168_v61 = vsel %vm2165_vm12, %v2167_v51, %v2163_v63 }
 0xaf7   :  { %v4169_v6 = vmul.f32 %v2168_v61, %v3426_v16 }
 0xaf9   :  { %v2170_v45 = vmul.f32 %v4169_v6, %v3585_v11 }
 0xafb   :  { %v2171_v57 = vsel %vm2138_vm7, %v2170_v45, 0.0 }
 0xafc   :  { %2172 = vadd.xlane.f32.xlu0 %v2171_v57 }
 0xb37   :  { %v1861_v44 = vpop.f32.mrf.mxu0 }
 0xb38   :  { %1898 = vmatmul.f32.vlgmr.msra.gmra.mxu1 %v1861_v44 }
 0xb3f   :  { %v1864_v14 = vpop.f32.mrf.mxu0 }
 0xb40   :  { %1901 = vmatmul.f32.gmra.mxu1 %v1864_v14 }
 0xb47   :  { %v1867_v2 = vpop.f32.mrf.mxu0 }
 0xb48   :  { %1904 = vmatmul.f32.gmra.mxu1 %v1867_v2 }
 0xb4f   :  { %v1870_v56 = vpop.f32.mrf.mxu0 }
 0xb50   :  { %1907 = vmatmul.f32.gmra.mxu1 %v1870_v56 }
 0xb57   :  { %v1873_v50 = vpop.f32.mrf.mxu0 }
 0xb58   :  { %1910 = vmatmul.f32.gmra.mxu1 %v1873_v50 }
 0xb60   :  { %v1876_v55 = vpop.f32.mrf.mxu0 }
 0xb61   :  { %1913 = vmatmul.f32.gmra.mxu1 %v1876_v55 }
 0xb68   :  { %v1879_v60 = vpop.f32.mrf.mxu0 }
 0xb69   :  { %1916 = vmatmul.f32.gmra.mxu1 %v1879_v60 }
 0xb6f   :  { %v2173_v35 = vpop.xlane.xlu0 %2172 }
 0xb70   :  { %v2174_v11 = vmul.f32 %v2173_v35, %v4169_v6 }
 0xb72   :  { %2176 = vrot.lane.b32.xlu1 %v2174_v11, %s2769_s2  ;;  %s2781_s2 = smov 8  }
 0xbb5   :  { %v1899_v47 = vpop.f32.mrf.mxu1 }
 0xbb6   :  { %v1900_v10 = vadd.f32 %v2708_v37, %v1899_v47 }
 0xbb8   :  { %2468 = vst [vmem:[%s4411_s14 + $0x38] sm:$0xff] %v1900_v10  ;;  %1928 = vmax.xlane.f32.xlu2 %v1900_v10 }
 0xbbd   :  { %v1902_v34 = vpop.f32.mrf.mxu1 }
 0xbbe   :  { %v1903_v12 = vadd.f32 %v2708_v37, %v1902_v34 }
 0xbc0   :  { %2469 = vst [vmem:[%s4411_s14 + $0x40] sm:$0xff] %v1903_v12  ;;  %1930 = vmax.xlane.f32.xlu0 %v1903_v12 }
 0xbc5   :  { %v1905_v41 = vpop.f32.mrf.mxu1 }
 0xbc6   :  { %v1906_v25 = vadd.f32 %v2708_v37, %v1905_v41 }
 0xbc8   :  { %2470 = vst [vmem:[%s4411_s14 + $0x48] sm:$0xff] %v1906_v25  ;;  %1932 = vmax.xlane.f32.xlu0 %v1906_v25 }
 0xbcd   :  { %v1908_v29 = vpop.f32.mrf.mxu1 }
 0xbce   :  { %v1909_v54 = vadd.f32 %v2708_v37, %v1908_v29 }
 0xbd0   :  { %2471 = vst [vmem:[%s4411_s14 + $0x50] sm:$0xff] %v1909_v54  ;;  %1934 = vmax.xlane.f32.xlu0 %v1909_v54 }
 0xbd5   :  { %v1911_v38 = vpop.f32.mrf.mxu1 }
 0xbd6   :  { %v1912_v49 = vadd.f32 %v2708_v37, %v1911_v38 }
 0xbd8   :  { %2472 = vst [vmem:[%s4411_s14 + $0x58] sm:$0xff] %v1912_v49  ;;  %1936 = vmax.xlane.f32.xlu1 %v1912_v49 }
 0xbde   :  { %v1914_v43 = vpop.f32.mrf.mxu1 }
 0xbdf   :  { %v1915_v17 = vadd.f32 %v2708_v37, %v1914_v43 }
 0xbe1   :  { %2473 = vst [vmem:[%s4411_s14 + $0x60] sm:$0xff] %v1915_v17  ;;  %1938 = vmax.xlane.f32.xlu0 %v1915_v17 }
 0xbe4   :  { %v2177_v3 = vpop.permute.xlu1 %2176 }
 0xbe5   :  { %v4198_v5 = vsub.f32 %v3426_v16, %v2177_v3 }
 0xbe6   :  { %v1917_v59 = vpop.f32.mrf.mxu1 }
 0xbe7   :  { %v2180_v8 = vmul.f32 %v4198_v5, %v4198_v5  ;;  %v1918_v15 = vadd.f32 %v2708_v37, %v1917_v59 }
 0xbe9   :  { %2182 = vrot.lane.b32.xlu2 %v2180_v8, %s2768_s25  ;;  %2474 = vst [vmem:[%s4411_s14 + $0x68] sm:$0x3f] %v1918_v15  ;;  %v1940_v40 = vsel %vm1073_vm9, %v1918_v15, -inf }
 0xbea   :  { %1941 = vmax.xlane.f32.xlu0 %v1940_v40 }
 0xc2b   :  { %v1929_v48 = vpop.xlane.xlu2 %1928 }
 0xc2c   :  { %vm1943_vm3 = vcmp.eq.f32.partialorder %v1900_v10, %v1929_v48 }
 0xc2d   :  { %v1950_v27 = vsel %vm1943_vm3, %v3701_v30, 128 }
 0xc2e   :  { %v1958_v16 = vshra.s32 %v1950_v27, 16  ;;  %v1957_v50 = vand.u32 65535, %v1950_v27 }
 0xc30   :  { %v1960_v28 = vcvt.s32.f32 %v1958_v16  ;;  %v1959_v60 = vcvt.s32.f32 %v1957_v50 }
 0xc32   :  { %1961 = vmin.xlane.f32.xlu2 %v1960_v28 }
 0xc33   :  { %v1931_v33 = vpop.xlane.xlu0 %1930 }
 0xc34   :  { %vm1944_vm0 = vcmp.eq.f32.partialorder %v1903_v12, %v1931_v33 }
 0xc35   :  { %v1951_v4 = vsel %vm1944_vm0, %v3701_v30, 128 }
 0xc36   :  { %v1972_v53 = vshra.s32 %v1951_v4, 16  ;;  %v1971_v37 = vand.u32 65535, %v1951_v4 }
 0xc38   :  { %v1974_v42 = vcvt.s32.f32 %v1972_v53  ;;  %v1973_v29 = vcvt.s32.f32 %v1971_v37 }
 0xc3b   :  { %v1933_v0 = vpop.xlane.xlu0 %1932 }
 0xc3c   :  { %vm1945_vm15 = vcmp.eq.f32.partialorder %v1906_v25, %v1933_v0 }
 0xc3d   :  { %v1952_v1 = vsel %vm1945_vm15, %v3701_v30, 128 }
 0xc3e   :  { %v1986_v52 = vshra.s32 %v1952_v1, 16  ;;  %v1985_v43 = vand.u32 65535, %v1952_v1 }
 0xc40   :  { %v1988_v58 = vcvt.s32.f32 %v1986_v52 }
 0xc43   :  { %v2183_v9 = vpop.permute.xlu2 %2182  ;;  %v1935_v36 = vpop.xlane.xlu0 %1934 }
 0xc44   :  { %v2185_v18 = vsel %vm2138_vm7, %v2183_v9, 0.0  ;;  %vm1946_vm10 = vcmp.eq.f32.partialorder %v1909_v54, %v1935_v36 }
 0xc45   :  { %2186 = vadd.xlane.f32.xlu0 %v2185_v18  ;;  %v1953_v7 = vsel %vm1946_vm10, %v3701_v30, 128 }
 0xc46   :  { %v2000_v31 = vshra.s32 %v1953_v7, 16  ;;  %v1999_v47 = vand.u32 65535, %v1953_v7 }
 0xc48   :  { %v2002_v21 = vcvt.s32.f32 %v2000_v31  ;;  %v2001_v34 = vcvt.s32.f32 %v1999_v47 }
 0xc4a   :  { %2003 = vmin.xlane.f32.xlu1 %v2002_v21 }
 0xc4b   :  { %v1937_v20 = vpop.xlane.xlu1 %1936 }
 0xc4c   :  { %vm1947_vm6 = vcmp.eq.f32.partialorder %v1912_v49, %v1937_v20 }
 0xc4d   :  { %1975 = vmin.xlane.f32.xlu0 %v1974_v42  ;;  %v4213_v39 = vsel %vm1947_vm6, %v3701_v30, 128 }
 0xc4e   :  { %v2014_v51 = vshra.s32 %v4213_v39, 16  ;;  %v2013_v16 = vand.u32 65535, %v4213_v39 }
 0xc50   :  { %v2016_v45 = vcvt.s32.f32 %v2014_v51  ;;  %v2015_v7 = vcvt.s32.f32 %v2013_v16 }
 0xc54   :  { %v1939_v26 = vpop.xlane.xlu0 %1938 }
 0xc55   :  { %1989 = vmin.xlane.f32.xlu0 %v1988_v58  ;;  %vm1948_vm7 = vcmp.eq.f32.partialorder %v1915_v17, %v1939_v26 }
 0xc56   :  { %v1955_v13 = vsel %vm1948_vm7, %v3701_v30, 128 }
 0xc57   :  { %v2028_v63 = vshra.s32 %v1955_v13, 16 }
 0xc59   :  { %v2030_v61 = vcvt.s32.f32 %v2028_v63 }
 0xc5b   :  { %2031 = vmin.xlane.f32.xlu2 %v2030_v61 }
 0xc5d   :  { %2017 = vmin.xlane.f32.xlu0 %v2016_v45  ;;  %v1942_v57 = vpop.xlane.xlu0 %1941 }
 0xc5e   :  { %vm1949_vm13 = vcmp.eq.f32.partialorder %v1918_v15, %v1942_v57  ;;  %v1987_v15 = vcvt.s32.f32 %v1985_v43 }
 0xc5f   :  { %v1956_v44 = vsel %vm1949_vm13, %v3701_v30, 128 }
 0xc60   :  { %v4219_v14 = vsel %vm1073_vm9, %v1956_v44, 2147483647 }
 0xc61   :  { %v2043_v2 = vshra.s32 %v4219_v14, 16 }
 0xc63   :  { %v4222_v56 = vcvt.s32.f32 %v2043_v2 }
 0xc65   :  { %2046 = vmin.xlane.f32.xlu0 %v4222_v56 }
 0xca5   :  { %v4225_v55 = vpop.xlane.xlu2 %1961 }
 0xca6   :  { %vm1963_vm4 = vcmp.eq.f32.partialorder %v1960_v28, %v4225_v55  ;;  %v2027_v28 = vand.u32 65535, %v1955_v13 }
 0xca7   :  { %v1964_v35 = vsel %vm1963_vm4, %v1959_v60, inf }
 0xca8   :  { %1965 = vmin.xlane.f32.xlu1 %v1964_v35  ;;  %v2029_v36 = vcvt.s32.f32 %v2027_v28 }
 0xcb8   :  { %v2187_v11 = vpop.xlane.xlu0 %2186 }
 0xcb9   :  { %2642 = vrsqrt.f32 %v2187_v11  ;;  %vm2195_vm10 = vcmp.eq.f32.partialorder %v2187_v11, inf  ;;  %v2198_v27 = vand.u32 2147483648, %v2187_v11  ;;  %vm2197_vm15 = vcmp.eq.f32.partialorder %v2187_v11, 0.0 }
 0xcbd   :  { %v4228_v12 = vpop.xlane.xlu1 %2003 }
 0xcbe   :  { %vm2005_vm12 = vcmp.eq.f32.partialorder %v2002_v21, %v4228_v12 }
 0xcbf   :  { %v2643_v10 = vpop.eup %2642  ;;  %v2006_v54 = vsel %vm2005_vm12, %v2001_v34, inf }
 0xcc0   :  { %v2189_v41 = vmul.f32 %v2643_v10, %v2187_v11  ;;  %v4231_v25 = vpop.xlane.xlu0 %1975  ;;  %2007 = vmin.xlane.f32.xlu0 %v2006_v54 }
 0xcc1   :  { %vm1977_vm3 = vcmp.eq.f32.partialorder %v1974_v42, %v4231_v25 }
 0xcc2   :  { %v2190_v38 = vmul.f32 %v2643_v10, %v2189_v41  ;;  %v1978_v49 = vsel %vm1977_vm3, %v1973_v29, inf }
 0xcc3   :  { %1979 = vmin.xlane.f32.xlu2 %v1978_v49  ;;  %v2010_v49 = vcvt.f32.s32 %v4228_v12 }
 0xcc4   :  { %v2191_v17 = vmul.f32 0.5, %v2190_v38 }
 0xcc6   :  { %v2192_v3 = vsub.f32 1.5, %v2191_v17 }
 0xcc8   :  { %v2193_v8 = vmul.f32 %v2643_v10, %v2192_v3  ;;  %v4234_v59 = vpop.xlane.xlu0 %1989 }
 0xcc9   :  { %vm1991_vm0 = vcmp.eq.f32.partialorder %v1988_v58, %v4234_v59  ;;  %v1996_v10 = vcvt.f32.s32 %v4234_v59 }
 0xcca   :  { %v2194_v40 = vmul.f32 %v2193_v8, %v2187_v11  ;;  %v1992_v48 = vsel %vm1991_vm0, %v1987_v15, inf }
 0xccb   :  { %1993 = vmin.xlane.f32.xlu1 %v1992_v48  ;;  %v1997_v54 = vshll.u32 %v1996_v10, 16 }
 0xccc   :  { %v2196_v33 = vsel %vm2195_vm10, %v2187_v11, %v2194_v40 }
 0xccd   :  { %v2199_v0 = vsel %vm2197_vm15, %v2198_v27, %v2196_v33 }
 0xcce   :  { %v2200_v9 = vmax.f32 %v2199_v0, 1e-12  ;;  %v4238_v4 = vpop.xlane.xlu2 %2031 }
 0xccf   :  { %vm2033_vm6 = vcmp.eq.f32.partialorder %v2030_v61, %v4238_v4  ;;  %v2042_v61 = vand.u32 65535, %v4219_v14  ;;  %v1982_v14 = vcvt.f32.s32 %v4231_v25 }
 0xcd0   :  { %2644 = vrcp.f32 %v2200_v9  ;;  %v4240_v18 = vpop.xlane.xlu0 %2017  ;;  %v2034_v53 = vsel %vm2033_vm6, %v2029_v36, inf  ;;  %v2212_v20 = vand.u32 2147483648, %v2200_v9  ;;  %v2210_v58 = vand.u32 2147483647, %v2200_v9 }
 0xcd1   :  { %vm2019_vm7 = vcmp.eq.f32.partialorder %v2016_v45, %v4240_v18  ;;  %vm2206_vm4 = vweird.f32 %v2200_v9  ;;  %v2044_v57 = vcvt.s32.f32 %v2042_v61  ;;  %v2024_v3 = vcvt.f32.s32 %v4240_v18 }
 0xcd2   :  { %v2020_v31 = vsel %vm2019_vm7, %v2015_v7, inf  ;;  %v2213_v26 = vor.u32 1.1754944e-38, %v2212_v20  ;;  %vm2211_vm3 = vcmp.eq.f32.partialorder %v2210_v58, 8.507059e+37  ;;  %v2038_v36 = vcvt.f32.s32 %v4238_v4 }
 0xcd3   :  { %2035 = vmin.xlane.f32.xlu1 %v2034_v53  ;;  %2021 = vmin.xlane.f32.xlu2 %v2020_v31  ;;  %v2025_v48 = vshll.u32 %v2024_v3, 16  ;;  %vm4435_vm7 = vcmask 434176   ;;  %v2710_v3 = vld [vmem:[%s4409_s12 + $0x8] sm:$0xff] }
 0xcd6   :  { %v2645_v21 = vpop.eup %2644 }
 0xcd7   :  { %v2202_v42 = vmul.f32 %v2645_v21, %v2200_v9  ;;  %vm2207_vm13 = vweird.f32 %v2645_v21 }
 0xcd8   :  { %vm2208_vm12 = vmor %vm2206_vm4, %vm2207_vm13  ;;  %v4254_v45 = vpop.xlane.xlu0 %2046  ;;  %vm4436_vm13 = vcmask 23552  }
 0xcd9   :  { %v2203_v1 = vsub.f32 1.0, %v2202_v42  ;;  %vm2048_vm0 = vcmp.eq.f32.partialorder %v4222_v56, %v4254_v45  ;;  %v1983_v56 = vshll.u32 %v1982_v14, 16  ;;  %v2053_v4 = vcvt.f32.s32 %v4254_v45 }
 0xcda   :  { %v2049_v44 = vsel %vm2048_vm0, %v2044_v57, inf  ;;  %vm4442_vm0 = vcmask 21504  }
 0xcdb   :  { %v2204_v52 = vmul.f32 %v2645_v21, %v2203_v1  ;;  %v2054_v1 = vshll.u32 %v2053_v4, 16 }
 0xcdd   :  { %v2205_v39 = vadd.f32 %v2645_v21, %v2204_v52 }
 0xcdf   :  { %v2209_v13 = vsel %vm2208_vm12, %v2645_v21, %v2205_v39 }
 0xce0   :  { %v2214_v51 = vsel %vm2211_vm3, %v2213_v26, %v2209_v13 }
 0xce1   :  { %v4245_v63 = vmul.f32 %v2214_v51, %v4198_v5  ;;  %v1968_v5 = vcvt.f32.s32 %v4225_v55 }
 0xce3   :  { %2217 = vrot.lane.b32.xlu0 %v4245_v63, %s2770_s29  ;;  %v1969_v50 = vshll.u32 %v1968_v5, 16 }
 0xceb   :  { %2221 = vrot.lane.b32.xlu2 %v4245_v63, %s2771_s3 }
 0xcec   :  { %2234 = vrot.lane.b32.xlu1 %v4245_v63, %s2774_s11 }
 0xd0d   :  { %2050 = vmin.xlane.f32.xlu0 %v2049_v44 }
 0xd1b   :  { %v1966_v2 = vpop.xlane.xlu1 %1965 }
 0xd1c   :  { %v1967_v60 = vcvt.f32.s32 %v1966_v2 }
 0xd1e   :  { %v1970_v35 = vadd.s32 %v1969_v50, %v1967_v60 }
 0xd20   :  { %vm2071_vm10 = vcmp.eq.s32.totalorder %v3701_v30, %v1970_v35  ;;  %v2056_v55 = vperm.slane %v1970_v35, %v3701_v30 }
 0xd21   :  { %2482 = vmatmul.msk.f32.vlgmr.msrb.gmra.mxu2 %vm2071_vm10, %v2773_v22  ;;  %2230 = vrot.lane.b32.xlu0 %v4245_v63, %s2772_s4  ;;  %vm4443_vm10 = vcmask 7168  }
 0xd33   :  { %v2008_v38 = vpop.xlane.xlu0 %2007 }
 0xd34   :  { %v2009_v17 = vcvt.f32.s32 %v2008_v38 }
 0xd36   :  { %v1980_v11 = vpop.xlane.xlu2 %1979 }
 0xd37   :  { %v1981_v47 = vcvt.f32.s32 %v1980_v11 }
 0xd39   :  { %v1984_v37 = vadd.s32 %v1983_v56, %v1981_v47 }
 0xd3b   :  { %v2057_v34 = vperm.slane %v1984_v37, %v3851_v24  ;;  %vm2072_vm15 = vcmp.eq.s32.totalorder %v3701_v30, %v1984_v37  ;;  %v2011_v24 = vshll.u32 %v2010_v49, 16  ;;  %v2257_v37 = vrot.slane %v4169_v6, 1 }
 0xd3c   :  { %2483 = vmatmul.msk.f32.gmra.mxu2 %vm2072_vm15, %v2773_v22  ;;  %vm4444_vm15 = vcmask 15360  }
 0xd3d   :  { %v2058_v41 = vsel %vm1193_vm2, %v2057_v34, %v2056_v55  ;;  %v2012_v15 = vadd.s32 %v2011_v24, %v2009_v17  ;;  %v2709_v17 = vld [vmem:[%s4409_s12] sm:$0xff] }
 0xd3e   :  { %v1994_v29 = vpop.xlane.xlu1 %1993 }
 0xd3f   :  { %v1995_v25 = vcvt.f32.s32 %v1994_v29  ;;  %v2061_v12 = vperm.slane %v2012_v15, %v3854_v19  ;;  %vm2074_vm2 = vcmp.eq.s32.totalorder %v3701_v30, %v2012_v15  ;;  %v2039_v19 = vshll.u32 %v2038_v36, 16 }
 0xd41   :  { %v1998_v43 = vadd.s32 %v1997_v54, %v1995_v25 }
 0xd43   :  { %v2059_v8 = vperm.slane %v1998_v43, %v3848_v62  ;;  %vm2073_vm6 = vcmp.eq.s32.totalorder %v3701_v30, %v1998_v43 }
 0xd44   :  { %2484 = vmatmul.msk.f32.gmra.mxu2 %vm2073_vm6, %v2773_v22  ;;  %vm4445_vm6 = vcmask 1040384  }
 0xd45   :  { %v2060_v59 = vsel %vm1197_vm5, %v2059_v8, %v2058_v41  ;;  %v2711_v8 = vld [vmem:[%s4409_s12 + $0x10] sm:$0x1]  ;;  %s2780_s12 = smov 128  }
 0xd46   :  { %v2022_v40 = vpop.xlane.xlu2 %2021  ;;  %v2062_v62 = vsel %vm1201_vm8, %v2061_v12, %v2060_v59  ;;  %v2036_v18 = vpop.xlane.xlu1 %2035 }
 0xd47   :  { %v2023_v27 = vcvt.f32.s32 %v2022_v40  ;;  %v2037_v7 = vcvt.f32.s32 %v2036_v18 }
 0xd49   :  { %v2026_v16 = vadd.s32 %v2025_v48, %v2023_v27 }
 0xd4b   :  { %v2063_v28 = vperm.slane %v2026_v16, %v3871_v32  ;;  %vm2075_vm5 = vcmp.eq.s32.totalorder %v3701_v30, %v2026_v16  ;;  %v2040_v32 = vadd.s32 %v2039_v19, %v2037_v7 }
 0xd4c   :  { %2485 = vmatmul.msk.f32.gmra.mxu2 %vm2074_vm2, %v2773_v22  ;;  %vm4446_vm2 = vcmask 1041408  }
 0xd4d   :  { %v2064_v33 = vsel %vm1205_vm11, %v2063_v28, %v2062_v62  ;;  %vm2076_vm8 = vcmp.eq.s32.totalorder %v3701_v30, %v2040_v32  ;;  %v2065_v52 = vperm.slane %v2040_v32, %v3883_v23 }
 0xd4e   :  { %v2222_v0 = vpop.permute.xlu2 %2221 }
 0xd4f   :  { %v2224_v9 = vmul.f32 %v2222_v0, %v4169_v6  ;;  %v2066_v26 = vsel %vm1209_vm14, %v2065_v52, %v2064_v33  ;;  %vm4437_vm14 = vmmov %vm4436_vm13 }
 0xd51   :  { %2226 = vrot.lane.b32.xlu2 %v2224_v9, %s2772_s4 }
 0xd54   :  { %2486 = vmatmul.msk.f32.gmra.mxu2 %vm2075_vm5, %v2773_v22 }
 0xd55   :  { %v2218_v21 = vpop.permute.xlu0 %2217 }
 0xd56   :  { %v2220_v23 = vmul.f32 %v2218_v21, %v4169_v6 }
 0xd5c   :  { %2487 = vmatmul.msk.f32.gmra.mxu2 %vm2076_vm8, %v2773_v22 }
 0xd5e   :  { %v2235_v53 = vpop.permute.xlu1 %2234 }
 0xd5f   :  { %v2237_v31 = vmul.f32 %v2235_v53, %v4169_v6 }
 0xd61   :  { %2239 = vrot.lane.b32.xlu1 %v2237_v31, %s2775_s30 }
 0xd80   :  { %v2051_v42 = vpop.xlane.xlu0 %2050 }
 0xd81   :  { %v2052_v20 = vcvt.f32.s32 %v2051_v42 }
 0xd83   :  { %v2055_v58 = vadd.s32 %v2054_v1, %v2052_v20 }
 0xd85   :  { %v2067_v39 = vperm.slane %v2055_v58, %v3891_v46  ;;  %vm2077_vm11 = vcmp.eq.s32.totalorder %v3701_v30, %v2055_v58 }
 0xd86   :  { %2488 = vmatmul.msk.f32.gmra.mxu2 %vm2077_vm11, %v2773_v22 }
 0xd87   :  { %v2068_v13 = vsel %vm1213_vm1, %v2067_v39, %v2066_v26  ;;  %vm4438_vm1 = vmmov %vm4436_vm13 }
 0xd88   :  { %2070 = vst.msk [vmem:[#allocation2 + $0x1] sm:$0x1] %vm4435_vm7, %v2068_v13  ;;  %vm4439_vm4 = vmmov %vm4438_vm1 }
 0xd89   :  { %vm4440_vm12 = vmmov %vm4438_vm1 }
 0xd8a   :  { %vm4441_vm3 = vmmov %vm4438_vm1 }
 0xd8b   :  { %vm4447_vm5 = vmmov %vm4438_vm1 }
 0xd8c   :  { %vm4448_vm8 = vmmov %vm4438_vm1 }
 0xd8d   :  { %vm4449_vm11 = vmmov %vm4438_vm1 }
 0xd8e   :  { %vm4450_vm7 = vmmov %vm4438_vm1 }
 0xd93   :  { %v2231_v45 = vpop.permute.xlu0 %2230 }
 0xda4   :  { %v2109_v51 = vpop.f32.mrf.mxu2 }
 0xda5   :  { %2489 = vst.msk [vmem:[%s4413_s16 + $0x38] sm:$0xff] %vm4436_vm13, %v2109_v51  ;;  %vm4451_vm13 = vmmov %vm4438_vm1 }
 0xdab   :  { %v2227_v61 = vpop.permute.xlu2 %2226 }
 0xdac   :  { %v2229_v46 = vsub.f32 %v2220_v23, %v2227_v61 }
 0xdae   :  { %2251 = vrot.lane.b32.xlu1 %v2229_v46, %s2775_s30  ;;  %2244 = vrot.lane.b32.xlu0 %v2229_v46, %s2772_s4  ;;  %s2380_s30 = sshll.u32 %s4412_s15, 4  ;;  %s2779_s15 = smov [#allocation4]   ;;  %s2381_s30 = int_to_ptr.hbm [resolvable:$true] %s2380_s30 }
 0xdaf   :  { %s2395_s13 = sshll.u32 %s2779_s15, 4  ;;  %s2396_s13 = int_to_ptr.vmem [resolvable:$true] %s2395_s13 }
 0xdb6   :  { %2259 = vrot.lane.b32.xlu0 %v4245_v63, %s2768_s25  ;;  %v2233_v63 = vmul.f32 %v2231_v45, %v4169_v6  ;;  %s2378_s25 = sshll.u32 %s2776_s5, 4  ;;  %s2379_s25 = int_to_ptr.vmem [resolvable:$true] %s2378_s25 }
 0xdb7   :  { %2386 = dma.vmem_to_hbm [thread:$0]  %s2379_s25, 32, %s2381_s30, [#allocation3], %s2777_s27, %s2777_s27, %s2778_s9  }
 0xdbf   :  { %v2112_v30 = vpop.f32.mrf.mxu2 }
 0xdc0   :  { %2490 = vst.msk [vmem:[%s4413_s16 + $0x40] sm:$0xff] %vm4437_vm14, %v2112_v30  ;;  %vm4452_vm14 = vmmov %vm4438_vm1 }
 0xdc7   :  { %v2115_v22 = vpop.f32.mrf.mxu2 }
 0xdc8   :  { %2491 = vst.msk [vmem:[%s4413_s16 + $0x48] sm:$0xff] %vm4438_vm1, %v2115_v22 }
 0xdcf   :  { %v2118_v57 = vpop.f32.mrf.mxu2 }
 0xdd0   :  { %2492 = vst.msk [vmem:[%s4413_s16 + $0x50] sm:$0xff] %vm4439_vm4, %v2118_v57  ;;  %vm4453_vm4 = vmmov %vm4438_vm1 }
 0xdd3   :  { %v2240_v44 = vpop.permute.xlu1 %2239 }
 0xdd4   :  { %v2242_v5 = vsub.f32 %v2233_v63, %v2240_v44 }
 0xdd6   :  { %2248 = vrot.lane.b32.xlu2 %v2242_v5, %s2772_s4 }
 0xdd7   :  { %v2121_v2 = vpop.f32.mrf.mxu2 }
 0xdd8   :  { %2493 = vst.msk [vmem:[%s4413_s16 + $0x58] sm:$0xff] %vm4440_vm12, %v2121_v2  ;;  %vm4454_vm12 = vmmov %vm4438_vm1 }
 0xddf   :  { %v2124_v50 = vpop.f32.mrf.mxu2 }
 0xde0   :  { %2494 = vst.msk [vmem:[%s4413_s16 + $0x60] sm:$0xff] %vm4441_vm3, %v2124_v50  ;;  %vm4455_vm3 = vmmov %vm4438_vm1 }
 0xe09   :  { %v2127_v60 = vpop.f32.mrf.mxu2 }
 0xe0a   :  { %2495 = vst.msk [vmem:[%s4413_s16 + $0x68] sm:$0x3f] %vm4442_vm0, %v2127_v60  ;;  %vm4456_vm0 = vmmov %vm4438_vm1 }
 0xe20   :  { %v2245_v35 = vpop.permute.xlu0 %2244  ;;  %v2252_v11 = vpop.permute.xlu1 %2251 }
 0xe28   :  { %v2260_v56 = vpop.permute.xlu0 %2259 }
 0xe29   :  { %v2265_v34 = vsel %vm4445_vm6, %v2257_v37, %v2260_v56  ;;  %vm4459_vm6 = vmmov %vm4456_vm0 }
 0xe30   :  { %v2249_v14 = vpop.permute.xlu2 %2248 }
 0xe31   :  { %v2254_v47 = vsel %vm4443_vm10, %v2245_v35, %v2249_v14  ;;  %vm4457_vm10 = vmmov %vm4456_vm0 }
 0xe32   :  { %v2255_v10 = vsel %vm4444_vm15, %v2254_v47, %v2252_v11  ;;  %vm4458_vm15 = vmmov %vm4456_vm0 }
 0xe33   :  { %v2263_v55 = vrot.slane %v2255_v10, 7 }
 0xe35   :  { %v2266_v41 = vsel %vm4446_vm2, %v2265_v34, %v2263_v55  ;;  %vm4460_vm2 = vcmask 21504  }
 0xe36   :  { %2496 = vmatpush.xpose.msk.msrb.mxu3 %vm4447_vm5, %v2266_v41  ;;  %vm4461_vm5 = vcmask 441344  }
 0xe39   :  { %2497 = vmatmul.msk.f32.vlgmr.msrb.gmra.mxu3 %vm4448_vm8, %v2109_v51  ;;  %vm4462_vm8 = vmmov %vm4461_vm5 }
 0xe41   :  { %2498 = vmatmul.msk.f32.gmra.mxu3 %vm4449_vm11, %v2112_v30  ;;  %vm4464_vm11 = vmmov %vm4456_vm0 }
 0xe49   :  { %2499 = vmatmul.msk.f32.gmra.mxu3 %vm4450_vm7, %v2115_v22  ;;  %vm4465_vm7 = vmmov %vm4456_vm0 }
 0xe51   :  { %2500 = vmatmul.msk.f32.gmra.mxu3 %vm4451_vm13, %v2118_v57  ;;  %vm4466_vm13 = vcmask 16384  }
 0xe59   :  { %2501 = vmatmul.msk.f32.gmra.mxu3 %vm4452_vm14, %v2121_v2 }
 0xe61   :  { %2502 = vmatmul.msk.f32.gmra.mxu3 %vm4438_vm1, %v2124_v50 }
 0xe69   :  { %2503 = vmatmul.msk.f32.gmra.mxu3 %vm4453_vm4, %v2127_v60 }
 0xebc   :  { %v2308_v6 = vpop.f32.mrf.mxu3 }
 0xebd   :  { %2504 = vst.msk [vmem:[%s4414_s17 + $0x38] sm:$0xff] %vm4454_vm12, %v2308_v6 }
 0xec4   :  { %v2311_v29 = vpop.f32.mrf.mxu3 }
 0xec5   :  { %2505 = vst.msk [vmem:[%s4414_s17 + $0x40] sm:$0xff] %vm4455_vm3, %v2311_v29 }
 0xecc   :  { %v2314_v54 = vpop.f32.mrf.mxu3 }
 0xecd   :  { %2506 = vst.msk [vmem:[%s4414_s17 + $0x48] sm:$0xff] %vm4456_vm0, %v2314_v54 }
 0xed4   :  { %v2317_v38 = vpop.f32.mrf.mxu3 }
 0xed5   :  { %2507 = vst.msk [vmem:[%s4414_s17 + $0x50] sm:$0xff] %vm4457_vm10, %v2317_v38 }
 0xedc   :  { %v2320_v25 = vpop.f32.mrf.mxu3 }
 0xedd   :  { %2508 = vst.msk [vmem:[%s4414_s17 + $0x58] sm:$0xff] %vm4458_vm15, %v2320_v25 }
 0xee4   :  { %v2323_v49 = vpop.f32.mrf.mxu3 }
 0xee5   :  { %2509 = vst.msk [vmem:[%s4414_s17 + $0x60] sm:$0xff] %vm4459_vm6, %v2323_v49 }
 0xeec   :  { %v2326_v43 = vpop.f32.mrf.mxu3 }
 0xeed   :  { %2510 = vst.msk [vmem:[%s4414_s17 + $0x68] sm:$0x3f] %vm4460_vm2, %v2326_v43  ;;  %2511 = vmatpush.msk.msrb.mxu0 %vm1073_vm9, %v2326_v43  ;;  %vm4463_vm9 = vmmov %vm4461_vm5 }
 0xeef   :  { %2350 = vmatpush.msrb.mxu0 %v2323_v49 }
 0xef1   :  { %2351 = vmatpush.msrb.mxu0 %v2320_v25 }
 0xef3   :  { %2352 = vmatpush.msrb.mxu0 %v2317_v38 }
 0xef5   :  { %2353 = vmatpush.msrb.mxu0 %v2314_v54 }
 0xef7   :  { %2354 = vmatpush.msrb.mxu0 %v2311_v29 }
 0xef9   :  { %2355 = vmatpush.msrb.mxu0 %v2308_v6 }
 0xefa   :  { %2512 = vmatmul.msk.f32.vlgmr.msrb.gmra.mxu0 %vm4461_vm5, %v2709_v17 }
 0xf02   :  { %2513 = vmatmul.msk.f32.gmra.mxu0 %vm4462_vm8, %v2710_v3 }
 0xf0a   :  { %2514 = vmatmul.msk.f32.gmra.mxu0 %vm4463_vm9, %v2711_v8 }
 0xf77   :  { %v2357_v24 = vpop.f32.mrf.mxu0 }
 0xf78   :  { %2367 = vst.msk [vmem:[#allocation4 + $0x18] sm:$0xff] %vm4464_vm11, %v2357_v24 }
 0xf7f   :  { %v2360_v59 = vpop.f32.mrf.mxu0 }
 0xf80   :  { %2368 = vst.msk [vmem:[#allocation4 + $0x20] sm:$0xff] %vm4465_vm7, %v2360_v59 }
 0xf87   :  { %v2363_v15 = vpop.f32.mrf.mxu0 }
 0xf88   :  { %2369 = vst.msk [vmem:[#allocation4 + $0x28] sm:$0x1] %vm4466_vm13, %v2363_v15 }
 0xf89   :  { %2403 = dma.vmem_to_hbm [thread:$0]  %s2396_s13, 768, %s2398_s28, [#allocation5], %s2780_s12, %s2780_s12, %s2781_s2  }
 0xf8a   :  { %2760 = dma.done.wait [#allocation3], 32  }
 0xf8b   :  { %2761 = vsyncadd [#allocation3], 4294967264 }
 0xf8c   :  { %2762 = dma.done.wait [#allocation5], 768  }
 0xf8d   :  { %2763 = vsyncadd [#allocation5], 4294966528 }
 0xf8e   :  { %2420 = vsyncpa [#allocation3], 1 }
 0xf8f   :  { %2421 = vsyncpa [#allocation5], 1 }

</bundles_post_ra>
